<compile_context>
chip_gen: v7x
topology: tpu7x:2x2x1
jax: 0.10.0
libtpu: 0.0.40
codegen_flags: <defaults>
</compile_context>

<pallas_src>
import functools

import numpy as np
import jax
import jax.numpy as jnp
from jax.experimental import pallas as pl
from jax.experimental.pallas import tpu as pltpu

KSIZE = 5        # conv kernel size (both convs)
PAD = 1          # conv padding (both convs)
C1_OUT = 6       # conv1 output channels
C2_OUT = 16      # conv2 output channels
KIN1 = 128       # conv1 contraction lane width (Wp*C = 102 padded to 128)
NCOL1 = 256      # conv1 output width: two column-parity halves of 128
NCOL2 = 256      # conv2 output width: 13*16 = 208 padded to 256 (lane dense)
FC_PAD = 128     # lane-dense padded fc widths (120 / 84 / 10 -> 128)
R16 = 16         # per-image row window stacked into the MXU M dimension
SLAB = 32        # per-image pooled-slab rows (sublane aligned) in VMEM scratch
POOL_BASE = 8    # pooled row q lives at slab row POOL_BASE + q (aligned store)
B_TILE = 8       # images per features grid step -> conv M = 128 (256 merged)


def _round_up(a, b):
    return (a + b - 1) // b * b


def _derive_dims(input_shape):
    c, h, w = input_shape
    hp, wp = h + 2 * PAD, w + 2 * PAD
    ho1, wo1 = hp - KSIZE + 1, wp - KSIZE + 1
    assert ho1 % 2 == 0 and wo1 % 2 == 0, "conv1 output must pool evenly"
    hh, wh = ho1 // 2, wo1 // 2                       # pooled H, W (15, 15)
    ho2, wo2 = hh + 2 * PAD - KSIZE + 1, wh + 2 * PAD - KSIZE + 1   # (13, 13)
    rows_half = (KSIZE - 1) // 2 + R16                # rows per row-parity plane
    assert wp * c <= KIN1
    assert C1_OUT * wh <= 128
    assert C2_OUT * wo2 <= NCOL2
    assert hh <= R16 - 1 and ho2 <= R16
    assert 2 * rows_half >= hp
    assert POOL_BASE - 1 + (KSIZE - 1) + R16 <= SLAB
    return dict(c=c, h=h, w=w, hp=hp, wp=wp, hh=hh, wh=wh, ho2=ho2, wo2=wo2,
                rows_half=rows_half)


# ----------------------------------------------------------------------------
# Pallas kernels
# ----------------------------------------------------------------------------
def _features_kernel(x_ref, b1_ref, c1b_ref, b2_ref, c2b_ref, o_ref,
                     y1_scr, p_scr, *, bt, hh):
    """conv1+ReLU -> 2x2/2 maxpool -> conv2+ReLU for bt images per grid step.

    x_ref : (bt, 2, rows_half, 128) bf16  padded input rows split by row parity
    b1_ref: (5*128, 256) bf16  conv1 banded matmul, band offsets stacked along K
    b2_ref: (5*128, 256) bf16  conv2 banded matmul (W padding folded in)
    o_ref : (bt*16, 256) bf16  lane-dense conv2 output (rows 13..15/img garbage,
                               zeroed out later by zero rows of the fc1 weight)
    y1_scr: (2*bt*16, 256) f32 conv1 pre-activations (even rows then odd rows)
    p_scr : (bt, 32, 128) bf16 per-image pooled slabs with zero guard rows
    """
    mb = bt * R16

    # ---- conv1: one banded (Toeplitz) matmul; images stacked along M,
    #      the 5 kernel-row offsets concatenated along K, even & odd output
    #      rows stacked along M (single MXU pass, accumulation inside the MXU).
    def band_block(par, r0):
        return jnp.concatenate(
            [x_ref[b, par, r0:r0 + R16, :] for b in range(bt)], axis=0)

    lhs_e = jnp.concatenate(
        [band_block(d % 2, d // 2) for d in range(KSIZE)], axis=1)
    lhs_o = jnp.concatenate(
        [band_block((d + 1) % 2, (d + 1) // 2) for d in range(KSIZE)], axis=1)
    lhs1 = jnp.concatenate([lhs_e, lhs_o], axis=0)        # (2*mb, 640) bf16
    y1_scr[...] = jnp.dot(lhs1, b1_ref[...], preferred_element_type=jnp.float32)

    # ---- bias + ReLU + fused 2x2/stride-2 max pool:
    #      rows via the even/odd M halves, cols via the 128-aligned lane halves.
    m = jnp.maximum(y1_scr[0:mb, :], y1_scr[mb:2 * mb, :]) + c1b_ref[...]
    m = jnp.maximum(m, 0.0)
    pooled = jnp.maximum(m[:, :128], m[:, 128:])          # (mb, 128) f32
    # zero the per-image garbage row (it must act as conv2's bottom H-pad row)
    row_in_img = jnp.bitwise_and(
        jax.lax.broadcasted_iota(jnp.int32, (mb, 128), 0), R16 - 1)
    pooled = jnp.where(row_in_img < hh, pooled, 0.0).astype(p_scr.dtype)

    # ---- pooled map -> per-image slabs.  Guard rows are rewritten every step
    #      with two 8-row-aligned stores (no @pl.when init -> megacore safe),
    #      the pooled store itself starts at the aligned slab row 8.
    zpad = jnp.zeros((bt, POOL_BASE, 128), p_scr.dtype)
    p_scr[:, 0:POOL_BASE, :] = zpad
    p_scr[:, POOL_BASE + R16:SLAB, :] = zpad
    for b in range(bt):
        p_scr[b, POOL_BASE:POOL_BASE + R16, :] = pooled[b * R16:(b + 1) * R16, :]

    # ---- conv2: one banded matmul over the pooled slabs (H pad = guard rows,
    #      W pad folded into b2).
    lhs2 = jnp.concatenate(
        [jnp.concatenate(
            [p_scr[b, POOL_BASE - 1 + d:POOL_BASE - 1 + d + R16, :]
             for b in range(bt)], axis=0)
         for d in range(KSIZE)], axis=1)                  # (mb, 640) bf16
    y2 = jnp.dot(lhs2, b2_ref[...], preferred_element_type=jnp.float32)
    o_ref[...] = jnp.maximum(y2 + c2b_ref[...], 0.0).astype(o_ref.dtype)


def _classifier_kernel(f_ref, w1_ref, b1_ref, w2_ref, b2_ref, w3_ref, b3_ref,
                       o_ref):
    """fc1+ReLU -> fc2+ReLU -> fc3+softmax for one batch tile; weights are
    pre-transposed / permuted / lane-padded bf16 and stay VMEM resident."""
    h = jnp.dot(f_ref[...], w1_ref[...], preferred_element_type=jnp.float32)
    h = jnp.maximum(h + b1_ref[...], 0.0)
    h = jnp.dot(h.astype(jnp.bfloat16), w2_ref[...],
                preferred_element_type=jnp.float32)
    h = jnp.maximum(h + b2_ref[...], 0.0)
    logits = jnp.dot(h.astype(jnp.bfloat16), w3_ref[...],
                     preferred_element_type=jnp.float32) + b3_ref[...]
    # padded logit columns carry a -1e30 f32 bias -> exp() == 0 exactly
    m = jnp.max(logits, axis=-1, keepdims=True)
    e = jnp.exp(logits - m)
    o_ref[...] = e / jnp.sum(e, axis=-1, keepdims=True)   # exact softmax


# ----------------------------------------------------------------------------
# pallas_call wrappers
# ----------------------------------------------------------------------------
def features_forward(packed, x):
    n, c, h, w = x.shape
    d = _derive_dims((c, h, w))
    rows_half = d["rows_half"]
    n1 = _round_up(max(n, 1), B_TILE)

    # thin XLA layout glue on the original-sized input (no im2col expansion):
    # pad batch/H/W -> channels-minor rows -> lane pad to 128 -> parity split
    xp = jnp.pad(x, ((0, n1 - n), (0, 0),
                     (PAD, 2 * rows_half - h - PAD), (PAD, PAD)))
    x3 = xp.transpose(0, 2, 3, 1).reshape(n1, 2 * rows_half, d["wp"] * c)
    x3 = jnp.pad(x3, ((0, 0), (0, 0), (0, KIN1 - d["wp"] * c)))
    x3 = x3.reshape(n1, rows_half, 2, KIN1).transpose(0, 2, 1, 3)
    x3 = x3.astype(jnp.bfloat16)

    kernel = functools.partial(_features_kernel, bt=B_TILE, hh=d["hh"])
    feats = pl.pallas_call(
        kernel,
        out_shape=jax.ShapeDtypeStruct((n1 * R16, NCOL2), jnp.bfloat16),
        grid=(n1 // B_TILE,),
        in_specs=[
            pl.BlockSpec((B_TILE, 2, rows_half, KIN1), lambda i: (i, 0, 0, 0)),
            pl.BlockSpec(packed["B1"].shape, lambda i: (0, 0)),
            pl.BlockSpec(packed["c1b"].shape, lambda i: (0, 0)),
            pl.BlockSpec(packed["B2"].shape, lambda i: (0, 0)),
            pl.BlockSpec(packed["c2b"].shape, lambda i: (0, 0)),
        ],
        out_specs=pl.BlockSpec((B_TILE * R16, NCOL2), lambda i: (i, 0)),
        scratch_shapes=[
            pltpu.VMEM((2 * B_TILE * R16, NCOL1), jnp.float32),
            pltpu.VMEM((B_TILE, SLAB, 128), jnp.bfloat16),
        ],
        compiler_params=pltpu.CompilerParams(
            dimension_semantics=("parallel",)),
    )(x3, packed["B1"], packed["c1b"], packed["B2"], packed["c2b"])

    # (n1*16, 256) -> (n1, 4096): contiguous, garbage rows handled by zero rows
    # in the packed fc1 weight.
    return feats.reshape(n1, R16 * NCOL2)


def classifier_forward(packed, feats):
    n, dfeat = feats.shape
    tb = min(256, n)                       # batch tile; weights stay resident
    n2 = _round_up(n, tb)
    if n2 != n:
        feats = jnp.pad(feats, ((0, n2 - n), (0, 0)))
    return pl.pallas_call(
        _classifier_kernel,
        out_shape=jax.ShapeDtypeStruct((n2, FC_PAD), jnp.float32),
        grid=(n2 // tb,),
        in_specs=[
            pl.BlockSpec((tb, dfeat), lambda i: (i, 0)),
            pl.BlockSpec(packed["W1"].shape, lambda i: (0, 0)),
            pl.BlockSpec(packed["b1"].shape, lambda i: (0, 0)),
            pl.BlockSpec(packed["W2"].shape, lambda i: (0, 0)),
            pl.BlockSpec(packed["b2"].shape, lambda i: (0, 0)),
            pl.BlockSpec(packed["W3"].shape, lambda i: (0, 0)),
            pl.BlockSpec(packed["b3"].shape, lambda i: (0, 0)),
        ],
        out_specs=pl.BlockSpec((tb, FC_PAD), lambda i: (i, 0)),
        compiler_params=pltpu.CompilerParams(
            dimension_semantics=("parallel",)),
    )(feats, packed["W1"], packed["b1"], packed["W2"], packed["b2"],
      packed["W3"], packed["b3"])


@functools.partial(jax.jit, static_argnames=("num_classes",))
def cifar_cnn_forward(packed, x, *, num_classes=10):
    n = x.shape[0]
    feats = features_forward(packed, x)          # (n1, 4096) bf16, lane-dense
    probs = classifier_forward(packed, feats)    # (n2, 128)  f32, lane-dense
    return probs[:n, :num_classes]               # slice padding outside


# ----------------------------------------------------------------------------
# Parameters: torch-layout init + one-time packing into kernel layouts
# ----------------------------------------------------------------------------
def init_params(key, input_shape=(3, 32, 32), num_classes=10):
    c, h, w = input_shape
    h1, w1 = h + 2 - 4, w + 2 - 4          # conv1 output (k=5, p=1)
    h2, w2 = h1 // 2, w1 // 2              # maxpool 2x2
    h3, w3 = h2 + 2 - 4, w2 + 2 - 4        # conv2 output
    num_features = 16 * h3 * w3

    ks = jax.random.split(key, 10)

    def rnd(k, shape, fan_in):
        return jax.random.normal(k, shape, jnp.float32) * (1.0 / jnp.sqrt(fan_in))

    return {
        "conv1_w": rnd(ks[0], (6, c, 5, 5), c * 25),
        "conv1_b": rnd(ks[1], (6,), c * 25),
        "conv2_w": rnd(ks[2], (16, 6, 5, 5), 6 * 25),
        "conv2_b": rnd(ks[3], (16,), 6 * 25),
        "fc1_w": rnd(ks[4], (120, num_features), num_features),
        "fc1_b": rnd(ks[5], (120,), num_features),
        "fc2_w": rnd(ks[6], (84, 120), 120),
        "fc2_b": rnd(ks[7], (84,), 120),
        "fc3_w": rnd(ks[8], (num_classes, 84), 84),
        "fc3_b": rnd(ks[9], (num_classes,), 84),
    }


def prepare_params(params, input_shape=(3, 32, 32), num_classes=10):
    """One-time packing: banded conv matmul matrices (band offsets stacked along
    K), pooled layout, and pre-transposed / permuted / lane-padded bf16 FC
    weights (with zero rows for the per-image garbage feature positions)."""
    d = _derive_dims(input_shape)
    c = input_shape[0]
    wh, hh, ho2, wo2 = d["wh"], d["hh"], d["ho2"], d["wo2"]

    w1 = np.asarray(params["conv1_w"], np.float32)
    b1 = np.asarray(params["conv1_b"], np.float32)
    w2 = np.asarray(params["conv2_w"], np.float32)
    b2 = np.asarray(params["conv2_b"], np.float32)

    # conv1 banded matrix: lhs lane = (w_in, channel) of one padded input row,
    # out column = col_parity*128 + out_channel*wh + pooled_w.
    B1 = np.zeros((KSIZE, KIN1, NCOL1), np.float32)
    di, dj, par, o, wq, cc = np.meshgrid(
        np.arange(KSIZE), np.arange(KSIZE), np.arange(2), np.arange(C1_OUT),
        np.arange(wh), np.arange(c), indexing="ij")
    wcol = 2 * wq + par + dj
    B1[di, wcol * c + cc, par * 128 + o * wh + wq] = w1[o, cc, di, dj]
    B1 = B1.reshape(KSIZE * KIN1, NCOL1)
    ob = np.zeros((128,), np.float32)
    ob[: C1_OUT * wh] = np.repeat(b1, wh)
    c1b = np.concatenate([ob, ob])[None, :]

    # conv2 banded matrix on the pooled map (lanes laid out (channel, w')); the
    # W zero-padding is folded in, H padding comes from the slab guard rows.
    cin2 = w2.shape[1]
    B2 = np.zeros((KSIZE, 128, NCOL2), np.float32)
    di, dj, o, wo, cc = np.meshgrid(
        np.arange(KSIZE), np.arange(KSIZE), np.arange(C2_OUT), np.arange(wo2),
        np.arange(cin2), indexing="ij")
    wq = wo + dj - PAD
    valid = (wq >= 0) & (wq < wh)
    B2[di[valid], (cc * wh + wq)[valid], (wo * C2_OUT + o)[valid]] = \
        w2[o[valid], cc[valid], di[valid], dj[valid]]
    B2 = B2.reshape(KSIZE * 128, NCOL2)
    c2b = np.zeros((NCOL2,), np.float32)
    c2b[: wo2 * C2_OUT] = np.tile(b2, wo2)
    c2b = c2b[None, :]

    # FC weights: (K, N) pre-transposed, permuted from torch's (c, h, w) flatten
    # to the kernel's 16x256-per-image feature layout; garbage rows / padded
    # lanes map to zero rows -> they contribute nothing.
    fw1 = np.asarray(params["fc1_w"], np.float32)
    fb1 = np.asarray(params["fc1_b"], np.float32)
    fw2 = np.asarray(params["fc2_w"], np.float32)
    fb2 = np.asarray(params["fc2_b"], np.float32)
    fw3 = np.asarray(params["fc3_w"], np.float32)
    fb3 = np.asarray(params["fc3_b"], np.float32)
    assert num_classes <= FC_PAD and fw1.shape[0] <= FC_PAD
    assert fw2.shape[0] <= FC_PAD and fw3.shape[1] <= FC_PAD

    d_in = R16 * NCOL2
    W1 = np.zeros((d_in, FC_PAD), np.float32)
    ch, hi, wi = np.meshgrid(np.arange(C2_OUT), np.arange(ho2), np.arange(wo2),
                             indexing="ij")
    src = (ch * (ho2 * wo2) + hi * wo2 + wi).ravel()       # torch flatten index
    dst = (hi * NCOL2 + wi * C2_OUT + ch).ravel()          # kernel feature index
    W1[dst, : fw1.shape[0]] = fw1[:, src].T
    b1r = np.zeros((FC_PAD,), np.float32)
    b1r[: fb1.shape[0]] = fb1

    W2 = np.zeros((FC_PAD, FC_PAD), np.float32)
    W2[: fw2.shape[1], : fw2.shape[0]] = fw2.T
    b2r = np.zeros((FC_PAD,), np.float32)
    b2r[: fb2.shape[0]] = fb2

    W3 = np.zeros((FC_PAD, FC_PAD), np.float32)
    W3[: fw3.shape[1], : fw3.shape[0]] = fw3.T
    b3r = np.full((FC_PAD,), -1e30, np.float32)   # mask padded softmax columns
    b3r[: fb3.shape[0]] = fb3                     # (kept in f32 on purpose)

    return {
        "B1": jnp.asarray(B1, jnp.bfloat16),
        "c1b": jnp.asarray(c1b),
        "B2": jnp.asarray(B2, jnp.bfloat16),
        "c2b": jnp.asarray(c2b),
        "W1": jnp.asarray(W1, jnp.bfloat16),
        "b1": jnp.asarray(b1r[None, :]),
        "W2": jnp.asarray(W2, jnp.bfloat16),
        "b2": jnp.asarray(b2r[None, :]),
        "W3": jnp.asarray(W3, jnp.bfloat16),
        "b3": jnp.asarray(b3r[None, :]),
    }


# ----------------------------------------------------------------------------
# Pure-JAX reference (f32) for a correctness cross-check
# ----------------------------------------------------------------------------
def reference_forward(params, x):
    def conv(x, w, b):
        y = jax.lax.conv_general_dilated(
            x, w, window_strides=(1, 1), padding=((PAD, PAD), (PAD, PAD)),
            dimension_numbers=("NCHW", "OIHW", "NCHW"))
        return jax.nn.relu(y + b[None, :, None, None])

    y = conv(x, params["conv1_w"], params["conv1_b"])
    n, c, h, w = y.shape
    y = y[:, :, : (h // 2) * 2, : (w // 2) * 2]
    y = y.reshape(n, c, h // 2, 2, w // 2, 2).max(axis=(3, 5))
    y = conv(y, params["conv2_w"], params["conv2_b"])
    y = y.reshape(n, -1)
    y = jax.nn.relu(y @ params["fc1_w"].T + params["fc1_b"])
    y = jax.nn.relu(y @ params["fc2_w"].T + params["fc2_b"])
    y = y @ params["fc3_w"].T + params["fc3_b"]
    return jax.nn.softmax(y, axis=-1)


if __name__ == "__main__":
    key = jax.random.PRNGKey(0)
    k_par, k_inp = jax.random.split(key)

    input_shape = (3, 32, 32)      # module default (C, H, W)
    batch = 2
    num_classes = 10

    params = init_params(k_par, input_shape=input_shape, num_classes=num_classes)
    packed = prepare_params(params, input_shape=input_shape,
                            num_classes=num_classes)
    x = jax.random.normal(k_inp, (batch, *input_shape), jnp.float32)

    out = cifar_cnn_forward(packed, x, num_classes=num_classes)
    out = jax.block_until_ready(out)

    assert out.shape == (batch, num_classes), out.shape
    # exact softmax -> rows sum to 1 within f32 roundoff
    assert bool(jnp.all(jnp.abs(jnp.sum(out, axis=-1) - 1.0) < 1e-3))
    # cross-check against a pure-JAX f32 reference (bf16 MXU path -> loose tol)
    ref = reference_forward(params, x)
    max_err = float(jnp.max(jnp.abs(out - ref)))
    assert max_err < 0.08, f"max |out-ref| = {max_err}"
    print("KERNEL_OK")
</pallas_src>

<mosaic_0001>
module attributes {stable_mosaic.version = 11 : i64} {
  func.func @_features_kernel(%arg0: i32, %arg1: memref<8x2x18x128xbf16, #tpu.memory_space<vmem>>, %arg2: memref<640x256xbf16, #tpu.memory_space<vmem>>, %arg3: memref<1x256xf32, #tpu.memory_space<vmem>>, %arg4: memref<640x256xbf16, #tpu.memory_space<vmem>>, %arg5: memref<1x256xf32, #tpu.memory_space<vmem>>, %arg6: memref<128x256xbf16, #tpu.memory_space<vmem>>, %arg7: memref<256x256xf32, #tpu.memory_space<vmem>>, %arg8: memref<8x32x128xbf16, #tpu.memory_space<vmem>>) attributes {dimension_semantics = [#tpu.dimension_semantics<parallel>], iteration_bounds = array<i64: 1>, scalar_prefetch = 0 : i64, scratch_operands = 2 : i64, tpu.core_type = #tpu.core_type<tc>, window_params = [{transform_indices = @transform_0, window_bounds = array<i64: 8, 2, 18, 128>}, {pipeline_mode = #tpu.pipeline_mode<synchronous>, transform_indices = @transform_1, window_bounds = array<i64: 640, 256>}, {pipeline_mode = #tpu.pipeline_mode<synchronous>, transform_indices = @transform_2, window_bounds = array<i64: 1, 256>}, {pipeline_mode = #tpu.pipeline_mode<synchronous>, transform_indices = @transform_3, window_bounds = array<i64: 640, 256>}, {pipeline_mode = #tpu.pipeline_mode<synchronous>, transform_indices = @transform_4, window_bounds = array<i64: 1, 256>}, {transform_indices = @transform_5, window_bounds = array<i64: 128, 256>}]} {
    %c0 = arith.constant 0 : index
    %c0_0 = arith.constant 0 : index
    %c0_1 = arith.constant 0 : index
    %c0_2 = arith.constant 0 : index
    %0 = vector.load %arg1[%c0, %c0_0, %c0_1, %c0_2] : memref<8x2x18x128xbf16, #tpu.memory_space<vmem>>, vector<1x1x16x128xbf16>
    %1 = vector.shape_cast %0 : vector<1x1x16x128xbf16> to vector<16x128xbf16>
    %c1 = arith.constant 1 : index
    %c0_3 = arith.constant 0 : index
    %c0_4 = arith.constant 0 : index
    %c0_5 = arith.constant 0 : index
    %2 = vector.load %arg1[%c1, %c0_3, %c0_4, %c0_5] : memref<8x2x18x128xbf16, #tpu.memory_space<vmem>>, vector<1x1x16x128xbf16>
    %3 = vector.shape_cast %2 : vector<1x1x16x128xbf16> to vector<16x128xbf16>
    %c2 = arith.constant 2 : index
    %c0_6 = arith.constant 0 : index
    %c0_7 = arith.constant 0 : index
    %c0_8 = arith.constant 0 : index
    %4 = vector.load %arg1[%c2, %c0_6, %c0_7, %c0_8] : memref<8x2x18x128xbf16, #tpu.memory_space<vmem>>, vector<1x1x16x128xbf16>
    %5 = vector.shape_cast %4 : vector<1x1x16x128xbf16> to vector<16x128xbf16>
    %c3 = arith.constant 3 : index
    %c0_9 = arith.constant 0 : index
    %c0_10 = arith.constant 0 : index
    %c0_11 = arith.constant 0 : index
    %6 = vector.load %arg1[%c3, %c0_9, %c0_10, %c0_11] : memref<8x2x18x128xbf16, #tpu.memory_space<vmem>>, vector<1x1x16x128xbf16>
    %7 = vector.shape_cast %6 : vector<1x1x16x128xbf16> to vector<16x128xbf16>
    %c4 = arith.constant 4 : index
    %c0_12 = arith.constant 0 : index
    %c0_13 = arith.constant 0 : index
    %c0_14 = arith.constant 0 : index
    %8 = vector.load %arg1[%c4, %c0_12, %c0_13, %c0_14] : memref<8x2x18x128xbf16, #tpu.memory_space<vmem>>, vector<1x1x16x128xbf16>
    %9 = vector.shape_cast %8 : vector<1x1x16x128xbf16> to vector<16x128xbf16>
    %c5 = arith.constant 5 : index
    %c0_15 = arith.constant 0 : index
    %c0_16 = arith.constant 0 : index
    %c0_17 = arith.constant 0 : index
    %10 = vector.load %arg1[%c5, %c0_15, %c0_16, %c0_17] : memref<8x2x18x128xbf16, #tpu.memory_space<vmem>>, vector<1x1x16x128xbf16>
    %11 = vector.shape_cast %10 : vector<1x1x16x128xbf16> to vector<16x128xbf16>
    %c6 = arith.constant 6 : index
    %c0_18 = arith.constant 0 : index
    %c0_19 = arith.constant 0 : index
    %c0_20 = arith.constant 0 : index
    %12 = vector.load %arg1[%c6, %c0_18, %c0_19, %c0_20] : memref<8x2x18x128xbf16, #tpu.memory_space<vmem>>, vector<1x1x16x128xbf16>
    %13 = vector.shape_cast %12 : vector<1x1x16x128xbf16> to vector<16x128xbf16>
    %c7 = arith.constant 7 : index
    %c0_21 = arith.constant 0 : index
    %c0_22 = arith.constant 0 : index
    %c0_23 = arith.constant 0 : index
    %14 = vector.load %arg1[%c7, %c0_21, %c0_22, %c0_23] : memref<8x2x18x128xbf16, #tpu.memory_space<vmem>>, vector<1x1x16x128xbf16>
    %15 = vector.shape_cast %14 : vector<1x1x16x128xbf16> to vector<16x128xbf16>
    %16 = tpu.concatenate %1, %3, %5, %7, %9, %11, %13, %15 in 0 : vector<16x128xbf16>, vector<16x128xbf16>, vector<16x128xbf16>, vector<16x128xbf16>, vector<16x128xbf16>, vector<16x128xbf16>, vector<16x128xbf16>, vector<16x128xbf16> -> vector<128x128xbf16>
    %c0_24 = arith.constant 0 : index
    %c1_25 = arith.constant 1 : index
    %c0_26 = arith.constant 0 : index
    %c0_27 = arith.constant 0 : index
    %17 = vector.load %arg1[%c0_24, %c1_25, %c0_26, %c0_27] : memref<8x2x18x128xbf16, #tpu.memory_space<vmem>>, vector<1x1x16x128xbf16>
    %18 = vector.shape_cast %17 : vector<1x1x16x128xbf16> to vector<16x128xbf16>
    %c1_28 = arith.constant 1 : index
    %c1_29 = arith.constant 1 : index
    %c0_30 = arith.constant 0 : index
    %c0_31 = arith.constant 0 : index
    %19 = vector.load %arg1[%c1_28, %c1_29, %c0_30, %c0_31] : memref<8x2x18x128xbf16, #tpu.memory_space<vmem>>, vector<1x1x16x128xbf16>
    %20 = vector.shape_cast %19 : vector<1x1x16x128xbf16> to vector<16x128xbf16>
    %c2_32 = arith.constant 2 : index
    %c1_33 = arith.constant 1 : index
    %c0_34 = arith.constant 0 : index
    %c0_35 = arith.constant 0 : index
    %21 = vector.load %arg1[%c2_32, %c1_33, %c0_34, %c0_35] : memref<8x2x18x128xbf16, #tpu.memory_space<vmem>>, vector<1x1x16x128xbf16>
    %22 = vector.shape_cast %21 : vector<1x1x16x128xbf16> to vector<16x128xbf16>
    %c3_36 = arith.constant 3 : index
    %c1_37 = arith.constant 1 : index
    %c0_38 = arith.constant 0 : index
    %c0_39 = arith.constant 0 : index
    %23 = vector.load %arg1[%c3_36, %c1_37, %c0_38, %c0_39] : memref<8x2x18x128xbf16, #tpu.memory_space<vmem>>, vector<1x1x16x128xbf16>
    %24 = vector.shape_cast %23 : vector<1x1x16x128xbf16> to vector<16x128xbf16>
    %c4_40 = arith.constant 4 : index
    %c1_41 = arith.constant 1 : index
    %c0_42 = arith.constant 0 : index
    %c0_43 = arith.constant 0 : index
    %25 = vector.load %arg1[%c4_40, %c1_41, %c0_42, %c0_43] : memref<8x2x18x128xbf16, #tpu.memory_space<vmem>>, vector<1x1x16x128xbf16>
    %26 = vector.shape_cast %25 : vector<1x1x16x128xbf16> to vector<16x128xbf16>
    %c5_44 = arith.constant 5 : index
    %c1_45 = arith.constant 1 : index
    %c0_46 = arith.constant 0 : index
    %c0_47 = arith.constant 0 : index
    %27 = vector.load %arg1[%c5_44, %c1_45, %c0_46, %c0_47] : memref<8x2x18x128xbf16, #tpu.memory_space<vmem>>, vector<1x1x16x128xbf16>
    %28 = vector.shape_cast %27 : vector<1x1x16x128xbf16> to vector<16x128xbf16>
    %c6_48 = arith.constant 6 : index
    %c1_49 = arith.constant 1 : index
    %c0_50 = arith.constant 0 : index
    %c0_51 = arith.constant 0 : index
    %29 = vector.load %arg1[%c6_48, %c1_49, %c0_50, %c0_51] : memref<8x2x18x128xbf16, #tpu.memory_space<vmem>>, vector<1x1x16x128xbf16>
    %30 = vector.shape_cast %29 : vector<1x1x16x128xbf16> to vector<16x128xbf16>
    %c7_52 = arith.constant 7 : index
    %c1_53 = arith.constant 1 : index
    %c0_54 = arith.constant 0 : index
    %c0_55 = arith.constant 0 : index
    %31 = vector.load %arg1[%c7_52, %c1_53, %c0_54, %c0_55] : memref<8x2x18x128xbf16, #tpu.memory_space<vmem>>, vector<1x1x16x128xbf16>
    %32 = vector.shape_cast %31 : vector<1x1x16x128xbf16> to vector<16x128xbf16>
    %33 = tpu.concatenate %18, %20, %22, %24, %26, %28, %30, %32 in 0 : vector<16x128xbf16>, vector<16x128xbf16>, vector<16x128xbf16>, vector<16x128xbf16>, vector<16x128xbf16>, vector<16x128xbf16>, vector<16x128xbf16>, vector<16x128xbf16> -> vector<128x128xbf16>
    %c0_56 = arith.constant 0 : index
    %c0_57 = arith.constant 0 : index
    %c1_58 = arith.constant 1 : index
    %c0_59 = arith.constant 0 : index
    %34 = vector.load %arg1[%c0_56, %c0_57, %c1_58, %c0_59] : memref<8x2x18x128xbf16, #tpu.memory_space<vmem>>, vector<1x1x16x128xbf16>
    %35 = vector.shape_cast %34 : vector<1x1x16x128xbf16> to vector<16x128xbf16>
    %c1_60 = arith.constant 1 : index
    %c0_61 = arith.constant 0 : index
    %c1_62 = arith.constant 1 : index
    %c0_63 = arith.constant 0 : index
    %36 = vector.load %arg1[%c1_60, %c0_61, %c1_62, %c0_63] : memref<8x2x18x128xbf16, #tpu.memory_space<vmem>>, vector<1x1x16x128xbf16>
    %37 = vector.shape_cast %36 : vector<1x1x16x128xbf16> to vector<16x128xbf16>
    %c2_64 = arith.constant 2 : index
    %c0_65 = arith.constant 0 : index
    %c1_66 = arith.constant 1 : index
    %c0_67 = arith.constant 0 : index
    %38 = vector.load %arg1[%c2_64, %c0_65, %c1_66, %c0_67] : memref<8x2x18x128xbf16, #tpu.memory_space<vmem>>, vector<1x1x16x128xbf16>
    %39 = vector.shape_cast %38 : vector<1x1x16x128xbf16> to vector<16x128xbf16>
    %c3_68 = arith.constant 3 : index
    %c0_69 = arith.constant 0 : index
    %c1_70 = arith.constant 1 : index
    %c0_71 = arith.constant 0 : index
    %40 = vector.load %arg1[%c3_68, %c0_69, %c1_70, %c0_71] : memref<8x2x18x128xbf16, #tpu.memory_space<vmem>>, vector<1x1x16x128xbf16>
    %41 = vector.shape_cast %40 : vector<1x1x16x128xbf16> to vector<16x128xbf16>
    %c4_72 = arith.constant 4 : index
    %c0_73 = arith.constant 0 : index
    %c1_74 = arith.constant 1 : index
    %c0_75 = arith.constant 0 : index
    %42 = vector.load %arg1[%c4_72, %c0_73, %c1_74, %c0_75] : memref<8x2x18x128xbf16, #tpu.memory_space<vmem>>, vector<1x1x16x128xbf16>
    %43 = vector.shape_cast %42 : vector<1x1x16x128xbf16> to vector<16x128xbf16>
    %c5_76 = arith.constant 5 : index
    %c0_77 = arith.constant 0 : index
    %c1_78 = arith.constant 1 : index
    %c0_79 = arith.constant 0 : index
    %44 = vector.load %arg1[%c5_76, %c0_77, %c1_78, %c0_79] : memref<8x2x18x128xbf16, #tpu.memory_space<vmem>>, vector<1x1x16x128xbf16>
    %45 = vector.shape_cast %44 : vector<1x1x16x128xbf16> to vector<16x128xbf16>
    %c6_80 = arith.constant 6 : index
    %c0_81 = arith.constant 0 : index
    %c1_82 = arith.constant 1 : index
    %c0_83 = arith.constant 0 : index
    %46 = vector.load %arg1[%c6_80, %c0_81, %c1_82, %c0_83] : memref<8x2x18x128xbf16, #tpu.memory_space<vmem>>, vector<1x1x16x128xbf16>
    %47 = vector.shape_cast %46 : vector<1x1x16x128xbf16> to vector<16x128xbf16>
    %c7_84 = arith.constant 7 : index
    %c0_85 = arith.constant 0 : index
    %c1_86 = arith.constant 1 : index
    %c0_87 = arith.constant 0 : index
    %48 = vector.load %arg1[%c7_84, %c0_85, %c1_86, %c0_87] : memref<8x2x18x128xbf16, #tpu.memory_space<vmem>>, vector<1x1x16x128xbf16>
    %49 = vector.shape_cast %48 : vector<1x1x16x128xbf16> to vector<16x128xbf16>
    %50 = tpu.concatenate %35, %37, %39, %41, %43, %45, %47, %49 in 0 : vector<16x128xbf16>, vector<16x128xbf16>, vector<16x128xbf16>, vector<16x128xbf16>, vector<16x128xbf16>, vector<16x128xbf16>, vector<16x128xbf16>, vector<16x128xbf16> -> vector<128x128xbf16>
    %c0_88 = arith.constant 0 : index
    %c1_89 = arith.constant 1 : index
    %c1_90 = arith.constant 1 : index
    %c0_91 = arith.constant 0 : index
    %51 = vector.load %arg1[%c0_88, %c1_89, %c1_90, %c0_91] : memref<8x2x18x128xbf16, #tpu.memory_space<vmem>>, vector<1x1x16x128xbf16>
    %52 = vector.shape_cast %51 : vector<1x1x16x128xbf16> to vector<16x128xbf16>
    %c1_92 = arith.constant 1 : index
    %c1_93 = arith.constant 1 : index
    %c1_94 = arith.constant 1 : index
    %c0_95 = arith.constant 0 : index
    %53 = vector.load %arg1[%c1_92, %c1_93, %c1_94, %c0_95] : memref<8x2x18x128xbf16, #tpu.memory_space<vmem>>, vector<1x1x16x128xbf16>
    %54 = vector.shape_cast %53 : vector<1x1x16x128xbf16> to vector<16x128xbf16>
    %c2_96 = arith.constant 2 : index
    %c1_97 = arith.constant 1 : index
    %c1_98 = arith.constant 1 : index
    %c0_99 = arith.constant 0 : index
    %55 = vector.load %arg1[%c2_96, %c1_97, %c1_98, %c0_99] : memref<8x2x18x128xbf16, #tpu.memory_space<vmem>>, vector<1x1x16x128xbf16>
    %56 = vector.shape_cast %55 : vector<1x1x16x128xbf16> to vector<16x128xbf16>
    %c3_100 = arith.constant 3 : index
    %c1_101 = arith.constant 1 : index
    %c1_102 = arith.constant 1 : index
    %c0_103 = arith.constant 0 : index
    %57 = vector.load %arg1[%c3_100, %c1_101, %c1_102, %c0_103] : memref<8x2x18x128xbf16, #tpu.memory_space<vmem>>, vector<1x1x16x128xbf16>
    %58 = vector.shape_cast %57 : vector<1x1x16x128xbf16> to vector<16x128xbf16>
    %c4_104 = arith.constant 4 : index
    %c1_105 = arith.constant 1 : index
    %c1_106 = arith.constant 1 : index
    %c0_107 = arith.constant 0 : index
    %59 = vector.load %arg1[%c4_104, %c1_105, %c1_106, %c0_107] : memref<8x2x18x128xbf16, #tpu.memory_space<vmem>>, vector<1x1x16x128xbf16>
    %60 = vector.shape_cast %59 : vector<1x1x16x128xbf16> to vector<16x128xbf16>
    %c5_108 = arith.constant 5 : index
    %c1_109 = arith.constant 1 : index
    %c1_110 = arith.constant 1 : index
    %c0_111 = arith.constant 0 : index
    %61 = vector.load %arg1[%c5_108, %c1_109, %c1_110, %c0_111] : memref<8x2x18x128xbf16, #tpu.memory_space<vmem>>, vector<1x1x16x128xbf16>
    %62 = vector.shape_cast %61 : vector<1x1x16x128xbf16> to vector<16x128xbf16>
    %c6_112 = arith.constant 6 : index
    %c1_113 = arith.constant 1 : index
    %c1_114 = arith.constant 1 : index
    %c0_115 = arith.constant 0 : index
    %63 = vector.load %arg1[%c6_112, %c1_113, %c1_114, %c0_115] : memref<8x2x18x128xbf16, #tpu.memory_space<vmem>>, vector<1x1x16x128xbf16>
    %64 = vector.shape_cast %63 : vector<1x1x16x128xbf16> to vector<16x128xbf16>
    %c7_116 = arith.constant 7 : index
    %c1_117 = arith.constant 1 : index
    %c1_118 = arith.constant 1 : index
    %c0_119 = arith.constant 0 : index
    %65 = vector.load %arg1[%c7_116, %c1_117, %c1_118, %c0_119] : memref<8x2x18x128xbf16, #tpu.memory_space<vmem>>, vector<1x1x16x128xbf16>
    %66 = vector.shape_cast %65 : vector<1x1x16x128xbf16> to vector<16x128xbf16>
    %67 = tpu.concatenate %52, %54, %56, %58, %60, %62, %64, %66 in 0 : vector<16x128xbf16>, vector<16x128xbf16>, vector<16x128xbf16>, vector<16x128xbf16>, vector<16x128xbf16>, vector<16x128xbf16>, vector<16x128xbf16>, vector<16x128xbf16> -> vector<128x128xbf16>
    %c0_120 = arith.constant 0 : index
    %c0_121 = arith.constant 0 : index
    %c2_122 = arith.constant 2 : index
    %c0_123 = arith.constant 0 : index
    %68 = vector.load %arg1[%c0_120, %c0_121, %c2_122, %c0_123] : memref<8x2x18x128xbf16, #tpu.memory_space<vmem>>, vector<1x1x16x128xbf16>
    %69 = vector.shape_cast %68 : vector<1x1x16x128xbf16> to vector<16x128xbf16>
    %c1_124 = arith.constant 1 : index
    %c0_125 = arith.constant 0 : index
    %c2_126 = arith.constant 2 : index
    %c0_127 = arith.constant 0 : index
    %70 = vector.load %arg1[%c1_124, %c0_125, %c2_126, %c0_127] : memref<8x2x18x128xbf16, #tpu.memory_space<vmem>>, vector<1x1x16x128xbf16>
    %71 = vector.shape_cast %70 : vector<1x1x16x128xbf16> to vector<16x128xbf16>
    %c2_128 = arith.constant 2 : index
    %c0_129 = arith.constant 0 : index
    %c2_130 = arith.constant 2 : index
    %c0_131 = arith.constant 0 : index
    %72 = vector.load %arg1[%c2_128, %c0_129, %c2_130, %c0_131] : memref<8x2x18x128xbf16, #tpu.memory_space<vmem>>, vector<1x1x16x128xbf16>
    %73 = vector.shape_cast %72 : vector<1x1x16x128xbf16> to vector<16x128xbf16>
    %c3_132 = arith.constant 3 : index
    %c0_133 = arith.constant 0 : index
    %c2_134 = arith.constant 2 : index
    %c0_135 = arith.constant 0 : index
    %74 = vector.load %arg1[%c3_132, %c0_133, %c2_134, %c0_135] : memref<8x2x18x128xbf16, #tpu.memory_space<vmem>>, vector<1x1x16x128xbf16>
    %75 = vector.shape_cast %74 : vector<1x1x16x128xbf16> to vector<16x128xbf16>
    %c4_136 = arith.constant 4 : index
    %c0_137 = arith.constant 0 : index
    %c2_138 = arith.constant 2 : index
    %c0_139 = arith.constant 0 : index
    %76 = vector.load %arg1[%c4_136, %c0_137, %c2_138, %c0_139] : memref<8x2x18x128xbf16, #tpu.memory_space<vmem>>, vector<1x1x16x128xbf16>
    %77 = vector.shape_cast %76 : vector<1x1x16x128xbf16> to vector<16x128xbf16>
    %c5_140 = arith.constant 5 : index
    %c0_141 = arith.constant 0 : index
    %c2_142 = arith.constant 2 : index
    %c0_143 = arith.constant 0 : index
    %78 = vector.load %arg1[%c5_140, %c0_141, %c2_142, %c0_143] : memref<8x2x18x128xbf16, #tpu.memory_space<vmem>>, vector<1x1x16x128xbf16>
    %79 = vector.shape_cast %78 : vector<1x1x16x128xbf16> to vector<16x128xbf16>
    %c6_144 = arith.constant 6 : index
    %c0_145 = arith.constant 0 : index
    %c2_146 = arith.constant 2 : index
    %c0_147 = arith.constant 0 : index
    %80 = vector.load %arg1[%c6_144, %c0_145, %c2_146, %c0_147] : memref<8x2x18x128xbf16, #tpu.memory_space<vmem>>, vector<1x1x16x128xbf16>
    %81 = vector.shape_cast %80 : vector<1x1x16x128xbf16> to vector<16x128xbf16>
    %c7_148 = arith.constant 7 : index
    %c0_149 = arith.constant 0 : index
    %c2_150 = arith.constant 2 : index
    %c0_151 = arith.constant 0 : index
    %82 = vector.load %arg1[%c7_148, %c0_149, %c2_150, %c0_151] : memref<8x2x18x128xbf16, #tpu.memory_space<vmem>>, vector<1x1x16x128xbf16>
    %83 = vector.shape_cast %82 : vector<1x1x16x128xbf16> to vector<16x128xbf16>
    %84 = tpu.concatenate %69, %71, %73, %75, %77, %79, %81, %83 in 0 : vector<16x128xbf16>, vector<16x128xbf16>, vector<16x128xbf16>, vector<16x128xbf16>, vector<16x128xbf16>, vector<16x128xbf16>, vector<16x128xbf16>, vector<16x128xbf16> -> vector<128x128xbf16>
    %85 = tpu.concatenate %16, %33, %50, %67, %84 in 1 : vector<128x128xbf16>, vector<128x128xbf16>, vector<128x128xbf16>, vector<128x128xbf16>, vector<128x128xbf16> -> vector<128x640xbf16>
    %c0_152 = arith.constant 0 : index
    %c1_153 = arith.constant 1 : index
    %c0_154 = arith.constant 0 : index
    %c0_155 = arith.constant 0 : index
    %86 = vector.load %arg1[%c0_152, %c1_153, %c0_154, %c0_155] : memref<8x2x18x128xbf16, #tpu.memory_space<vmem>>, vector<1x1x16x128xbf16>
    %87 = vector.shape_cast %86 : vector<1x1x16x128xbf16> to vector<16x128xbf16>
    %c1_156 = arith.constant 1 : index
    %c1_157 = arith.constant 1 : index
    %c0_158 = arith.constant 0 : index
    %c0_159 = arith.constant 0 : index
    %88 = vector.load %arg1[%c1_156, %c1_157, %c0_158, %c0_159] : memref<8x2x18x128xbf16, #tpu.memory_space<vmem>>, vector<1x1x16x128xbf16>
    %89 = vector.shape_cast %88 : vector<1x1x16x128xbf16> to vector<16x128xbf16>
    %c2_160 = arith.constant 2 : index
    %c1_161 = arith.constant 1 : index
    %c0_162 = arith.constant 0 : index
    %c0_163 = arith.constant 0 : index
    %90 = vector.load %arg1[%c2_160, %c1_161, %c0_162, %c0_163] : memref<8x2x18x128xbf16, #tpu.memory_space<vmem>>, vector<1x1x16x128xbf16>
    %91 = vector.shape_cast %90 : vector<1x1x16x128xbf16> to vector<16x128xbf16>
    %c3_164 = arith.constant 3 : index
    %c1_165 = arith.constant 1 : index
    %c0_166 = arith.constant 0 : index
    %c0_167 = arith.constant 0 : index
    %92 = vector.load %arg1[%c3_164, %c1_165, %c0_166, %c0_167] : memref<8x2x18x128xbf16, #tpu.memory_space<vmem>>, vector<1x1x16x128xbf16>
    %93 = vector.shape_cast %92 : vector<1x1x16x128xbf16> to vector<16x128xbf16>
    %c4_168 = arith.constant 4 : index
    %c1_169 = arith.constant 1 : index
    %c0_170 = arith.constant 0 : index
    %c0_171 = arith.constant 0 : index
    %94 = vector.load %arg1[%c4_168, %c1_169, %c0_170, %c0_171] : memref<8x2x18x128xbf16, #tpu.memory_space<vmem>>, vector<1x1x16x128xbf16>
    %95 = vector.shape_cast %94 : vector<1x1x16x128xbf16> to vector<16x128xbf16>
    %c5_172 = arith.constant 5 : index
    %c1_173 = arith.constant 1 : index
    %c0_174 = arith.constant 0 : index
    %c0_175 = arith.constant 0 : index
    %96 = vector.load %arg1[%c5_172, %c1_173, %c0_174, %c0_175] : memref<8x2x18x128xbf16, #tpu.memory_space<vmem>>, vector<1x1x16x128xbf16>
    %97 = vector.shape_cast %96 : vector<1x1x16x128xbf16> to vector<16x128xbf16>
    %c6_176 = arith.constant 6 : index
    %c1_177 = arith.constant 1 : index
    %c0_178 = arith.constant 0 : index
    %c0_179 = arith.constant 0 : index
    %98 = vector.load %arg1[%c6_176, %c1_177, %c0_178, %c0_179] : memref<8x2x18x128xbf16, #tpu.memory_space<vmem>>, vector<1x1x16x128xbf16>
    %99 = vector.shape_cast %98 : vector<1x1x16x128xbf16> to vector<16x128xbf16>
    %c7_180 = arith.constant 7 : index
    %c1_181 = arith.constant 1 : index
    %c0_182 = arith.constant 0 : index
    %c0_183 = arith.constant 0 : index
    %100 = vector.load %arg1[%c7_180, %c1_181, %c0_182, %c0_183] : memref<8x2x18x128xbf16, #tpu.memory_space<vmem>>, vector<1x1x16x128xbf16>
    %101 = vector.shape_cast %100 : vector<1x1x16x128xbf16> to vector<16x128xbf16>
    %102 = tpu.concatenate %87, %89, %91, %93, %95, %97, %99, %101 in 0 : vector<16x128xbf16>, vector<16x128xbf16>, vector<16x128xbf16>, vector<16x128xbf16>, vector<16x128xbf16>, vector<16x128xbf16>, vector<16x128xbf16>, vector<16x128xbf16> -> vector<128x128xbf16>
    %c0_184 = arith.constant 0 : index
    %c0_185 = arith.constant 0 : index
    %c1_186 = arith.constant 1 : index
    %c0_187 = arith.constant 0 : index
    %103 = vector.load %arg1[%c0_184, %c0_185, %c1_186, %c0_187] : memref<8x2x18x128xbf16, #tpu.memory_space<vmem>>, vector<1x1x16x128xbf16>
    %104 = vector.shape_cast %103 : vector<1x1x16x128xbf16> to vector<16x128xbf16>
    %c1_188 = arith.constant 1 : index
    %c0_189 = arith.constant 0 : index
    %c1_190 = arith.constant 1 : index
    %c0_191 = arith.constant 0 : index
    %105 = vector.load %arg1[%c1_188, %c0_189, %c1_190, %c0_191] : memref<8x2x18x128xbf16, #tpu.memory_space<vmem>>, vector<1x1x16x128xbf16>
    %106 = vector.shape_cast %105 : vector<1x1x16x128xbf16> to vector<16x128xbf16>
    %c2_192 = arith.constant 2 : index
    %c0_193 = arith.constant 0 : index
    %c1_194 = arith.constant 1 : index
    %c0_195 = arith.constant 0 : index
    %107 = vector.load %arg1[%c2_192, %c0_193, %c1_194, %c0_195] : memref<8x2x18x128xbf16, #tpu.memory_space<vmem>>, vector<1x1x16x128xbf16>
    %108 = vector.shape_cast %107 : vector<1x1x16x128xbf16> to vector<16x128xbf16>
    %c3_196 = arith.constant 3 : index
    %c0_197 = arith.constant 0 : index
    %c1_198 = arith.constant 1 : index
    %c0_199 = arith.constant 0 : index
    %109 = vector.load %arg1[%c3_196, %c0_197, %c1_198, %c0_199] : memref<8x2x18x128xbf16, #tpu.memory_space<vmem>>, vector<1x1x16x128xbf16>
    %110 = vector.shape_cast %109 : vector<1x1x16x128xbf16> to vector<16x128xbf16>
    %c4_200 = arith.constant 4 : index
    %c0_201 = arith.constant 0 : index
    %c1_202 = arith.constant 1 : index
    %c0_203 = arith.constant 0 : index
    %111 = vector.load %arg1[%c4_200, %c0_201, %c1_202, %c0_203] : memref<8x2x18x128xbf16, #tpu.memory_space<vmem>>, vector<1x1x16x128xbf16>
    %112 = vector.shape_cast %111 : vector<1x1x16x128xbf16> to vector<16x128xbf16>
    %c5_204 = arith.constant 5 : index
    %c0_205 = arith.constant 0 : index
    %c1_206 = arith.constant 1 : index
    %c0_207 = arith.constant 0 : index
    %113 = vector.load %arg1[%c5_204, %c0_205, %c1_206, %c0_207] : memref<8x2x18x128xbf16, #tpu.memory_space<vmem>>, vector<1x1x16x128xbf16>
    %114 = vector.shape_cast %113 : vector<1x1x16x128xbf16> to vector<16x128xbf16>
    %c6_208 = arith.constant 6 : index
    %c0_209 = arith.constant 0 : index
    %c1_210 = arith.constant 1 : index
    %c0_211 = arith.constant 0 : index
    %115 = vector.load %arg1[%c6_208, %c0_209, %c1_210, %c0_211] : memref<8x2x18x128xbf16, #tpu.memory_space<vmem>>, vector<1x1x16x128xbf16>
    %116 = vector.shape_cast %115 : vector<1x1x16x128xbf16> to vector<16x128xbf16>
    %c7_212 = arith.constant 7 : index
    %c0_213 = arith.constant 0 : index
    %c1_214 = arith.constant 1 : index
    %c0_215 = arith.constant 0 : index
    %117 = vector.load %arg1[%c7_212, %c0_213, %c1_214, %c0_215] : memref<8x2x18x128xbf16, #tpu.memory_space<vmem>>, vector<1x1x16x128xbf16>
    %118 = vector.shape_cast %117 : vector<1x1x16x128xbf16> to vector<16x128xbf16>
    %119 = tpu.concatenate %104, %106, %108, %110, %112, %114, %116, %118 in 0 : vector<16x128xbf16>, vector<16x128xbf16>, vector<16x128xbf16>, vector<16x128xbf16>, vector<16x128xbf16>, vector<16x128xbf16>, vector<16x128xbf16>, vector<16x128xbf16> -> vector<128x128xbf16>
    %c0_216 = arith.constant 0 : index
    %c1_217 = arith.constant 1 : index
    %c1_218 = arith.constant 1 : index
    %c0_219 = arith.constant 0 : index
    %120 = vector.load %arg1[%c0_216, %c1_217, %c1_218, %c0_219] : memref<8x2x18x128xbf16, #tpu.memory_space<vmem>>, vector<1x1x16x128xbf16>
    %121 = vector.shape_cast %120 : vector<1x1x16x128xbf16> to vector<16x128xbf16>
    %c1_220 = arith.constant 1 : index
    %c1_221 = arith.constant 1 : index
    %c1_222 = arith.constant 1 : index
    %c0_223 = arith.constant 0 : index
    %122 = vector.load %arg1[%c1_220, %c1_221, %c1_222, %c0_223] : memref<8x2x18x128xbf16, #tpu.memory_space<vmem>>, vector<1x1x16x128xbf16>
    %123 = vector.shape_cast %122 : vector<1x1x16x128xbf16> to vector<16x128xbf16>
    %c2_224 = arith.constant 2 : index
    %c1_225 = arith.constant 1 : index
    %c1_226 = arith.constant 1 : index
    %c0_227 = arith.constant 0 : index
    %124 = vector.load %arg1[%c2_224, %c1_225, %c1_226, %c0_227] : memref<8x2x18x128xbf16, #tpu.memory_space<vmem>>, vector<1x1x16x128xbf16>
    %125 = vector.shape_cast %124 : vector<1x1x16x128xbf16> to vector<16x128xbf16>
    %c3_228 = arith.constant 3 : index
    %c1_229 = arith.constant 1 : index
    %c1_230 = arith.constant 1 : index
    %c0_231 = arith.constant 0 : index
    %126 = vector.load %arg1[%c3_228, %c1_229, %c1_230, %c0_231] : memref<8x2x18x128xbf16, #tpu.memory_space<vmem>>, vector<1x1x16x128xbf16>
    %127 = vector.shape_cast %126 : vector<1x1x16x128xbf16> to vector<16x128xbf16>
    %c4_232 = arith.constant 4 : index
    %c1_233 = arith.constant 1 : index
    %c1_234 = arith.constant 1 : index
    %c0_235 = arith.constant 0 : index
    %128 = vector.load %arg1[%c4_232, %c1_233, %c1_234, %c0_235] : memref<8x2x18x128xbf16, #tpu.memory_space<vmem>>, vector<1x1x16x128xbf16>
    %129 = vector.shape_cast %128 : vector<1x1x16x128xbf16> to vector<16x128xbf16>
    %c5_236 = arith.constant 5 : index
    %c1_237 = arith.constant 1 : index
    %c1_238 = arith.constant 1 : index
    %c0_239 = arith.constant 0 : index
    %130 = vector.load %arg1[%c5_236, %c1_237, %c1_238, %c0_239] : memref<8x2x18x128xbf16, #tpu.memory_space<vmem>>, vector<1x1x16x128xbf16>
    %131 = vector.shape_cast %130 : vector<1x1x16x128xbf16> to vector<16x128xbf16>
    %c6_240 = arith.constant 6 : index
    %c1_241 = arith.constant 1 : index
    %c1_242 = arith.constant 1 : index
    %c0_243 = arith.constant 0 : index
    %132 = vector.load %arg1[%c6_240, %c1_241, %c1_242, %c0_243] : memref<8x2x18x128xbf16, #tpu.memory_space<vmem>>, vector<1x1x16x128xbf16>
    %133 = vector.shape_cast %132 : vector<1x1x16x128xbf16> to vector<16x128xbf16>
    %c7_244 = arith.constant 7 : index
    %c1_245 = arith.constant 1 : index
    %c1_246 = arith.constant 1 : index
    %c0_247 = arith.constant 0 : index
    %134 = vector.load %arg1[%c7_244, %c1_245, %c1_246, %c0_247] : memref<8x2x18x128xbf16, #tpu.memory_space<vmem>>, vector<1x1x16x128xbf16>
    %135 = vector.shape_cast %134 : vector<1x1x16x128xbf16> to vector<16x128xbf16>
    %136 = tpu.concatenate %121, %123, %125, %127, %129, %131, %133, %135 in 0 : vector<16x128xbf16>, vector<16x128xbf16>, vector<16x128xbf16>, vector<16x128xbf16>, vector<16x128xbf16>, vector<16x128xbf16>, vector<16x128xbf16>, vector<16x128xbf16> -> vector<128x128xbf16>
    %c0_248 = arith.constant 0 : index
    %c0_249 = arith.constant 0 : index
    %c2_250 = arith.constant 2 : index
    %c0_251 = arith.constant 0 : index
    %137 = vector.load %arg1[%c0_248, %c0_249, %c2_250, %c0_251] : memref<8x2x18x128xbf16, #tpu.memory_space<vmem>>, vector<1x1x16x128xbf16>
    %138 = vector.shape_cast %137 : vector<1x1x16x128xbf16> to vector<16x128xbf16>
    %c1_252 = arith.constant 1 : index
    %c0_253 = arith.constant 0 : index
    %c2_254 = arith.constant 2 : index
    %c0_255 = arith.constant 0 : index
    %139 = vector.load %arg1[%c1_252, %c0_253, %c2_254, %c0_255] : memref<8x2x18x128xbf16, #tpu.memory_space<vmem>>, vector<1x1x16x128xbf16>
    %140 = vector.shape_cast %139 : vector<1x1x16x128xbf16> to vector<16x128xbf16>
    %c2_256 = arith.constant 2 : index
    %c0_257 = arith.constant 0 : index
    %c2_258 = arith.constant 2 : index
    %c0_259 = arith.constant 0 : index
    %141 = vector.load %arg1[%c2_256, %c0_257, %c2_258, %c0_259] : memref<8x2x18x128xbf16, #tpu.memory_space<vmem>>, vector<1x1x16x128xbf16>
    %142 = vector.shape_cast %141 : vector<1x1x16x128xbf16> to vector<16x128xbf16>
    %c3_260 = arith.constant 3 : index
    %c0_261 = arith.constant 0 : index
    %c2_262 = arith.constant 2 : index
    %c0_263 = arith.constant 0 : index
    %143 = vector.load %arg1[%c3_260, %c0_261, %c2_262, %c0_263] : memref<8x2x18x128xbf16, #tpu.memory_space<vmem>>, vector<1x1x16x128xbf16>
    %144 = vector.shape_cast %143 : vector<1x1x16x128xbf16> to vector<16x128xbf16>
    %c4_264 = arith.constant 4 : index
    %c0_265 = arith.constant 0 : index
    %c2_266 = arith.constant 2 : index
    %c0_267 = arith.constant 0 : index
    %145 = vector.load %arg1[%c4_264, %c0_265, %c2_266, %c0_267] : memref<8x2x18x128xbf16, #tpu.memory_space<vmem>>, vector<1x1x16x128xbf16>
    %146 = vector.shape_cast %145 : vector<1x1x16x128xbf16> to vector<16x128xbf16>
    %c5_268 = arith.constant 5 : index
    %c0_269 = arith.constant 0 : index
    %c2_270 = arith.constant 2 : index
    %c0_271 = arith.constant 0 : index
    %147 = vector.load %arg1[%c5_268, %c0_269, %c2_270, %c0_271] : memref<8x2x18x128xbf16, #tpu.memory_space<vmem>>, vector<1x1x16x128xbf16>
    %148 = vector.shape_cast %147 : vector<1x1x16x128xbf16> to vector<16x128xbf16>
    %c6_272 = arith.constant 6 : index
    %c0_273 = arith.constant 0 : index
    %c2_274 = arith.constant 2 : index
    %c0_275 = arith.constant 0 : index
    %149 = vector.load %arg1[%c6_272, %c0_273, %c2_274, %c0_275] : memref<8x2x18x128xbf16, #tpu.memory_space<vmem>>, vector<1x1x16x128xbf16>
    %150 = vector.shape_cast %149 : vector<1x1x16x128xbf16> to vector<16x128xbf16>
    %c7_276 = arith.constant 7 : index
    %c0_277 = arith.constant 0 : index
    %c2_278 = arith.constant 2 : index
    %c0_279 = arith.constant 0 : index
    %151 = vector.load %arg1[%c7_276, %c0_277, %c2_278, %c0_279] : memref<8x2x18x128xbf16, #tpu.memory_space<vmem>>, vector<1x1x16x128xbf16>
    %152 = vector.shape_cast %151 : vector<1x1x16x128xbf16> to vector<16x128xbf16>
    %153 = tpu.concatenate %138, %140, %142, %144, %146, %148, %150, %152 in 0 : vector<16x128xbf16>, vector<16x128xbf16>, vector<16x128xbf16>, vector<16x128xbf16>, vector<16x128xbf16>, vector<16x128xbf16>, vector<16x128xbf16>, vector<16x128xbf16> -> vector<128x128xbf16>
    %c0_280 = arith.constant 0 : index
    %c1_281 = arith.constant 1 : index
    %c2_282 = arith.constant 2 : index
    %c0_283 = arith.constant 0 : index
    %154 = vector.load %arg1[%c0_280, %c1_281, %c2_282, %c0_283] : memref<8x2x18x128xbf16, #tpu.memory_space<vmem>>, vector<1x1x16x128xbf16>
    %155 = vector.shape_cast %154 : vector<1x1x16x128xbf16> to vector<16x128xbf16>
    %c1_284 = arith.constant 1 : index
    %c1_285 = arith.constant 1 : index
    %c2_286 = arith.constant 2 : index
    %c0_287 = arith.constant 0 : index
    %156 = vector.load %arg1[%c1_284, %c1_285, %c2_286, %c0_287] : memref<8x2x18x128xbf16, #tpu.memory_space<vmem>>, vector<1x1x16x128xbf16>
    %157 = vector.shape_cast %156 : vector<1x1x16x128xbf16> to vector<16x128xbf16>
    %c2_288 = arith.constant 2 : index
    %c1_289 = arith.constant 1 : index
    %c2_290 = arith.constant 2 : index
    %c0_291 = arith.constant 0 : index
    %158 = vector.load %arg1[%c2_288, %c1_289, %c2_290, %c0_291] : memref<8x2x18x128xbf16, #tpu.memory_space<vmem>>, vector<1x1x16x128xbf16>
    %159 = vector.shape_cast %158 : vector<1x1x16x128xbf16> to vector<16x128xbf16>
    %c3_292 = arith.constant 3 : index
    %c1_293 = arith.constant 1 : index
    %c2_294 = arith.constant 2 : index
    %c0_295 = arith.constant 0 : index
    %160 = vector.load %arg1[%c3_292, %c1_293, %c2_294, %c0_295] : memref<8x2x18x128xbf16, #tpu.memory_space<vmem>>, vector<1x1x16x128xbf16>
    %161 = vector.shape_cast %160 : vector<1x1x16x128xbf16> to vector<16x128xbf16>
    %c4_296 = arith.constant 4 : index
    %c1_297 = arith.constant 1 : index
    %c2_298 = arith.constant 2 : index
    %c0_299 = arith.constant 0 : index
    %162 = vector.load %arg1[%c4_296, %c1_297, %c2_298, %c0_299] : memref<8x2x18x128xbf16, #tpu.memory_space<vmem>>, vector<1x1x16x128xbf16>
    %163 = vector.shape_cast %162 : vector<1x1x16x128xbf16> to vector<16x128xbf16>
    %c5_300 = arith.constant 5 : index
    %c1_301 = arith.constant 1 : index
    %c2_302 = arith.constant 2 : index
    %c0_303 = arith.constant 0 : index
    %164 = vector.load %arg1[%c5_300, %c1_301, %c2_302, %c0_303] : memref<8x2x18x128xbf16, #tpu.memory_space<vmem>>, vector<1x1x16x128xbf16>
    %165 = vector.shape_cast %164 : vector<1x1x16x128xbf16> to vector<16x128xbf16>
    %c6_304 = arith.constant 6 : index
    %c1_305 = arith.constant 1 : index
    %c2_306 = arith.constant 2 : index
    %c0_307 = arith.constant 0 : index
    %166 = vector.load %arg1[%c6_304, %c1_305, %c2_306, %c0_307] : memref<8x2x18x128xbf16, #tpu.memory_space<vmem>>, vector<1x1x16x128xbf16>
    %167 = vector.shape_cast %166 : vector<1x1x16x128xbf16> to vector<16x128xbf16>
    %c7_308 = arith.constant 7 : index
    %c1_309 = arith.constant 1 : index
    %c2_310 = arith.constant 2 : index
    %c0_311 = arith.constant 0 : index
    %168 = vector.load %arg1[%c7_308, %c1_309, %c2_310, %c0_311] : memref<8x2x18x128xbf16, #tpu.memory_space<vmem>>, vector<1x1x16x128xbf16>
    %169 = vector.shape_cast %168 : vector<1x1x16x128xbf16> to vector<16x128xbf16>
    %170 = tpu.concatenate %155, %157, %159, %161, %163, %165, %167, %169 in 0 : vector<16x128xbf16>, vector<16x128xbf16>, vector<16x128xbf16>, vector<16x128xbf16>, vector<16x128xbf16>, vector<16x128xbf16>, vector<16x128xbf16>, vector<16x128xbf16> -> vector<128x128xbf16>
    %171 = tpu.concatenate %102, %119, %136, %153, %170 in 1 : vector<128x128xbf16>, vector<128x128xbf16>, vector<128x128xbf16>, vector<128x128xbf16>, vector<128x128xbf16> -> vector<128x640xbf16>
    %172 = tpu.concatenate %85, %171 in 0 : vector<128x640xbf16>, vector<128x640xbf16> -> vector<256x640xbf16>
    %c0_312 = arith.constant 0 : index
    %c0_313 = arith.constant 0 : index
    %173 = vector.load %arg2[%c0_312, %c0_313] : memref<640x256xbf16, #tpu.memory_space<vmem>>, vector<640x256xbf16>
    %cst = arith.constant dense<0.000000e+00> : vector<256x256xf32>
    %174 = tpu.matmul %172, %173, %cst {dimension_numbers = #tpu.dot_dimension_numbers<[1], [0], [0], [1], [0, 0, 1, 1], [], []>} : vector<256x640xbf16>, vector<640x256xbf16>, vector<256x256xf32> -> vector<256x256xf32>
    %c0_314 = arith.constant 0 : index
    %c0_315 = arith.constant 0 : index
    %175 = vector.load %arg7[%c0_314, %c0_315] : memref<256x256xf32, #tpu.memory_space<vmem>>, vector<256x256xf32>
    tpu.vector_store %arg7[%c0_314, %c0_315], %174 {strides = array<i32>} : memref<256x256xf32, #tpu.memory_space<vmem>>, vector<256x256xf32>,
    %c0_316 = arith.constant 0 : index
    %c0_317 = arith.constant 0 : index
    %176 = vector.load %arg7[%c0_316, %c0_317] : memref<256x256xf32, #tpu.memory_space<vmem>>, vector<128x256xf32>
    %c128 = arith.constant 128 : index
    %c0_318 = arith.constant 0 : index
    %177 = vector.load %arg7[%c128, %c0_318] : memref<256x256xf32, #tpu.memory_space<vmem>>, vector<128x256xf32>
    %178 = arith.maximumf %176, %177 : vector<128x256xf32>
    %c0_319 = arith.constant 0 : index
    %c0_320 = arith.constant 0 : index
    %179 = vector.load %arg3[%c0_319, %c0_320] : memref<1x256xf32, #tpu.memory_space<vmem>>, vector<1x256xf32>
    %180 = vector.broadcast %179 : vector<1x256xf32> to vector<128x256xf32>
    %181 = arith.addf %178, %180 : vector<128x256xf32>
    %cst_321 = arith.constant 0.000000e+00 : f32
    %182 = vector.broadcast %cst_321 : f32 to vector<128x256xf32>
    %183 = arith.maximumf %181, %182 : vector<128x256xf32>
    %184 = vector.extract_strided_slice %183 {offsets = [0, 0], sizes = [128, 128], strides = [1, 1]} : vector<128x256xf32> to vector<128x128xf32>
    %185 = vector.extract_strided_slice %183 {offsets = [0, 128], sizes = [128, 128], strides = [1, 1]} : vector<128x256xf32> to vector<128x128xf32>
    %186 = arith.maximumf %184, %185 : vector<128x128xf32>
    %187 = tpu.iota {dimensions = array<i32: 0>} : vector<128x128xi32>
    %c15_i32 = arith.constant 15 : i32
    %188 = vector.broadcast %c15_i32 : i32 to vector<128x128xi32>
    %189 = arith.andi %187, %188 : vector<128x128xi32>
    %c15_i32_322 = arith.constant 15 : i32
    %190 = vector.broadcast %c15_i32_322 : i32 to vector<128x128xi32>
    %191 = arith.cmpi slt, %189, %190 : vector<128x128xi32>
    %cst_323 = arith.constant 0.000000e+00 : f32
    %192 = vector.broadcast %cst_323 : f32 to vector<128x128xf32>
    %193 = arith.select %191, %186, %192 : vector<128x128xi1>, vector<128x128xf32>
    %194 = arith.truncf %193 : vector<128x128xf32> to vector<128x128xbf16>
    %cst_324 = arith.constant 0.000000e+00 : bf16
    %195 = vector.broadcast %cst_324 : bf16 to vector<8x8x128xbf16>
    %c0_325 = arith.constant 0 : index
    %c0_326 = arith.constant 0 : index
    %c0_327 = arith.constant 0 : index
    %196 = vector.load %arg8[%c0_325, %c0_326, %c0_327] : memref<8x32x128xbf16, #tpu.memory_space<vmem>>, vector<8x8x128xbf16>
    tpu.vector_store %arg8[%c0_325, %c0_326, %c0_327], %195 {strides = array<i32>} : memref<8x32x128xbf16, #tpu.memory_space<vmem>>, vector<8x8x128xbf16>,
    %c0_328 = arith.constant 0 : index
    %c24 = arith.constant 24 : index
    %c0_329 = arith.constant 0 : index
    %197 = vector.load %arg8[%c0_328, %c24, %c0_329] : memref<8x32x128xbf16, #tpu.memory_space<vmem>>, vector<8x8x128xbf16>
    tpu.vector_store %arg8[%c0_328, %c24, %c0_329], %195 {strides = array<i32>} : memref<8x32x128xbf16, #tpu.memory_space<vmem>>, vector<8x8x128xbf16>,
    %198 = vector.extract_strided_slice %194 {offsets = [0, 0], sizes = [16, 128], strides = [1, 1]} : vector<128x128xbf16> to vector<16x128xbf16>
    %c0_330 = arith.constant 0 : index
    %c8 = arith.constant 8 : index
    %c0_331 = arith.constant 0 : index
    %199 = vector.load %arg8[%c0_330, %c8, %c0_331] : memref<8x32x128xbf16, #tpu.memory_space<vmem>>, vector<1x16x128xbf16>
    %200 = vector.shape_cast %199 : vector<1x16x128xbf16> to vector<16x128xbf16>
    %201 = vector.shape_cast %198 : vector<16x128xbf16> to vector<1x16x128xbf16>
    tpu.vector_store %arg8[%c0_330, %c8, %c0_331], %201 {strides = array<i32>} : memref<8x32x128xbf16, #tpu.memory_space<vmem>>, vector<1x16x128xbf16>,
    %202 = vector.extract_strided_slice %194 {offsets = [16, 0], sizes = [16, 128], strides = [1, 1]} : vector<128x128xbf16> to vector<16x128xbf16>
    %c1_332 = arith.constant 1 : index
    %c8_333 = arith.constant 8 : index
    %c0_334 = arith.constant 0 : index
    %203 = vector.load %arg8[%c1_332, %c8_333, %c0_334] : memref<8x32x128xbf16, #tpu.memory_space<vmem>>, vector<1x16x128xbf16>
    %204 = vector.shape_cast %203 : vector<1x16x128xbf16> to vector<16x128xbf16>
    %205 = vector.shape_cast %202 : vector<16x128xbf16> to vector<1x16x128xbf16>
    tpu.vector_store %arg8[%c1_332, %c8_333, %c0_334], %205 {strides = array<i32>} : memref<8x32x128xbf16, #tpu.memory_space<vmem>>, vector<1x16x128xbf16>,
    %206 = vector.extract_strided_slice %194 {offsets = [32, 0], sizes = [16, 128], strides = [1, 1]} : vector<128x128xbf16> to vector<16x128xbf16>
    %c2_335 = arith.constant 2 : index
    %c8_336 = arith.constant 8 : index
    %c0_337 = arith.constant 0 : index
    %207 = vector.load %arg8[%c2_335, %c8_336, %c0_337] : memref<8x32x128xbf16, #tpu.memory_space<vmem>>, vector<1x16x128xbf16>
    %208 = vector.shape_cast %207 : vector<1x16x128xbf16> to vector<16x128xbf16>
    %209 = vector.shape_cast %206 : vector<16x128xbf16> to vector<1x16x128xbf16>
    tpu.vector_store %arg8[%c2_335, %c8_336, %c0_337], %209 {strides = array<i32>} : memref<8x32x128xbf16, #tpu.memory_space<vmem>>, vector<1x16x128xbf16>,
    %210 = vector.extract_strided_slice %194 {offsets = [48, 0], sizes = [16, 128], strides = [1, 1]} : vector<128x128xbf16> to vector<16x128xbf16>
    %c3_338 = arith.constant 3 : index
    %c8_339 = arith.constant 8 : index
    %c0_340 = arith.constant 0 : index
    %211 = vector.load %arg8[%c3_338, %c8_339, %c0_340] : memref<8x32x128xbf16, #tpu.memory_space<vmem>>, vector<1x16x128xbf16>
    %212 = vector.shape_cast %211 : vector<1x16x128xbf16> to vector<16x128xbf16>
    %213 = vector.shape_cast %210 : vector<16x128xbf16> to vector<1x16x128xbf16>
    tpu.vector_store %arg8[%c3_338, %c8_339, %c0_340], %213 {strides = array<i32>} : memref<8x32x128xbf16, #tpu.memory_space<vmem>>, vector<1x16x128xbf16>,
    %214 = vector.extract_strided_slice %194 {offsets = [64, 0], sizes = [16, 128], strides = [1, 1]} : vector<128x128xbf16> to vector<16x128xbf16>
    %c4_341 = arith.constant 4 : index
    %c8_342 = arith.constant 8 : index
    %c0_343 = arith.constant 0 : index
    %215 = vector.load %arg8[%c4_341, %c8_342, %c0_343] : memref<8x32x128xbf16, #tpu.memory_space<vmem>>, vector<1x16x128xbf16>
    %216 = vector.shape_cast %215 : vector<1x16x128xbf16> to vector<16x128xbf16>
    %217 = vector.shape_cast %214 : vector<16x128xbf16> to vector<1x16x128xbf16>
    tpu.vector_store %arg8[%c4_341, %c8_342, %c0_343], %217 {strides = array<i32>} : memref<8x32x128xbf16, #tpu.memory_space<vmem>>, vector<1x16x128xbf16>,
    %218 = vector.extract_strided_slice %194 {offsets = [80, 0], sizes = [16, 128], strides = [1, 1]} : vector<128x128xbf16> to vector<16x128xbf16>
    %c5_344 = arith.constant 5 : index
    %c8_345 = arith.constant 8 : index
    %c0_346 = arith.constant 0 : index
    %219 = vector.load %arg8[%c5_344, %c8_345, %c0_346] : memref<8x32x128xbf16, #tpu.memory_space<vmem>>, vector<1x16x128xbf16>
    %220 = vector.shape_cast %219 : vector<1x16x128xbf16> to vector<16x128xbf16>
    %221 = vector.shape_cast %218 : vector<16x128xbf16> to vector<1x16x128xbf16>
    tpu.vector_store %arg8[%c5_344, %c8_345, %c0_346], %221 {strides = array<i32>} : memref<8x32x128xbf16, #tpu.memory_space<vmem>>, vector<1x16x128xbf16>,
    %222 = vector.extract_strided_slice %194 {offsets = [96, 0], sizes = [16, 128], strides = [1, 1]} : vector<128x128xbf16> to vector<16x128xbf16>
    %c6_347 = arith.constant 6 : index
    %c8_348 = arith.constant 8 : index
    %c0_349 = arith.constant 0 : index
    %223 = vector.load %arg8[%c6_347, %c8_348, %c0_349] : memref<8x32x128xbf16, #tpu.memory_space<vmem>>, vector<1x16x128xbf16>
    %224 = vector.shape_cast %223 : vector<1x16x128xbf16> to vector<16x128xbf16>
    %225 = vector.shape_cast %222 : vector<16x128xbf16> to vector<1x16x128xbf16>
    tpu.vector_store %arg8[%c6_347, %c8_348, %c0_349], %225 {strides = array<i32>} : memref<8x32x128xbf16, #tpu.memory_space<vmem>>, vector<1x16x128xbf16>,
    %226 = vector.extract_strided_slice %194 {offsets = [112, 0], sizes = [16, 128], strides = [1, 1]} : vector<128x128xbf16> to vector<16x128xbf16>
    %c7_350 = arith.constant 7 : index
    %c8_351 = arith.constant 8 : index
    %c0_352 = arith.constant 0 : index
    %227 = vector.load %arg8[%c7_350, %c8_351, %c0_352] : memref<8x32x128xbf16, #tpu.memory_space<vmem>>, vector<1x16x128xbf16>
    %228 = vector.shape_cast %227 : vector<1x16x128xbf16> to vector<16x128xbf16>
    %229 = vector.shape_cast %226 : vector<16x128xbf16> to vector<1x16x128xbf16>
    tpu.vector_store %arg8[%c7_350, %c8_351, %c0_352], %229 {strides = array<i32>} : memref<8x32x128xbf16, #tpu.memory_space<vmem>>, vector<1x16x128xbf16>,
    %c0_353 = arith.constant 0 : index
    %c7_354 = arith.constant 7 : index
    %c0_355 = arith.constant 0 : index
    %230 = vector.load %arg8[%c0_353, %c7_354, %c0_355] : memref<8x32x128xbf16, #tpu.memory_space<vmem>>, vector<1x16x128xbf16>
    %231 = vector.shape_cast %230 : vector<1x16x128xbf16> to vector<16x128xbf16>
    %c1_356 = arith.constant 1 : index
    %c7_357 = arith.constant 7 : index
    %c0_358 = arith.constant 0 : index
    %232 = vector.load %arg8[%c1_356, %c7_357, %c0_358] : memref<8x32x128xbf16, #tpu.memory_space<vmem>>, vector<1x16x128xbf16>
    %233 = vector.shape_cast %232 : vector<1x16x128xbf16> to vector<16x128xbf16>
    %c2_359 = arith.constant 2 : index
    %c7_360 = arith.constant 7 : index
    %c0_361 = arith.constant 0 : index
    %234 = vector.load %arg8[%c2_359, %c7_360, %c0_361] : memref<8x32x128xbf16, #tpu.memory_space<vmem>>, vector<1x16x128xbf16>
    %235 = vector.shape_cast %234 : vector<1x16x128xbf16> to vector<16x128xbf16>
    %c3_362 = arith.constant 3 : index
    %c7_363 = arith.constant 7 : index
    %c0_364 = arith.constant 0 : index
    %236 = vector.load %arg8[%c3_362, %c7_363, %c0_364] : memref<8x32x128xbf16, #tpu.memory_space<vmem>>, vector<1x16x128xbf16>
    %237 = vector.shape_cast %236 : vector<1x16x128xbf16> to vector<16x128xbf16>
    %c4_365 = arith.constant 4 : index
    %c7_366 = arith.constant 7 : index
    %c0_367 = arith.constant 0 : index
    %238 = vector.load %arg8[%c4_365, %c7_366, %c0_367] : memref<8x32x128xbf16, #tpu.memory_space<vmem>>, vector<1x16x128xbf16>
    %239 = vector.shape_cast %238 : vector<1x16x128xbf16> to vector<16x128xbf16>
    %c5_368 = arith.constant 5 : index
    %c7_369 = arith.constant 7 : index
    %c0_370 = arith.constant 0 : index
    %240 = vector.load %arg8[%c5_368, %c7_369, %c0_370] : memref<8x32x128xbf16, #tpu.memory_space<vmem>>, vector<1x16x128xbf16>
    %241 = vector.shape_cast %240 : vector<1x16x128xbf16> to vector<16x128xbf16>
    %c6_371 = arith.constant 6 : index
    %c7_372 = arith.constant 7 : index
    %c0_373 = arith.constant 0 : index
    %242 = vector.load %arg8[%c6_371, %c7_372, %c0_373] : memref<8x32x128xbf16, #tpu.memory_space<vmem>>, vector<1x16x128xbf16>
    %243 = vector.shape_cast %242 : vector<1x16x128xbf16> to vector<16x128xbf16>
    %c7_374 = arith.constant 7 : index
    %c7_375 = arith.constant 7 : index
    %c0_376 = arith.constant 0 : index
    %244 = vector.load %arg8[%c7_374, %c7_375, %c0_376] : memref<8x32x128xbf16, #tpu.memory_space<vmem>>, vector<1x16x128xbf16>
    %245 = vector.shape_cast %244 : vector<1x16x128xbf16> to vector<16x128xbf16>
    %246 = tpu.concatenate %231, %233, %235, %237, %239, %241, %243, %245 in 0 : vector<16x128xbf16>, vector<16x128xbf16>, vector<16x128xbf16>, vector<16x128xbf16>, vector<16x128xbf16>, vector<16x128xbf16>, vector<16x128xbf16>, vector<16x128xbf16> -> vector<128x128xbf16>
    %c0_377 = arith.constant 0 : index
    %c8_378 = arith.constant 8 : index
    %c0_379 = arith.constant 0 : index
    %247 = vector.load %arg8[%c0_377, %c8_378, %c0_379] : memref<8x32x128xbf16, #tpu.memory_space<vmem>>, vector<1x16x128xbf16>
    %248 = vector.shape_cast %247 : vector<1x16x128xbf16> to vector<16x128xbf16>
    %c1_380 = arith.constant 1 : index
    %c8_381 = arith.constant 8 : index
    %c0_382 = arith.constant 0 : index
    %249 = vector.load %arg8[%c1_380, %c8_381, %c0_382] : memref<8x32x128xbf16, #tpu.memory_space<vmem>>, vector<1x16x128xbf16>
    %250 = vector.shape_cast %249 : vector<1x16x128xbf16> to vector<16x128xbf16>
    %c2_383 = arith.constant 2 : index
    %c8_384 = arith.constant 8 : index
    %c0_385 = arith.constant 0 : index
    %251 = vector.load %arg8[%c2_383, %c8_384, %c0_385] : memref<8x32x128xbf16, #tpu.memory_space<vmem>>, vector<1x16x128xbf16>
    %252 = vector.shape_cast %251 : vector<1x16x128xbf16> to vector<16x128xbf16>
    %c3_386 = arith.constant 3 : index
    %c8_387 = arith.constant 8 : index
    %c0_388 = arith.constant 0 : index
    %253 = vector.load %arg8[%c3_386, %c8_387, %c0_388] : memref<8x32x128xbf16, #tpu.memory_space<vmem>>, vector<1x16x128xbf16>
    %254 = vector.shape_cast %253 : vector<1x16x128xbf16> to vector<16x128xbf16>
    %c4_389 = arith.constant 4 : index
    %c8_390 = arith.constant 8 : index
    %c0_391 = arith.constant 0 : index
    %255 = vector.load %arg8[%c4_389, %c8_390, %c0_391] : memref<8x32x128xbf16, #tpu.memory_space<vmem>>, vector<1x16x128xbf16>
    %256 = vector.shape_cast %255 : vector<1x16x128xbf16> to vector<16x128xbf16>
    %c5_392 = arith.constant 5 : index
    %c8_393 = arith.constant 8 : index
    %c0_394 = arith.constant 0 : index
    %257 = vector.load %arg8[%c5_392, %c8_393, %c0_394] : memref<8x32x128xbf16, #tpu.memory_space<vmem>>, vector<1x16x128xbf16>
    %258 = vector.shape_cast %257 : vector<1x16x128xbf16> to vector<16x128xbf16>
    %c6_395 = arith.constant 6 : index
    %c8_396 = arith.constant 8 : index
    %c0_397 = arith.constant 0 : index
    %259 = vector.load %arg8[%c6_395, %c8_396, %c0_397] : memref<8x32x128xbf16, #tpu.memory_space<vmem>>, vector<1x16x128xbf16>
    %260 = vector.shape_cast %259 : vector<1x16x128xbf16> to vector<16x128xbf16>
    %c7_398 = arith.constant 7 : index
    %c8_399 = arith.constant 8 : index
    %c0_400 = arith.constant 0 : index
    %261 = vector.load %arg8[%c7_398, %c8_399, %c0_400] : memref<8x32x128xbf16, #tpu.memory_space<vmem>>, vector<1x16x128xbf16>
    %262 = vector.shape_cast %261 : vector<1x16x128xbf16> to vector<16x128xbf16>
    %263 = tpu.concatenate %248, %250, %252, %254, %256, %258, %260, %262 in 0 : vector<16x128xbf16>, vector<16x128xbf16>, vector<16x128xbf16>, vector<16x128xbf16>, vector<16x128xbf16>, vector<16x128xbf16>, vector<16x128xbf16>, vector<16x128xbf16> -> vector<128x128xbf16>
    %c0_401 = arith.constant 0 : index
    %c9 = arith.constant 9 : index
    %c0_402 = arith.constant 0 : index
    %264 = vector.load %arg8[%c0_401, %c9, %c0_402] : memref<8x32x128xbf16, #tpu.memory_space<vmem>>, vector<1x16x128xbf16>
    %265 = vector.shape_cast %264 : vector<1x16x128xbf16> to vector<16x128xbf16>
    %c1_403 = arith.constant 1 : index
    %c9_404 = arith.constant 9 : index
    %c0_405 = arith.constant 0 : index
    %266 = vector.load %arg8[%c1_403, %c9_404, %c0_405] : memref<8x32x128xbf16, #tpu.memory_space<vmem>>, vector<1x16x128xbf16>
    %267 = vector.shape_cast %266 : vector<1x16x128xbf16> to vector<16x128xbf16>
    %c2_406 = arith.constant 2 : index
    %c9_407 = arith.constant 9 : index
    %c0_408 = arith.constant 0 : index
    %268 = vector.load %arg8[%c2_406, %c9_407, %c0_408] : memref<8x32x128xbf16, #tpu.memory_space<vmem>>, vector<1x16x128xbf16>
    %269 = vector.shape_cast %268 : vector<1x16x128xbf16> to vector<16x128xbf16>
    %c3_409 = arith.constant 3 : index
    %c9_410 = arith.constant 9 : index
    %c0_411 = arith.constant 0 : index
    %270 = vector.load %arg8[%c3_409, %c9_410, %c0_411] : memref<8x32x128xbf16, #tpu.memory_space<vmem>>, vector<1x16x128xbf16>
    %271 = vector.shape_cast %270 : vector<1x16x128xbf16> to vector<16x128xbf16>
    %c4_412 = arith.constant 4 : index
    %c9_413 = arith.constant 9 : index
    %c0_414 = arith.constant 0 : index
    %272 = vector.load %arg8[%c4_412, %c9_413, %c0_414] : memref<8x32x128xbf16, #tpu.memory_space<vmem>>, vector<1x16x128xbf16>
    %273 = vector.shape_cast %272 : vector<1x16x128xbf16> to vector<16x128xbf16>
    %c5_415 = arith.constant 5 : index
    %c9_416 = arith.constant 9 : index
    %c0_417 = arith.constant 0 : index
    %274 = vector.load %arg8[%c5_415, %c9_416, %c0_417] : memref<8x32x128xbf16, #tpu.memory_space<vmem>>, vector<1x16x128xbf16>
    %275 = vector.shape_cast %274 : vector<1x16x128xbf16> to vector<16x128xbf16>
    %c6_418 = arith.constant 6 : index
    %c9_419 = arith.constant 9 : index
    %c0_420 = arith.constant 0 : index
    %276 = vector.load %arg8[%c6_418, %c9_419, %c0_420] : memref<8x32x128xbf16, #tpu.memory_space<vmem>>, vector<1x16x128xbf16>
    %277 = vector.shape_cast %276 : vector<1x16x128xbf16> to vector<16x128xbf16>
    %c7_421 = arith.constant 7 : index
    %c9_422 = arith.constant 9 : index
    %c0_423 = arith.constant 0 : index
    %278 = vector.load %arg8[%c7_421, %c9_422, %c0_423] : memref<8x32x128xbf16, #tpu.memory_space<vmem>>, vector<1x16x128xbf16>
    %279 = vector.shape_cast %278 : vector<1x16x128xbf16> to vector<16x128xbf16>
    %280 = tpu.concatenate %265, %267, %269, %271, %273, %275, %277, %279 in 0 : vector<16x128xbf16>, vector<16x128xbf16>, vector<16x128xbf16>, vector<16x128xbf16>, vector<16x128xbf16>, vector<16x128xbf16>, vector<16x128xbf16>, vector<16x128xbf16> -> vector<128x128xbf16>
    %c0_424 = arith.constant 0 : index
    %c10 = arith.constant 10 : index
    %c0_425 = arith.constant 0 : index
    %281 = vector.load %arg8[%c0_424, %c10, %c0_425] : memref<8x32x128xbf16, #tpu.memory_space<vmem>>, vector<1x16x128xbf16>
    %282 = vector.shape_cast %281 : vector<1x16x128xbf16> to vector<16x128xbf16>
    %c1_426 = arith.constant 1 : index
    %c10_427 = arith.constant 10 : index
    %c0_428 = arith.constant 0 : index
    %283 = vector.load %arg8[%c1_426, %c10_427, %c0_428] : memref<8x32x128xbf16, #tpu.memory_space<vmem>>, vector<1x16x128xbf16>
    %284 = vector.shape_cast %283 : vector<1x16x128xbf16> to vector<16x128xbf16>
    %c2_429 = arith.constant 2 : index
    %c10_430 = arith.constant 10 : index
    %c0_431 = arith.constant 0 : index
    %285 = vector.load %arg8[%c2_429, %c10_430, %c0_431] : memref<8x32x128xbf16, #tpu.memory_space<vmem>>, vector<1x16x128xbf16>
    %286 = vector.shape_cast %285 : vector<1x16x128xbf16> to vector<16x128xbf16>
    %c3_432 = arith.constant 3 : index
    %c10_433 = arith.constant 10 : index
    %c0_434 = arith.constant 0 : index
    %287 = vector.load %arg8[%c3_432, %c10_433, %c0_434] : memref<8x32x128xbf16, #tpu.memory_space<vmem>>, vector<1x16x128xbf16>
    %288 = vector.shape_cast %287 : vector<1x16x128xbf16> to vector<16x128xbf16>
    %c4_435 = arith.constant 4 : index
    %c10_436 = arith.constant 10 : index
    %c0_437 = arith.constant 0 : index
    %289 = vector.load %arg8[%c4_435, %c10_436, %c0_437] : memref<8x32x128xbf16, #tpu.memory_space<vmem>>, vector<1x16x128xbf16>
    %290 = vector.shape_cast %289 : vector<1x16x128xbf16> to vector<16x128xbf16>
    %c5_438 = arith.constant 5 : index
    %c10_439 = arith.constant 10 : index
    %c0_440 = arith.constant 0 : index
    %291 = vector.load %arg8[%c5_438, %c10_439, %c0_440] : memref<8x32x128xbf16, #tpu.memory_space<vmem>>, vector<1x16x128xbf16>
    %292 = vector.shape_cast %291 : vector<1x16x128xbf16> to vector<16x128xbf16>
    %c6_441 = arith.constant 6 : index
    %c10_442 = arith.constant 10 : index
    %c0_443 = arith.constant 0 : index
    %293 = vector.load %arg8[%c6_441, %c10_442, %c0_443] : memref<8x32x128xbf16, #tpu.memory_space<vmem>>, vector<1x16x128xbf16>
    %294 = vector.shape_cast %293 : vector<1x16x128xbf16> to vector<16x128xbf16>
    %c7_444 = arith.constant 7 : index
    %c10_445 = arith.constant 10 : index
    %c0_446 = arith.constant 0 : index
    %295 = vector.load %arg8[%c7_444, %c10_445, %c0_446] : memref<8x32x128xbf16, #tpu.memory_space<vmem>>, vector<1x16x128xbf16>
    %296 = vector.shape_cast %295 : vector<1x16x128xbf16> to vector<16x128xbf16>
    %297 = tpu.concatenate %282, %284, %286, %288, %290, %292, %294, %296 in 0 : vector<16x128xbf16>, vector<16x128xbf16>, vector<16x128xbf16>, vector<16x128xbf16>, vector<16x128xbf16>, vector<16x128xbf16>, vector<16x128xbf16>, vector<16x128xbf16> -> vector<128x128xbf16>
    %c0_447 = arith.constant 0 : index
    %c11 = arith.constant 11 : index
    %c0_448 = arith.constant 0 : index
    %298 = vector.load %arg8[%c0_447, %c11, %c0_448] : memref<8x32x128xbf16, #tpu.memory_space<vmem>>, vector<1x16x128xbf16>
    %299 = vector.shape_cast %298 : vector<1x16x128xbf16> to vector<16x128xbf16>
    %c1_449 = arith.constant 1 : index
    %c11_450 = arith.constant 11 : index
    %c0_451 = arith.constant 0 : index
    %300 = vector.load %arg8[%c1_449, %c11_450, %c0_451] : memref<8x32x128xbf16, #tpu.memory_space<vmem>>, vector<1x16x128xbf16>
    %301 = vector.shape_cast %300 : vector<1x16x128xbf16> to vector<16x128xbf16>
    %c2_452 = arith.constant 2 : index
    %c11_453 = arith.constant 11 : index
    %c0_454 = arith.constant 0 : index
    %302 = vector.load %arg8[%c2_452, %c11_453, %c0_454] : memref<8x32x128xbf16, #tpu.memory_space<vmem>>, vector<1x16x128xbf16>
    %303 = vector.shape_cast %302 : vector<1x16x128xbf16> to vector<16x128xbf16>
    %c3_455 = arith.constant 3 : index
    %c11_456 = arith.constant 11 : index
    %c0_457 = arith.constant 0 : index
    %304 = vector.load %arg8[%c3_455, %c11_456, %c0_457] : memref<8x32x128xbf16, #tpu.memory_space<vmem>>, vector<1x16x128xbf16>
    %305 = vector.shape_cast %304 : vector<1x16x128xbf16> to vector<16x128xbf16>
    %c4_458 = arith.constant 4 : index
    %c11_459 = arith.constant 11 : index
    %c0_460 = arith.constant 0 : index
    %306 = vector.load %arg8[%c4_458, %c11_459, %c0_460] : memref<8x32x128xbf16, #tpu.memory_space<vmem>>, vector<1x16x128xbf16>
    %307 = vector.shape_cast %306 : vector<1x16x128xbf16> to vector<16x128xbf16>
    %c5_461 = arith.constant 5 : index
    %c11_462 = arith.constant 11 : index
    %c0_463 = arith.constant 0 : index
    %308 = vector.load %arg8[%c5_461, %c11_462, %c0_463] : memref<8x32x128xbf16, #tpu.memory_space<vmem>>, vector<1x16x128xbf16>
    %309 = vector.shape_cast %308 : vector<1x16x128xbf16> to vector<16x128xbf16>
    %c6_464 = arith.constant 6 : index
    %c11_465 = arith.constant 11 : index
    %c0_466 = arith.constant 0 : index
    %310 = vector.load %arg8[%c6_464, %c11_465, %c0_466] : memref<8x32x128xbf16, #tpu.memory_space<vmem>>, vector<1x16x128xbf16>
    %311 = vector.shape_cast %310 : vector<1x16x128xbf16> to vector<16x128xbf16>
    %c7_467 = arith.constant 7 : index
    %c11_468 = arith.constant 11 : index
    %c0_469 = arith.constant 0 : index
    %312 = vector.load %arg8[%c7_467, %c11_468, %c0_469] : memref<8x32x128xbf16, #tpu.memory_space<vmem>>, vector<1x16x128xbf16>
    %313 = vector.shape_cast %312 : vector<1x16x128xbf16> to vector<16x128xbf16>
    %314 = tpu.concatenate %299, %301, %303, %305, %307, %309, %311, %313 in 0 : vector<16x128xbf16>, vector<16x128xbf16>, vector<16x128xbf16>, vector<16x128xbf16>, vector<16x128xbf16>, vector<16x128xbf16>, vector<16x128xbf16>, vector<16x128xbf16> -> vector<128x128xbf16>
    %315 = tpu.concatenate %246, %263, %280, %297, %314 in 1 : vector<128x128xbf16>, vector<128x128xbf16>, vector<128x128xbf16>, vector<128x128xbf16>, vector<128x128xbf16> -> vector<128x640xbf16>
    %c0_470 = arith.constant 0 : index
    %c0_471 = arith.constant 0 : index
    %316 = vector.load %arg4[%c0_470, %c0_471] : memref<640x256xbf16, #tpu.memory_space<vmem>>, vector<640x256xbf16>
    %cst_472 = arith.constant dense<0.000000e+00> : vector<128x256xf32>
    %317 = tpu.matmul %315, %316, %cst_472 {dimension_numbers = #tpu.dot_dimension_numbers<[1], [0], [0], [1], [0, 0, 1, 1], [], []>} : vector<128x640xbf16>, vector<640x256xbf16>, vector<128x256xf32> -> vector<128x256xf32>
    %c0_473 = arith.constant 0 : index
    %c0_474 = arith.constant 0 : index
    %318 = vector.load %arg5[%c0_473, %c0_474] : memref<1x256xf32, #tpu.memory_space<vmem>>, vector<1x256xf32>
    %319 = vector.broadcast %318 : vector<1x256xf32> to vector<128x256xf32>
    %320 = arith.addf %317, %319 : vector<128x256xf32>
    %cst_475 = arith.constant 0.000000e+00 : f32
    %321 = vector.broadcast %cst_475 : f32 to vector<128x256xf32>
    %322 = arith.maximumf %320, %321 : vector<128x256xf32>
    %323 = arith.truncf %322 : vector<128x256xf32> to vector<128x256xbf16>
    %c0_476 = arith.constant 0 : index
    %c0_477 = arith.constant 0 : index
    %324 = vector.load %arg6[%c0_476, %c0_477] : memref<128x256xbf16, #tpu.memory_space<vmem>>, vector<128x256xbf16>
    tpu.vector_store %arg6[%c0_476, %c0_477], %323 {strides = array<i32>} : memref<128x256xbf16, #tpu.memory_space<vmem>>, vector<128x256xbf16>,
    return
  }
  func.func @transform_0(%arg0: i32) -> (i32, i32, i32, i32) {
    %c0_i32 = arith.constant 0 : i32
    %c0_i32_0 = arith.constant 0 : i32
    %c0_i32_1 = arith.constant 0 : i32
    %c0_i32_2 = arith.constant 0 : i32
    return %arg0, %c0_i32, %c0_i32_0, %c0_i32_1 : i32, i32, i32, i32
  }
  func.func @transform_1(%arg0: i32) -> (i32, i32) {
    %c0_i32 = arith.constant 0 : i32
    %c0_i32_0 = arith.constant 0 : i32
    %c0_i32_1 = arith.constant 0 : i32
    return %c0_i32, %c0_i32_0 : i32, i32
  }
  func.func @transform_2(%arg0: i32) -> (i32, i32) {
    %c0_i32 = arith.constant 0 : i32
    %c0_i32_0 = arith.constant 0 : i32
    %c0_i32_1 = arith.constant 0 : i32
    return %c0_i32, %c0_i32_0 : i32, i32
  }
  func.func @transform_3(%arg0: i32) -> (i32, i32) {
    %c0_i32 = arith.constant 0 : i32
    %c0_i32_0 = arith.constant 0 : i32
    %c0_i32_1 = arith.constant 0 : i32
    return %c0_i32, %c0_i32_0 : i32, i32
  }
  func.func @transform_4(%arg0: i32) -> (i32, i32) {
    %c0_i32 = arith.constant 0 : i32
    %c0_i32_0 = arith.constant 0 : i32
    %c0_i32_1 = arith.constant 0 : i32
    return %c0_i32, %c0_i32_0 : i32, i32
  }
  func.func @transform_5(%arg0: i32) -> (i32, i32) {
    %c0_i32 = arith.constant 0 : i32
    %c0_i32_0 = arith.constant 0 : i32
    return %arg0, %c0_i32 : i32, i32
  }
}

module attributes {stable_mosaic.version = 11 : i64} {
  func.func @_classifier_kernel(%arg0: i32, %arg1: memref<8x4096xbf16, #tpu.memory_space<vmem>>, %arg2: memref<4096x128xbf16, #tpu.memory_space<vmem>>, %arg3: memref<1x128xf32, #tpu.memory_space<vmem>>, %arg4: memref<128x128xbf16, #tpu.memory_space<vmem>>, %arg5: memref<1x128xf32, #tpu.memory_space<vmem>>, %arg6: memref<128x128xbf16, #tpu.memory_space<vmem>>, %arg7: memref<1x128xf32, #tpu.memory_space<vmem>>, %arg8: memref<8x128xf32, #tpu.memory_space<vmem>>) attributes {dimension_semantics = [#tpu.dimension_semantics<parallel>], iteration_bounds = array<i64: 1>, scalar_prefetch = 0 : i64, scratch_operands = 0 : i64, tpu.core_type = #tpu.core_type<tc>, window_params = [{transform_indices = @transform_0, window_bounds = array<i64: 8, 4096>}, {pipeline_mode = #tpu.pipeline_mode<synchronous>, transform_indices = @transform_1, window_bounds = array<i64: 4096, 128>}, {pipeline_mode = #tpu.pipeline_mode<synchronous>, transform_indices = @transform_2, window_bounds = array<i64: 1, 128>}, {pipeline_mode = #tpu.pipeline_mode<synchronous>, transform_indices = @transform_3, window_bounds = array<i64: 128, 128>}, {pipeline_mode = #tpu.pipeline_mode<synchronous>, transform_indices = @transform_4, window_bounds = array<i64: 1, 128>}, {pipeline_mode = #tpu.pipeline_mode<synchronous>, transform_indices = @transform_5, window_bounds = array<i64: 128, 128>}, {pipeline_mode = #tpu.pipeline_mode<synchronous>, transform_indices = @transform_6, window_bounds = array<i64: 1, 128>}, {transform_indices = @transform_7, window_bounds = array<i64: 8, 128>}]} {
    %c0 = arith.constant 0 : index
    %c0_0 = arith.constant 0 : index
    %0 = vector.load %arg1[%c0, %c0_0] : memref<8x4096xbf16, #tpu.memory_space<vmem>>, vector<8x4096xbf16>
    %c0_1 = arith.constant 0 : index
    %c0_2 = arith.constant 0 : index
    %1 = vector.load %arg2[%c0_1, %c0_2] : memref<4096x128xbf16, #tpu.memory_space<vmem>>, vector<4096x128xbf16>
    %cst = arith.constant dense<0.000000e+00> : vector<8x128xf32>
    %2 = tpu.matmul %0, %1, %cst {dimension_numbers = #tpu.dot_dimension_numbers<[1], [0], [0], [1], [0, 0, 1, 1], [], []>} : vector<8x4096xbf16>, vector<4096x128xbf16>, vector<8x128xf32> -> vector<8x128xf32>
    %c0_3 = arith.constant 0 : index
    %c0_4 = arith.constant 0 : index
    %3 = vector.load %arg3[%c0_3, %c0_4] : memref<1x128xf32, #tpu.memory_space<vmem>>, vector<1x128xf32>
    %4 = vector.broadcast %3 : vector<1x128xf32> to vector<8x128xf32>
    %5 = arith.addf %2, %4 : vector<8x128xf32>
    %cst_5 = arith.constant 0.000000e+00 : f32
    %6 = vector.broadcast %cst_5 : f32 to vector<8x128xf32>
    %7 = arith.maximumf %5, %6 : vector<8x128xf32>
    %8 = arith.truncf %7 : vector<8x128xf32> to vector<8x128xbf16>
    %c0_6 = arith.constant 0 : index
    %c0_7 = arith.constant 0 : index
    %9 = vector.load %arg4[%c0_6, %c0_7] : memref<128x128xbf16, #tpu.memory_space<vmem>>, vector<128x128xbf16>
    %cst_8 = arith.constant dense<0.000000e+00> : vector<8x128xf32>
    %10 = tpu.matmul %8, %9, %cst_8 {dimension_numbers = #tpu.dot_dimension_numbers<[1], [0], [0], [1], [0, 0, 1, 1], [], []>} : vector<8x128xbf16>, vector<128x128xbf16>, vector<8x128xf32> -> vector<8x128xf32>
    %c0_9 = arith.constant 0 : index
    %c0_10 = arith.constant 0 : index
    %11 = vector.load %arg5[%c0_9, %c0_10] : memref<1x128xf32, #tpu.memory_space<vmem>>, vector<1x128xf32>
    %12 = vector.broadcast %11 : vector<1x128xf32> to vector<8x128xf32>
    %13 = arith.addf %10, %12 : vector<8x128xf32>
    %cst_11 = arith.constant 0.000000e+00 : f32
    %14 = vector.broadcast %cst_11 : f32 to vector<8x128xf32>
    %15 = arith.maximumf %13, %14 : vector<8x128xf32>
    %16 = arith.truncf %15 : vector<8x128xf32> to vector<8x128xbf16>
    %c0_12 = arith.constant 0 : index
    %c0_13 = arith.constant 0 : index
    %17 = vector.load %arg6[%c0_12, %c0_13] : memref<128x128xbf16, #tpu.memory_space<vmem>>, vector<128x128xbf16>
    %cst_14 = arith.constant dense<0.000000e+00> : vector<8x128xf32>
    %18 = tpu.matmul %16, %17, %cst_14 {dimension_numbers = #tpu.dot_dimension_numbers<[1], [0], [0], [1], [0, 0, 1, 1], [], []>} : vector<8x128xbf16>, vector<128x128xbf16>, vector<8x128xf32> -> vector<8x128xf32>
    %c0_15 = arith.constant 0 : index
    %c0_16 = arith.constant 0 : index
    %19 = vector.load %arg7[%c0_15, %c0_16] : memref<1x128xf32, #tpu.memory_space<vmem>>, vector<1x128xf32>
    %20 = vector.broadcast %19 : vector<1x128xf32> to vector<8x128xf32>
    %21 = arith.addf %18, %20 : vector<8x128xf32>
    %cst_17 = arith.constant dense<0xFF800000> : vector<8xf32>
    %22 = vector.multi_reduction <maximumf>, %21, %cst_17 [1] : vector<8x128xf32> to vector<8xf32>
    %23 = vector.shape_cast %22 : vector<8xf32> to vector<8x1xf32>
    %24 = vector.broadcast %23 : vector<8x1xf32> to vector<8x128xf32>
    %25 = arith.subf %21, %24 : vector<8x128xf32>
    %26 = math.exp %25 : vector<8x128xf32>
    %cst_18 = arith.constant dense<0.000000e+00> : vector<8xf32>
    %27 = vector.multi_reduction <add>, %26, %cst_18 [1] : vector<8x128xf32> to vector<8xf32>
    %28 = vector.shape_cast %27 : vector<8xf32> to vector<8x1xf32>
    %29 = vector.broadcast %28 : vector<8x1xf32> to vector<8x128xf32>
    %30 = arith.divf %26, %29 : vector<8x128xf32>
    %c0_19 = arith.constant 0 : index
    %c0_20 = arith.constant 0 : index
    %31 = vector.load %arg8[%c0_19, %c0_20] : memref<8x128xf32, #tpu.memory_space<vmem>>, vector<8x128xf32>
    tpu.vector_store %arg8[%c0_19, %c0_20], %30 {strides = array<i32>} : memref<8x128xf32, #tpu.memory_space<vmem>>, vector<8x128xf32>,
    return
  }
  func.func @transform_0(%arg0: i32) -> (i32, i32) {
    %c0_i32 = arith.constant 0 : i32
    %c0_i32_0 = arith.constant 0 : i32
    return %arg0, %c0_i32 : i32, i32
  }
  func.func @transform_1(%arg0: i32) -> (i32, i32) {
    %c0_i32 = arith.constant 0 : i32
    %c0_i32_0 = arith.constant 0 : i32
    %c0_i32_1 = arith.constant 0 : i32
    return %c0_i32, %c0_i32_0 : i32, i32
  }
  func.func @transform_2(%arg0: i32) -> (i32, i32) {
    %c0_i32 = arith.constant 0 : i32
    %c0_i32_0 = arith.constant 0 : i32
    %c0_i32_1 = arith.constant 0 : i32
    return %c0_i32, %c0_i32_0 : i32, i32
  }
  func.func @transform_3(%arg0: i32) -> (i32, i32) {
    %c0_i32 = arith.constant 0 : i32
    %c0_i32_0 = arith.constant 0 : i32
    %c0_i32_1 = arith.constant 0 : i32
    return %c0_i32, %c0_i32_0 : i32, i32
  }
  func.func @transform_4(%arg0: i32) -> (i32, i32) {
    %c0_i32 = arith.constant 0 : i32
    %c0_i32_0 = arith.constant 0 : i32
    %c0_i32_1 = arith.constant 0 : i32
    return %c0_i32, %c0_i32_0 : i32, i32
  }
  func.func @transform_5(%arg0: i32) -> (i32, i32) {
    %c0_i32 = arith.constant 0 : i32
    %c0_i32_0 = arith.constant 0 : i32
    %c0_i32_1 = arith.constant 0 : i32
    return %c0_i32, %c0_i32_0 : i32, i32
  }
  func.func @transform_6(%arg0: i32) -> (i32, i32) {
    %c0_i32 = arith.constant 0 : i32
    %c0_i32_0 = arith.constant 0 : i32
    %c0_i32_1 = arith.constant 0 : i32
    return %c0_i32, %c0_i32_0 : i32, i32
  }
  func.func @transform_7(%arg0: i32) -> (i32, i32) {
    %c0_i32 = arith.constant 0 : i32
    %c0_i32_0 = arith.constant 0 : i32
    return %arg0, %c0_i32 : i32, i32
  }
}

</mosaic_0001>

<bundles_post_ra>
// kernel: cifar_cnn_forward.3
= control target key start
LH: loop header
LB: loop body
LE: loop exit
PB: predicated region body
PF: predicated region fallthrough
CT: control target
= control target key end

     0   :  { %vm4118_vm0 = vmmov 0   ;;  %s5053_s1 = inlined_call_operand.vmem [shape: bf16[4096,128], index: 1, kind: input, shape index: {}]   ;;  %s5054_s0 = inlined_call_operand.vmem [shape: bf16[8,4096], index: 0, kind: input, shape index: {}]   ;;  %s5055_s2 = inlined_call_operand.vmem [shape: f32[1,128], index: 2, kind: input, shape index: {}]   ;;  %s5056_s3 = inlined_call_operand.vmem [shape: bf16[128,128], index: 3, kind: input, shape index: {}]   ;;  %s5057_s5 = inlined_call_operand.vmem [shape: bf16[128,128], index: 5, kind: input, shape index: {}]   ;;  %s5058_s4 = inlined_call_operand.vmem [shape: f32[1,128], index: 4, kind: input, shape index: {}]   ;;  %s5059_s6 = inlined_call_operand.vmem [shape: f32[1,128], index: 6, kind: input, shape index: {}]   ;;  %s5060_s7 = inlined_call_operand.vmem [shape: f32[8,128], index: 7, kind: output, shape index: {}]  }
   0x1   :  { %v3809_v0 = vld [vmem:[%s5053_s1 + $0x40] sm:$0xff]   ;;  %v3813_v4 = vld [vmem:[%s5053_s1 + $0x48] sm:$0xff]   ;;  %v3817_v8 = vld [vmem:[%s5053_s1 + $0x50] sm:$0xff]  }
   0x2   :  { %v3810_v1 = vld [vmem:[%s5053_s1 + $0xc0] sm:$0xff]   ;;  %3397 = vmatprep.subr.bf16.mxu0 %v3809_v0  ;;  %v3814_v5 = vld [vmem:[%s5053_s1 + $0xc8] sm:$0xff]   ;;  %v3818_v9 = vld [vmem:[%s5053_s1 + $0xd0] sm:$0xff]  }
   0x3   :  { %v3811_v2 = vld [vmem:[%s5053_s1] sm:$0xff]   ;;  %3419 = vmatprep.subr.bf16.mxu1 %v3810_v1  ;;  %v3815_v6 = vld [vmem:[%s5053_s1 + $0x8] sm:$0xff]   ;;  %v3819_v10 = vld [vmem:[%s5053_s1 + $0x10] sm:$0xff]  }
   0x4   :  { %v3812_v3 = vld [vmem:[%s5053_s1 + $0x80] sm:$0xff]   ;;  %3398 = vmatpush3.bf16.msra.mxu0 %v3811_v2  ;;  %v3816_v7 = vld [vmem:[%s5053_s1 + $0x88] sm:$0xff]   ;;  %v3820_v11 = vld [vmem:[%s5053_s1 + $0x90] sm:$0xff]  }
   0x5   :  { %3420 = vmatpush3.bf16.msra.mxu1 %v3812_v3  ;;  %3399 = vmatprep.subr.bf16.mxu0 %v3813_v4  ;;  %v3821_v12 = vld [vmem:[%s5053_s1 + $0x58] sm:$0xff]   ;;  %v3825_v16 = vld [vmem:[%s5053_s1 + $0x60] sm:$0xff]   ;;  %v3829_v20 = vld [vmem:[%s5053_s1 + $0x68] sm:$0xff]  }
   0x6   :  { %3421 = vmatprep.subr.bf16.mxu1 %v3814_v5  ;;  %v3822_v13 = vld [vmem:[%s5053_s1 + $0xd8] sm:$0xff]   ;;  %v3826_v17 = vld [vmem:[%s5053_s1 + $0xe0] sm:$0xff]   ;;  %v3830_v21 = vld [vmem:[%s5053_s1 + $0xe8] sm:$0xff]  }
   0x7   :  { %v3823_v14 = vld [vmem:[%s5053_s1 + $0x18] sm:$0xff]   ;;  %v3827_v18 = vld [vmem:[%s5053_s1 + $0x20] sm:$0xff]   ;;  %v3831_v22 = vld [vmem:[%s5053_s1 + $0x28] sm:$0xff]  }
   0x8   :  { %3400 = vmatpush3.bf16.msra.mxu0 %v3815_v6  ;;  %v3824_v15 = vld [vmem:[%s5053_s1 + $0x98] sm:$0xff]   ;;  %v3828_v19 = vld [vmem:[%s5053_s1 + $0xa0] sm:$0xff]   ;;  %v3832_v23 = vld [vmem:[%s5053_s1 + $0xa8] sm:$0xff]  }
   0x9   :  { %3422 = vmatpush3.bf16.msra.mxu1 %v3816_v7  ;;  %3401 = vmatprep.subr.bf16.mxu0 %v3817_v8  ;;  %v3833_v24 = vld [vmem:[%s5053_s1 + $0x70] sm:$0xff]   ;;  %v3837_v28 = vld [vmem:[%s5053_s1 + $0x78] sm:$0xff]   ;;  %v27_v32 = vld [vmem:[%s5054_s0] sm:$0xff] }
   0xa   :  { %3423 = vmatprep.subr.bf16.mxu1 %v3818_v9  ;;  %v3834_v25 = vld [vmem:[%s5053_s1 + $0xf0] sm:$0xff]   ;;  %v3838_v29 = vld [vmem:[%s5053_s1 + $0xf8] sm:$0xff]   ;;  %v28_v33 = vld [vmem:[%s5054_s0 + $0x8] sm:$0xff]  ;;  %v3091_v34 = vcombine.low %v27_v32, %v27_v32  ;;  %v3092_v35 = vcombine.high %v27_v32, %v27_v32 }
   0xb   :  { %v3835_v26 = vld [vmem:[%s5053_s1 + $0x30] sm:$0xff]   ;;  %v3839_v30 = vld [vmem:[%s5053_s1 + $0x38] sm:$0xff]   ;;  %v3093_v36 = vcombine.low %v28_v33, %v28_v33  ;;  %v3094_v37 = vcombine.high %v28_v33, %v28_v33  ;;  %v3845_v38 = vld [vmem:[%s5053_s1 + $0x140] sm:$0xff]  }
   0xc   :  { %3402 = vmatpush3.bf16.msra.mxu0 %v3819_v10  ;;  %v3836_v27 = vld [vmem:[%s5053_s1 + $0xb0] sm:$0xff]   ;;  %v3840_v31 = vld [vmem:[%s5053_s1 + $0xb8] sm:$0xff]   ;;  %v3846_v39 = vld [vmem:[%s5053_s1 + $0x1c0] sm:$0xff]   ;;  %2242 = vmatprep.mubr.bf16.mxu0 %v3092_v35 }
   0xd   :  { %3424 = vmatpush3.bf16.msra.mxu1 %v3820_v11  ;;  %3403 = vmatprep.subr.bf16.mxu0 %v3821_v12  ;;  %v3847_v40 = vld [vmem:[%s5053_s1 + $0x100] sm:$0xff]   ;;  %v3849_v42 = vld [vmem:[%s5053_s1 + $0x148] sm:$0xff]   ;;  %v3853_v46 = vld [vmem:[%s5053_s1 + $0x150] sm:$0xff]  }
   0xe   :  { %3425 = vmatprep.subr.bf16.mxu1 %v3822_v13  ;;  %2282 = vmatprep.mubr.bf16.mxu1 %v3094_v37  ;;  %v3848_v41 = vld [vmem:[%s5053_s1 + $0x180] sm:$0xff]   ;;  %v3850_v43 = vld [vmem:[%s5053_s1 + $0x1c8] sm:$0xff]   ;;  %v3854_v47 = vld [vmem:[%s5053_s1 + $0x1d0] sm:$0xff]  }
   0xf   :  { %v3851_v44 = vld [vmem:[%s5053_s1 + $0x108] sm:$0xff]   ;;  %v3855_v48 = vld [vmem:[%s5053_s1 + $0x110] sm:$0xff]   ;;  %v3857_v50 = vld [vmem:[%s5053_s1 + $0x158] sm:$0xff]  }
  0x10   :  { %3404 = vmatpush3.bf16.msra.mxu0 %v3823_v14  ;;  %v3852_v45 = vld [vmem:[%s5053_s1 + $0x188] sm:$0xff]   ;;  %v3856_v49 = vld [vmem:[%s5053_s1 + $0x190] sm:$0xff]   ;;  %v3858_v51 = vld [vmem:[%s5053_s1 + $0x1d8] sm:$0xff]  }
  0x11   :  { %3426 = vmatpush3.bf16.msra.mxu1 %v3824_v15  ;;  %3405 = vmatprep.subr.bf16.mxu0 %v3825_v16  ;;  %v3859_v52 = vld [vmem:[%s5053_s1 + $0x118] sm:$0xff]   ;;  %v3861_v54 = vld [vmem:[%s5053_s1 + $0x160] sm:$0xff]   ;;  %v3865_v58 = vld [vmem:[%s5053_s1 + $0x168] sm:$0xff]  }
  0x12   :  { %3427 = vmatprep.subr.bf16.mxu1 %v3826_v17  ;;  %v3860_v53 = vld [vmem:[%s5053_s1 + $0x198] sm:$0xff]   ;;  %v3862_v55 = vld [vmem:[%s5053_s1 + $0x1e0] sm:$0xff]   ;;  %v3866_v59 = vld [vmem:[%s5053_s1 + $0x1e8] sm:$0xff]  }
  0x13   :  { %v3863_v56 = vld [vmem:[%s5053_s1 + $0x120] sm:$0xff]   ;;  %v3867_v60 = vld [vmem:[%s5053_s1 + $0x128] sm:$0xff]   ;;  %v3869_v62 = vld [vmem:[%s5053_s1 + $0x170] sm:$0xff]  }
  0x14   :  { %3406 = vmatpush3.bf16.msra.mxu0 %v3827_v18  ;;  %v3864_v57 = vld [vmem:[%s5053_s1 + $0x1a0] sm:$0xff]   ;;  %v3868_v61 = vld [vmem:[%s5053_s1 + $0x1a8] sm:$0xff]   ;;  %v3870_v63 = vld [vmem:[%s5053_s1 + $0x1f0] sm:$0xff]  }
  0x15   :  { %3428 = vmatpush3.bf16.msra.mxu1 %v3828_v19  ;;  %3407 = vmatprep.subr.bf16.mxu0 %v3829_v20  ;;  %v3871_v0 = vld [vmem:[%s5053_s1 + $0x130] sm:$0xff]   ;;  %v3873_v2 = vld [vmem:[%s5053_s1 + $0x178] sm:$0xff]   ;;  %v3881_v12 = vld [vmem:[%s5053_s1 + $0x240] sm:$0xff]  }
  0x16   :  { %3429 = vmatprep.subr.bf16.mxu1 %v3830_v21  ;;  %v3872_v1 = vld [vmem:[%s5053_s1 + $0x1b0] sm:$0xff]   ;;  %v3874_v3 = vld [vmem:[%s5053_s1 + $0x1f8] sm:$0xff]   ;;  %v3882_v13 = vld [vmem:[%s5053_s1 + $0x2c0] sm:$0xff]  }
  0x17   :  { %v3875_v4 = vld [vmem:[%s5053_s1 + $0x138] sm:$0xff]   ;;  %v29_v6 = vld [vmem:[%s5054_s0 + $0x10] sm:$0xff]  ;;  %v3883_v14 = vld [vmem:[%s5053_s1 + $0x200] sm:$0xff]  }
  0x18   :  { %3408 = vmatpush3.bf16.msra.mxu0 %v3831_v22  ;;  %v3876_v5 = vld [vmem:[%s5053_s1 + $0x1b8] sm:$0xff]   ;;  %v3095_v7 = vcombine.low %v29_v6, %v29_v6  ;;  %v3096_v8 = vcombine.high %v29_v6, %v29_v6  ;;  %v3884_v15 = vld [vmem:[%s5053_s1 + $0x280] sm:$0xff]   ;;  %v3885_v16 = vld [vmem:[%s5053_s1 + $0x248] sm:$0xff]  }
  0x19   :  { %3430 = vmatpush3.bf16.msra.mxu1 %v3832_v23  ;;  %3409 = vmatprep.subr.bf16.mxu0 %v3833_v24  ;;  %v30_v9 = vld [vmem:[%s5054_s0 + $0x18] sm:$0xff]  ;;  %v3886_v17 = vld [vmem:[%s5053_s1 + $0x2c8] sm:$0xff]   ;;  %v3889_v20 = vld [vmem:[%s5053_s1 + $0x250] sm:$0xff]  }
  0x1a   :  { %3431 = vmatprep.subr.bf16.mxu1 %v3834_v25  ;;  %v3097_v10 = vcombine.low %v30_v9, %v30_v9  ;;  %v3098_v11 = vcombine.high %v30_v9, %v30_v9  ;;  %v3887_v18 = vld [vmem:[%s5053_s1 + $0x208] sm:$0xff]   ;;  %v3890_v21 = vld [vmem:[%s5053_s1 + $0x2d0] sm:$0xff]   ;;  %v3893_v24 = vld [vmem:[%s5053_s1 + $0x258] sm:$0xff]  }
  0x1b   :  { %v3888_v19 = vld [vmem:[%s5053_s1 + $0x288] sm:$0xff]   ;;  %v3891_v22 = vld [vmem:[%s5053_s1 + $0x210] sm:$0xff]   ;;  %v3894_v25 = vld [vmem:[%s5053_s1 + $0x2d8] sm:$0xff]  }
  0x1c   :  { %3410 = vmatpush3.bf16.msra.mxu0 %v3835_v26  ;;  %v3892_v23 = vld [vmem:[%s5053_s1 + $0x290] sm:$0xff]   ;;  %v3895_v26 = vld [vmem:[%s5053_s1 + $0x218] sm:$0xff]   ;;  %v3901_v32 = vld [vmem:[%s5053_s1 + $0x268] sm:$0xff]  }
  0x1d   :  { %3432 = vmatpush3.bf16.msra.mxu1 %v3836_v27  ;;  %3411 = vmatprep.subr.bf16.mxu0 %v3837_v28  ;;  %v3896_v27 = vld [vmem:[%s5053_s1 + $0x298] sm:$0xff]   ;;  %v3897_v28 = vld [vmem:[%s5053_s1 + $0x260] sm:$0xff]   ;;  %v3902_v33 = vld [vmem:[%s5053_s1 + $0x2e8] sm:$0xff]  }
  0x1e   :  { %3433 = vmatprep.subr.bf16.mxu1 %v3838_v29  ;;  %v3898_v29 = vld [vmem:[%s5053_s1 + $0x2e0] sm:$0xff]   ;;  %v3904_v35 = vld [vmem:[%s5053_s1 + $0x2a8] sm:$0xff]   ;;  %v3906_v37 = vld [vmem:[%s5053_s1 + $0x2f0] sm:$0xff]  }
  0x1f   :  { %v3937_v6 = vld [vmem:[%s5053_s1 + $0x368] sm:$0xff]  }
  0x20   :  { %3412 = vmatpush3.bf16.msra.mxu0 %v3839_v30  ;;  %v3899_v30 = vld [vmem:[%s5053_s1 + $0x220] sm:$0xff]   ;;  %v3940_v9 = vld [vmem:[%s5053_s1 + $0x3a8] sm:$0xff]  }
  0x21   :  { %3434 = vmatpush3.bf16.msra.mxu1 %v3840_v31  ;;  %3441 = vmatprep.subr.bf16.mxu0 %v3845_v38  ;;  %v3900_v31 = vld [vmem:[%s5053_s1 + $0x2a0] sm:$0xff]   ;;  %v3907_v38 = vld [vmem:[%s5053_s1 + $0x230] sm:$0xff]  }
  0x22   :  { %3463 = vmatprep.subr.bf16.mxu1 %v3846_v39  ;;  %v3908_v39 = vld [vmem:[%s5053_s1 + $0x2b0] sm:$0xff]  }
  0x23   :  { %2243 = vmatmul.mubr.bf16.vlgmr.msra.gmra.mrb[0].mxu0 %v3091_v34  ;;  %v3903_v34 = vld [vmem:[%s5053_s1 + $0x228] sm:$0xff]  }
  0x24   :  { %2283 = vmatmul.mubr.bf16.vlgmr.msra.gmra.mrb[0].mxu1 %v3093_v36  ;;  %3442 = vmatpush3.bf16.msra.mxu0 %v3847_v40  ;;  %v3905_v36 = vld [vmem:[%s5053_s1 + $0x270] sm:$0xff]   ;;  %v3909_v40 = vld [vmem:[%s5053_s1 + $0x278] sm:$0xff]  }
  0x25   :  { %3464 = vmatpush3.bf16.msra.mxu1 %v3848_v41  ;;  %3443 = vmatprep.subr.bf16.mxu0 %v3849_v42  ;;  %v3910_v41 = vld [vmem:[%s5053_s1 + $0x2f8] sm:$0xff]  }
  0x26   :  { %3465 = vmatprep.subr.bf16.mxu1 %v3850_v43  ;;  %2322 = vmatprep.mubr.bf16.mxu0 %v3096_v8  ;;  %v3911_v42 = vld [vmem:[%s5053_s1 + $0x238] sm:$0xff]   ;;  %v3939_v8 = vld [vmem:[%s5053_s1 + $0x328] sm:$0xff]  }
  0x27   :  { %2362 = vmatprep.mubr.bf16.mxu1 %v3098_v11  ;;  %v3912_v43 = vld [vmem:[%s5053_s1 + $0x2b8] sm:$0xff]   ;;  %v3942_v11 = vld [vmem:[%s5053_s1 + $0x3f0] sm:$0xff]  }
  0x28   :  { %3444 = vmatpush3.bf16.msra.mxu0 %v3851_v44  ;;  %v31_v44 = vld [vmem:[%s5054_s0 + $0x20] sm:$0xff] }
  0x29   :  { %3466 = vmatpush3.bf16.msra.mxu1 %v3852_v45  ;;  %3445 = vmatprep.subr.bf16.mxu0 %v3853_v46  ;;  %v32_v45 = vld [vmem:[%s5054_s0 + $0x28] sm:$0xff]  ;;  %v3099_v46 = vcombine.low %v31_v44, %v31_v44 }
  0x2a   :  { %3467 = vmatprep.subr.bf16.mxu1 %v3854_v47  ;;  %v3100_v47 = vcombine.high %v31_v44, %v31_v44  ;;  %v3973_v44 = vld [vmem:[%s5053_s1 + $0x468] sm:$0xff]  }
  0x2c   :  { %3446 = vmatpush3.bf16.msra.mxu0 %v3855_v48  ;;  %v3101_v48 = vcombine.low %v32_v45, %v32_v45 }
  0x2d   :  { %3468 = vmatpush3.bf16.msra.mxu1 %v3856_v49  ;;  %3447 = vmatprep.subr.bf16.mxu0 %v3857_v50  ;;  %v3102_v49 = vcombine.high %v32_v45, %v32_v45  ;;  %v3917_v50 = vld [vmem:[%s5053_s1 + $0x340] sm:$0xff]   ;;  %v3974_v45 = vld [vmem:[%s5053_s1 + $0x4e8] sm:$0xff]  }
  0x2e   :  { %3469 = vmatprep.subr.bf16.mxu1 %v3858_v51  ;;  %v3918_v51 = vld [vmem:[%s5053_s1 + $0x3c0] sm:$0xff]  }
  0x30   :  { %3448 = vmatpush3.bf16.msra.mxu0 %v3859_v52  ;;  %v3919_v52 = vld [vmem:[%s5053_s1 + $0x300] sm:$0xff]  }
  0x31   :  { %3470 = vmatpush3.bf16.msra.mxu1 %v3860_v53  ;;  %3449 = vmatprep.subr.bf16.mxu0 %v3861_v54  ;;  %v3920_v53 = vld [vmem:[%s5053_s1 + $0x380] sm:$0xff]   ;;  %v3921_v54 = vld [vmem:[%s5053_s1 + $0x348] sm:$0xff]  }
  0x32   :  { %3471 = vmatprep.subr.bf16.mxu1 %v3862_v55  ;;  %v3922_v55 = vld [vmem:[%s5053_s1 + $0x3c8] sm:$0xff]  }
  0x34   :  { %3450 = vmatpush3.bf16.msra.mxu0 %v3863_v56  ;;  %v3923_v56 = vld [vmem:[%s5053_s1 + $0x308] sm:$0xff]  }
  0x35   :  { %3472 = vmatpush3.bf16.msra.mxu1 %v3864_v57  ;;  %3451 = vmatprep.subr.bf16.mxu0 %v3865_v58  ;;  %v3924_v57 = vld [vmem:[%s5053_s1 + $0x388] sm:$0xff]   ;;  %v3925_v58 = vld [vmem:[%s5053_s1 + $0x350] sm:$0xff]  }
  0x36   :  { %3473 = vmatprep.subr.bf16.mxu1 %v3866_v59  ;;  %v3926_v59 = vld [vmem:[%s5053_s1 + $0x3d0] sm:$0xff]  }
  0x38   :  { %3452 = vmatpush3.bf16.msra.mxu0 %v3867_v60  ;;  %v3927_v60 = vld [vmem:[%s5053_s1 + $0x310] sm:$0xff]  }
  0x39   :  { %3474 = vmatpush3.bf16.msra.mxu1 %v3868_v61  ;;  %3453 = vmatprep.subr.bf16.mxu0 %v3869_v62  ;;  %v3928_v61 = vld [vmem:[%s5053_s1 + $0x390] sm:$0xff]   ;;  %v3929_v62 = vld [vmem:[%s5053_s1 + $0x358] sm:$0xff]  }
  0x3a   :  { %3475 = vmatprep.subr.bf16.mxu1 %v3870_v63  ;;  %v3930_v63 = vld [vmem:[%s5053_s1 + $0x3d8] sm:$0xff]  }
  0x3c   :  { %3454 = vmatpush3.bf16.msra.mxu0 %v3871_v0  ;;  %v3931_v0 = vld [vmem:[%s5053_s1 + $0x318] sm:$0xff]  }
  0x3d   :  { %3476 = vmatpush3.bf16.msra.mxu1 %v3872_v1  ;;  %3455 = vmatprep.subr.bf16.mxu0 %v3873_v2  ;;  %v3932_v1 = vld [vmem:[%s5053_s1 + $0x398] sm:$0xff]   ;;  %v3933_v2 = vld [vmem:[%s5053_s1 + $0x360] sm:$0xff]  }
  0x3e   :  { %3477 = vmatprep.subr.bf16.mxu1 %v3874_v3  ;;  %v3934_v3 = vld [vmem:[%s5053_s1 + $0x3e0] sm:$0xff]  }
  0x40   :  { %3456 = vmatpush3.bf16.msra.mxu0 %v3875_v4  ;;  %v3935_v4 = vld [vmem:[%s5053_s1 + $0x320] sm:$0xff]  }
  0x41   :  { %3478 = vmatpush3.bf16.msra.mxu1 %v3876_v5  ;;  %3485 = vmatprep.subr.bf16.mxu0 %v3881_v12  ;;  %v3936_v5 = vld [vmem:[%s5053_s1 + $0x3a0] sm:$0xff]   ;;  %v3943_v12 = vld [vmem:[%s5053_s1 + $0x330] sm:$0xff]  }
  0x42   :  { %3507 = vmatprep.subr.bf16.mxu1 %v3882_v13  ;;  %v3944_v13 = vld [vmem:[%s5053_s1 + $0x3b0] sm:$0xff]  }
  0x43   :  { %2323 = vmatmul.mubr.bf16.vlgmr.msra.gmra.mrb[4].mxu0 %v3095_v7  ;;  %v3938_v7 = vld [vmem:[%s5053_s1 + $0x3e8] sm:$0xff]  }
  0x44   :  { %2363 = vmatmul.mubr.bf16.vlgmr.msra.gmra.mrb[4].mxu1 %v3097_v10  ;;  %3486 = vmatpush3.bf16.msra.mxu0 %v3883_v14  ;;  %v3941_v10 = vld [vmem:[%s5053_s1 + $0x370] sm:$0xff]   ;;  %v3945_v14 = vld [vmem:[%s5053_s1 + $0x378] sm:$0xff]  }
  0x45   :  { %3508 = vmatpush3.bf16.msra.mxu1 %v3884_v15  ;;  %3487 = vmatprep.subr.bf16.mxu0 %v3885_v16  ;;  %v3946_v15 = vld [vmem:[%s5053_s1 + $0x3f8] sm:$0xff]  }
  0x46   :  { %3509 = vmatprep.subr.bf16.mxu1 %v3886_v17  ;;  %2402 = vmatprep.mubr.bf16.mxu0 %v3100_v47  ;;  %v3947_v16 = vld [vmem:[%s5053_s1 + $0x338] sm:$0xff]   ;;  %v3976_v47 = vld [vmem:[%s5053_s1 + $0x4a8] sm:$0xff]  }
  0x47   :  { %2442 = vmatprep.mubr.bf16.mxu1 %v3102_v49  ;;  %v3948_v17 = vld [vmem:[%s5053_s1 + $0x3b8] sm:$0xff]   ;;  %v3978_v49 = vld [vmem:[%s5053_s1 + $0x4f0] sm:$0xff]  }
  0x48   :  { %3488 = vmatpush3.bf16.msra.mxu0 %v3887_v18  ;;  %v33_v18 = vld [vmem:[%s5054_s0 + $0x30] sm:$0xff] }
  0x49   :  { %3510 = vmatpush3.bf16.msra.mxu1 %v3888_v19  ;;  %3489 = vmatprep.subr.bf16.mxu0 %v3889_v20  ;;  %v34_v19 = vld [vmem:[%s5054_s0 + $0x38] sm:$0xff]  ;;  %v3103_v20 = vcombine.low %v33_v18, %v33_v18 }
  0x4a   :  { %3511 = vmatprep.subr.bf16.mxu1 %v3890_v21  ;;  %v3104_v21 = vcombine.high %v33_v18, %v33_v18  ;;  %v4009_v18 = vld [vmem:[%s5053_s1 + $0x568] sm:$0xff]  }
  0x4c   :  { %3490 = vmatpush3.bf16.msra.mxu0 %v3891_v22  ;;  %v3105_v22 = vcombine.low %v34_v19, %v34_v19 }
  0x4d   :  { %3512 = vmatpush3.bf16.msra.mxu1 %v3892_v23  ;;  %3491 = vmatprep.subr.bf16.mxu0 %v3893_v24  ;;  %v3953_v23 = vld [vmem:[%s5053_s1 + $0x440] sm:$0xff]   ;;  %v3106_v24 = vcombine.high %v34_v19, %v34_v19  ;;  %v4010_v19 = vld [vmem:[%s5053_s1 + $0x5e8] sm:$0xff]  }
  0x4e   :  { %3513 = vmatprep.subr.bf16.mxu1 %v3894_v25  ;;  %v3954_v25 = vld [vmem:[%s5053_s1 + $0x4c0] sm:$0xff]  }
  0x50   :  { %3492 = vmatpush3.bf16.msra.mxu0 %v3895_v26  ;;  %v3955_v26 = vld [vmem:[%s5053_s1 + $0x400] sm:$0xff]  }
  0x51   :  { %3514 = vmatpush3.bf16.msra.mxu1 %v3896_v27  ;;  %3493 = vmatprep.subr.bf16.mxu0 %v3897_v28  ;;  %v3956_v27 = vld [vmem:[%s5053_s1 + $0x480] sm:$0xff]   ;;  %v3957_v28 = vld [vmem:[%s5053_s1 + $0x448] sm:$0xff]  }
  0x52   :  { %3515 = vmatprep.subr.bf16.mxu1 %v3898_v29  ;;  %v3958_v29 = vld [vmem:[%s5053_s1 + $0x4c8] sm:$0xff]  }
  0x54   :  { %3494 = vmatpush3.bf16.msra.mxu0 %v3899_v30  ;;  %v3959_v30 = vld [vmem:[%s5053_s1 + $0x408] sm:$0xff]  }
  0x55   :  { %3516 = vmatpush3.bf16.msra.mxu1 %v3900_v31  ;;  %3495 = vmatprep.subr.bf16.mxu0 %v3901_v32  ;;  %v3960_v31 = vld [vmem:[%s5053_s1 + $0x488] sm:$0xff]   ;;  %v3961_v32 = vld [vmem:[%s5053_s1 + $0x450] sm:$0xff]  }
  0x56   :  { %3517 = vmatprep.subr.bf16.mxu1 %v3902_v33  ;;  %v3962_v33 = vld [vmem:[%s5053_s1 + $0x4d0] sm:$0xff]  }
  0x58   :  { %3496 = vmatpush3.bf16.msra.mxu0 %v3903_v34  ;;  %v3963_v34 = vld [vmem:[%s5053_s1 + $0x410] sm:$0xff]  }
  0x59   :  { %3518 = vmatpush3.bf16.msra.mxu1 %v3904_v35  ;;  %3497 = vmatprep.subr.bf16.mxu0 %v3905_v36  ;;  %v3964_v35 = vld [vmem:[%s5053_s1 + $0x490] sm:$0xff]   ;;  %v3965_v36 = vld [vmem:[%s5053_s1 + $0x458] sm:$0xff]  }
  0x5a   :  { %3519 = vmatprep.subr.bf16.mxu1 %v3906_v37  ;;  %v3966_v37 = vld [vmem:[%s5053_s1 + $0x4d8] sm:$0xff]  }
  0x5c   :  { %3498 = vmatpush3.bf16.msra.mxu0 %v3907_v38  ;;  %v3967_v38 = vld [vmem:[%s5053_s1 + $0x418] sm:$0xff]  }
  0x5d   :  { %3520 = vmatpush3.bf16.msra.mxu1 %v3908_v39  ;;  %3499 = vmatprep.subr.bf16.mxu0 %v3909_v40  ;;  %v3968_v39 = vld [vmem:[%s5053_s1 + $0x498] sm:$0xff]   ;;  %v3969_v40 = vld [vmem:[%s5053_s1 + $0x460] sm:$0xff]  }
  0x5e   :  { %3521 = vmatprep.subr.bf16.mxu1 %v3910_v41  ;;  %v3970_v41 = vld [vmem:[%s5053_s1 + $0x4e0] sm:$0xff]  }
  0x60   :  { %3500 = vmatpush3.bf16.msra.mxu0 %v3911_v42  ;;  %v3971_v42 = vld [vmem:[%s5053_s1 + $0x420] sm:$0xff]  }
  0x61   :  { %3522 = vmatpush3.bf16.msra.mxu1 %v3912_v43  ;;  %3529 = vmatprep.subr.bf16.mxu0 %v3917_v50  ;;  %v3972_v43 = vld [vmem:[%s5053_s1 + $0x4a0] sm:$0xff]   ;;  %v3979_v50 = vld [vmem:[%s5053_s1 + $0x430] sm:$0xff]  }
  0x62   :  { %3551 = vmatprep.subr.bf16.mxu1 %v3918_v51  ;;  %v3980_v51 = vld [vmem:[%s5053_s1 + $0x4b0] sm:$0xff]  }
  0x63   :  { %2403 = vmatmul.mubr.bf16.vlgmr.msra.gmra.mrb[8].mxu0 %v3099_v46  ;;  %v3975_v46 = vld [vmem:[%s5053_s1 + $0x428] sm:$0xff]  }
  0x64   :  { %2443 = vmatmul.mubr.bf16.vlgmr.msra.gmra.mrb[8].mxu1 %v3101_v48  ;;  %3530 = vmatpush3.bf16.msra.mxu0 %v3919_v52  ;;  %v3977_v48 = vld [vmem:[%s5053_s1 + $0x470] sm:$0xff]   ;;  %v3981_v52 = vld [vmem:[%s5053_s1 + $0x478] sm:$0xff]  }
  0x65   :  { %3552 = vmatpush3.bf16.msra.mxu1 %v3920_v53  ;;  %3531 = vmatprep.subr.bf16.mxu0 %v3921_v54  ;;  %v3982_v53 = vld [vmem:[%s5053_s1 + $0x4f8] sm:$0xff]  }
  0x66   :  { %3553 = vmatprep.subr.bf16.mxu1 %v3922_v55  ;;  %2482 = vmatprep.mubr.bf16.mxu0 %v3104_v21  ;;  %v3983_v54 = vld [vmem:[%s5053_s1 + $0x438] sm:$0xff]   ;;  %v4012_v21 = vld [vmem:[%s5053_s1 + $0x5a8] sm:$0xff]  }
  0x67   :  { %2522 = vmatprep.mubr.bf16.mxu1 %v3106_v24  ;;  %v3984_v55 = vld [vmem:[%s5053_s1 + $0x4b8] sm:$0xff]   ;;  %v4015_v24 = vld [vmem:[%s5053_s1 + $0x530] sm:$0xff]  }
  0x68   :  { %3532 = vmatpush3.bf16.msra.mxu0 %v3923_v56  ;;  %v35_v56 = vld [vmem:[%s5054_s0 + $0x40] sm:$0xff] }
  0x69   :  { %3554 = vmatpush3.bf16.msra.mxu1 %v3924_v57  ;;  %3533 = vmatprep.subr.bf16.mxu0 %v3925_v58  ;;  %v3107_v57 = vcombine.low %v35_v56, %v35_v56  ;;  %v3108_v58 = vcombine.high %v35_v56, %v35_v56  ;;  %v4045_v56 = vld [vmem:[%s5053_s1 + $0x668] sm:$0xff]  }
  0x6a   :  { %3555 = vmatprep.subr.bf16.mxu1 %v3926_v59  ;;  %v36_v59 = vld [vmem:[%s5054_s0 + $0x48] sm:$0xff] }
  0x6c   :  { %3534 = vmatpush3.bf16.msra.mxu0 %v3927_v60  ;;  %v3109_v60 = vcombine.low %v36_v59, %v36_v59 }
  0x6d   :  { %3556 = vmatpush3.bf16.msra.mxu1 %v3928_v61  ;;  %3535 = vmatprep.subr.bf16.mxu0 %v3929_v62  ;;  %v3110_v61 = vcombine.high %v36_v59, %v36_v59  ;;  %v3989_v62 = vld [vmem:[%s5053_s1 + $0x540] sm:$0xff]   ;;  %v4048_v59 = vld [vmem:[%s5053_s1 + $0x6a8] sm:$0xff]  }
  0x6e   :  { %3557 = vmatprep.subr.bf16.mxu1 %v3930_v63  ;;  %v3990_v63 = vld [vmem:[%s5053_s1 + $0x5c0] sm:$0xff]  }
  0x70   :  { %3536 = vmatpush3.bf16.msra.mxu0 %v3931_v0  ;;  %v3991_v0 = vld [vmem:[%s5053_s1 + $0x500] sm:$0xff]  }
  0x71   :  { %3558 = vmatpush3.bf16.msra.mxu1 %v3932_v1  ;;  %3537 = vmatprep.subr.bf16.mxu0 %v3933_v2  ;;  %v3992_v1 = vld [vmem:[%s5053_s1 + $0x580] sm:$0xff]   ;;  %v3993_v2 = vld [vmem:[%s5053_s1 + $0x548] sm:$0xff]  }
  0x72   :  { %3559 = vmatprep.subr.bf16.mxu1 %v3934_v3  ;;  %v3994_v3 = vld [vmem:[%s5053_s1 + $0x5c8] sm:$0xff]  }
  0x74   :  { %3538 = vmatpush3.bf16.msra.mxu0 %v3935_v4  ;;  %v3995_v4 = vld [vmem:[%s5053_s1 + $0x508] sm:$0xff]  }
  0x75   :  { %3560 = vmatpush3.bf16.msra.mxu1 %v3936_v5  ;;  %3539 = vmatprep.subr.bf16.mxu0 %v3937_v6  ;;  %v3996_v5 = vld [vmem:[%s5053_s1 + $0x588] sm:$0xff]   ;;  %v3997_v6 = vld [vmem:[%s5053_s1 + $0x550] sm:$0xff]  }
  0x76   :  { %3561 = vmatprep.subr.bf16.mxu1 %v3938_v7  ;;  %v3998_v7 = vld [vmem:[%s5053_s1 + $0x5d0] sm:$0xff]  }
  0x78   :  { %3540 = vmatpush3.bf16.msra.mxu0 %v3939_v8  ;;  %v3999_v8 = vld [vmem:[%s5053_s1 + $0x510] sm:$0xff]  }
  0x79   :  { %3562 = vmatpush3.bf16.msra.mxu1 %v3940_v9  ;;  %3541 = vmatprep.subr.bf16.mxu0 %v3941_v10  ;;  %v4000_v9 = vld [vmem:[%s5053_s1 + $0x590] sm:$0xff]   ;;  %v4001_v10 = vld [vmem:[%s5053_s1 + $0x558] sm:$0xff]  }
  0x7a   :  { %3563 = vmatprep.subr.bf16.mxu1 %v3942_v11  ;;  %v4002_v11 = vld [vmem:[%s5053_s1 + $0x5d8] sm:$0xff]  }
  0x7c   :  { %3542 = vmatpush3.bf16.msra.mxu0 %v3943_v12  ;;  %v4003_v12 = vld [vmem:[%s5053_s1 + $0x518] sm:$0xff]  }
  0x7d   :  { %3564 = vmatpush3.bf16.msra.mxu1 %v3944_v13  ;;  %3543 = vmatprep.subr.bf16.mxu0 %v3945_v14  ;;  %v4004_v13 = vld [vmem:[%s5053_s1 + $0x598] sm:$0xff]   ;;  %v4005_v14 = vld [vmem:[%s5053_s1 + $0x560] sm:$0xff]  }
  0x7e   :  { %3565 = vmatprep.subr.bf16.mxu1 %v3946_v15  ;;  %v4006_v15 = vld [vmem:[%s5053_s1 + $0x5e0] sm:$0xff]  }
  0x80   :  { %3544 = vmatpush3.bf16.msra.mxu0 %v3947_v16  ;;  %v4007_v16 = vld [vmem:[%s5053_s1 + $0x520] sm:$0xff]  }
  0x81   :  { %3566 = vmatpush3.bf16.msra.mxu1 %v3948_v17  ;;  %3573 = vmatprep.subr.bf16.mxu0 %v3953_v23  ;;  %v4008_v17 = vld [vmem:[%s5053_s1 + $0x5a0] sm:$0xff]   ;;  %v4014_v23 = vld [vmem:[%s5053_s1 + $0x5f0] sm:$0xff]  }
  0x82   :  { %3595 = vmatprep.subr.bf16.mxu1 %v3954_v25  ;;  %v4016_v25 = vld [vmem:[%s5053_s1 + $0x5b0] sm:$0xff]  }
  0x83   :  { %2483 = vmatmul.mubr.bf16.vlgmr.msra.gmra.mrb[12].mxu0 %v3103_v20  ;;  %v4011_v20 = vld [vmem:[%s5053_s1 + $0x528] sm:$0xff]  }
  0x84   :  { %2523 = vmatmul.mubr.bf16.vlgmr.msra.gmra.mrb[12].mxu1 %v3105_v22  ;;  %3574 = vmatpush3.bf16.msra.mxu0 %v3955_v26  ;;  %v4013_v22 = vld [vmem:[%s5053_s1 + $0x570] sm:$0xff]   ;;  %v4017_v26 = vld [vmem:[%s5053_s1 + $0x578] sm:$0xff]  }
  0x85   :  { %3596 = vmatpush3.bf16.msra.mxu1 %v3956_v27  ;;  %3575 = vmatprep.subr.bf16.mxu0 %v3957_v28  ;;  %v4018_v27 = vld [vmem:[%s5053_s1 + $0x5f8] sm:$0xff]  }
  0x86   :  { %3597 = vmatprep.subr.bf16.mxu1 %v3958_v29  ;;  %2562 = vmatprep.mubr.bf16.mxu0 %v3108_v58  ;;  %v4019_v28 = vld [vmem:[%s5053_s1 + $0x538] sm:$0xff]   ;;  %v4047_v58 = vld [vmem:[%s5053_s1 + $0x628] sm:$0xff]  }
  0x87   :  { %2602 = vmatprep.mubr.bf16.mxu1 %v3110_v61  ;;  %v4020_v29 = vld [vmem:[%s5053_s1 + $0x5b8] sm:$0xff]   ;;  %v4050_v61 = vld [vmem:[%s5053_s1 + $0x6f0] sm:$0xff]  }
  0x88   :  { %3576 = vmatpush3.bf16.msra.mxu0 %v3959_v30  ;;  %v37_v30 = vld [vmem:[%s5054_s0 + $0x50] sm:$0xff] }
  0x89   :  { %3598 = vmatpush3.bf16.msra.mxu1 %v3960_v31  ;;  %3577 = vmatprep.subr.bf16.mxu0 %v3961_v32  ;;  %v38_v31 = vld [vmem:[%s5054_s0 + $0x58] sm:$0xff]  ;;  %v3111_v32 = vcombine.low %v37_v30, %v37_v30 }
  0x8a   :  { %3599 = vmatprep.subr.bf16.mxu1 %v3962_v33  ;;  %v3112_v33 = vcombine.high %v37_v30, %v37_v30  ;;  %v4080_v30 = vld [vmem:[%s5053_s1 + $0x7a0] sm:$0xff]  }
  0x8c   :  { %3578 = vmatpush3.bf16.msra.mxu0 %v3963_v34  ;;  %v3113_v34 = vcombine.low %v38_v31, %v38_v31 }
  0x8d   :  { %3600 = vmatpush3.bf16.msra.mxu1 %v3964_v35  ;;  %3579 = vmatprep.subr.bf16.mxu0 %v3965_v36  ;;  %v3114_v35 = vcombine.high %v38_v31, %v38_v31  ;;  %v4025_v36 = vld [vmem:[%s5053_s1 + $0x640] sm:$0xff]  }
  0x8e   :  { %3601 = vmatprep.subr.bf16.mxu1 %v3966_v37  ;;  %v4026_v37 = vld [vmem:[%s5053_s1 + $0x6c0] sm:$0xff]  }
  0x90   :  { %3580 = vmatpush3.bf16.msra.mxu0 %v3967_v38  ;;  %v4027_v38 = vld [vmem:[%s5053_s1 + $0x600] sm:$0xff]  }
  0x91   :  { %3602 = vmatpush3.bf16.msra.mxu1 %v3968_v39  ;;  %3581 = vmatprep.subr.bf16.mxu0 %v3969_v40  ;;  %v4028_v39 = vld [vmem:[%s5053_s1 + $0x680] sm:$0xff]   ;;  %v4029_v40 = vld [vmem:[%s5053_s1 + $0x648] sm:$0xff]  }
  0x92   :  { %3603 = vmatprep.subr.bf16.mxu1 %v3970_v41  ;;  %v4030_v41 = vld [vmem:[%s5053_s1 + $0x6c8] sm:$0xff]  }
  0x94   :  { %3582 = vmatpush3.bf16.msra.mxu0 %v3971_v42  ;;  %v4031_v42 = vld [vmem:[%s5053_s1 + $0x608] sm:$0xff]  }
  0x95   :  { %3604 = vmatpush3.bf16.msra.mxu1 %v3972_v43  ;;  %3583 = vmatprep.subr.bf16.mxu0 %v3973_v44  ;;  %v4032_v43 = vld [vmem:[%s5053_s1 + $0x688] sm:$0xff]   ;;  %v4033_v44 = vld [vmem:[%s5053_s1 + $0x650] sm:$0xff]  }
  0x96   :  { %3605 = vmatprep.subr.bf16.mxu1 %v3974_v45  ;;  %v4034_v45 = vld [vmem:[%s5053_s1 + $0x6d0] sm:$0xff]  }
  0x98   :  { %3584 = vmatpush3.bf16.msra.mxu0 %v3975_v46  ;;  %v4035_v46 = vld [vmem:[%s5053_s1 + $0x610] sm:$0xff]  }
  0x99   :  { %3606 = vmatpush3.bf16.msra.mxu1 %v3976_v47  ;;  %3585 = vmatprep.subr.bf16.mxu0 %v3977_v48  ;;  %v4036_v47 = vld [vmem:[%s5053_s1 + $0x690] sm:$0xff]   ;;  %v4037_v48 = vld [vmem:[%s5053_s1 + $0x658] sm:$0xff]  }
  0x9a   :  { %3607 = vmatprep.subr.bf16.mxu1 %v3978_v49  ;;  %v4038_v49 = vld [vmem:[%s5053_s1 + $0x6d8] sm:$0xff]  }
  0x9c   :  { %3586 = vmatpush3.bf16.msra.mxu0 %v3979_v50  ;;  %v4039_v50 = vld [vmem:[%s5053_s1 + $0x618] sm:$0xff]  }
  0x9d   :  { %3608 = vmatpush3.bf16.msra.mxu1 %v3980_v51  ;;  %3587 = vmatprep.subr.bf16.mxu0 %v3981_v52  ;;  %v4040_v51 = vld [vmem:[%s5053_s1 + $0x698] sm:$0xff]   ;;  %v4041_v52 = vld [vmem:[%s5053_s1 + $0x660] sm:$0xff]  }
  0x9e   :  { %3609 = vmatprep.subr.bf16.mxu1 %v3982_v53  ;;  %v4042_v53 = vld [vmem:[%s5053_s1 + $0x6e0] sm:$0xff]  }
  0xa0   :  { %3588 = vmatpush3.bf16.msra.mxu0 %v3983_v54  ;;  %v4043_v54 = vld [vmem:[%s5053_s1 + $0x620] sm:$0xff]  }
  0xa1   :  { %3610 = vmatpush3.bf16.msra.mxu1 %v3984_v55  ;;  %3617 = vmatprep.subr.bf16.mxu0 %v3989_v62  ;;  %v4044_v55 = vld [vmem:[%s5053_s1 + $0x6a0] sm:$0xff]   ;;  %v4051_v62 = vld [vmem:[%s5053_s1 + $0x630] sm:$0xff]  }
  0xa2   :  { %3639 = vmatprep.subr.bf16.mxu1 %v3990_v63  ;;  %v4052_v63 = vld [vmem:[%s5053_s1 + $0x6b0] sm:$0xff]  }
  0xa3   :  { %2563 = vmatmul.mubr.bf16.vlgmr.msra.gmra.mrb[16].mxu0 %v3107_v57  ;;  %v4046_v57 = vld [vmem:[%s5053_s1 + $0x6e8] sm:$0xff]  }
  0xa4   :  { %2603 = vmatmul.mubr.bf16.vlgmr.msra.gmra.mrb[16].mxu1 %v3109_v60  ;;  %3618 = vmatpush3.bf16.msra.mxu0 %v3991_v0  ;;  %v4049_v60 = vld [vmem:[%s5053_s1 + $0x670] sm:$0xff]   ;;  %v4053_v0 = vld [vmem:[%s5053_s1 + $0x678] sm:$0xff]  }
  0xa5   :  { %3640 = vmatpush3.bf16.msra.mxu1 %v3992_v1  ;;  %3619 = vmatprep.subr.bf16.mxu0 %v3993_v2  ;;  %v4054_v1 = vld [vmem:[%s5053_s1 + $0x6f8] sm:$0xff]  }
  0xa6   :  { %3641 = vmatprep.subr.bf16.mxu1 %v3994_v3  ;;  %2642 = vmatprep.mubr.bf16.mxu0 %v3112_v33  ;;  %v4055_v2 = vld [vmem:[%s5053_s1 + $0x638] sm:$0xff]  }
  0xa7   :  { %2682 = vmatprep.mubr.bf16.mxu1 %v3114_v35  ;;  %v4056_v3 = vld [vmem:[%s5053_s1 + $0x6b8] sm:$0xff]  }
  0xa8   :  { %3620 = vmatpush3.bf16.msra.mxu0 %v3995_v4  ;;  %v39_v4 = vld [vmem:[%s5054_s0 + $0x60] sm:$0xff] }
  0xa9   :  { %3642 = vmatpush3.bf16.msra.mxu1 %v3996_v5  ;;  %3621 = vmatprep.subr.bf16.mxu0 %v3997_v6  ;;  %v40_v5 = vld [vmem:[%s5054_s0 + $0x68] sm:$0xff]  ;;  %v3115_v6 = vcombine.low %v39_v4, %v39_v4 }
  0xaa   :  { %3643 = vmatprep.subr.bf16.mxu1 %v3998_v7  ;;  %v3116_v7 = vcombine.high %v39_v4, %v39_v4 }
  0xac   :  { %3622 = vmatpush3.bf16.msra.mxu0 %v3999_v8  ;;  %v3117_v8 = vcombine.low %v40_v5, %v40_v5 }
  0xad   :  { %3644 = vmatpush3.bf16.msra.mxu1 %v4000_v9  ;;  %3623 = vmatprep.subr.bf16.mxu0 %v4001_v10  ;;  %v4061_v9 = vld [vmem:[%s5053_s1 + $0x740] sm:$0xff]   ;;  %v3118_v10 = vcombine.high %v40_v5, %v40_v5 }
  0xae   :  { %3645 = vmatprep.subr.bf16.mxu1 %v4002_v11  ;;  %v4062_v11 = vld [vmem:[%s5053_s1 + $0x7c0] sm:$0xff]  }
  0xb0   :  { %3624 = vmatpush3.bf16.msra.mxu0 %v4003_v12  ;;  %v4063_v12 = vld [vmem:[%s5053_s1 + $0x700] sm:$0xff]  }
  0xb1   :  { %3646 = vmatpush3.bf16.msra.mxu1 %v4004_v13  ;;  %3625 = vmatprep.subr.bf16.mxu0 %v4005_v14  ;;  %v4064_v13 = vld [vmem:[%s5053_s1 + $0x780] sm:$0xff]   ;;  %v4065_v14 = vld [vmem:[%s5053_s1 + $0x748] sm:$0xff]  }
  0xb2   :  { %3647 = vmatprep.subr.bf16.mxu1 %v4006_v15  ;;  %v4066_v15 = vld [vmem:[%s5053_s1 + $0x7c8] sm:$0xff]  }
  0xb4   :  { %3626 = vmatpush3.bf16.msra.mxu0 %v4007_v16  ;;  %v4067_v16 = vld [vmem:[%s5053_s1 + $0x708] sm:$0xff]  }
  0xb5   :  { %3648 = vmatpush3.bf16.msra.mxu1 %v4008_v17  ;;  %3627 = vmatprep.subr.bf16.mxu0 %v4009_v18  ;;  %v4068_v17 = vld [vmem:[%s5053_s1 + $0x788] sm:$0xff]   ;;  %v4069_v18 = vld [vmem:[%s5053_s1 + $0x750] sm:$0xff]  }
  0xb6   :  { %3649 = vmatprep.subr.bf16.mxu1 %v4010_v19  ;;  %v4070_v19 = vld [vmem:[%s5053_s1 + $0x7d0] sm:$0xff]  }
  0xb8   :  { %3628 = vmatpush3.bf16.msra.mxu0 %v4011_v20  ;;  %v4071_v20 = vld [vmem:[%s5053_s1 + $0x710] sm:$0xff]  }
  0xb9   :  { %3650 = vmatpush3.bf16.msra.mxu1 %v4012_v21  ;;  %3629 = vmatprep.subr.bf16.mxu0 %v4013_v22  ;;  %v4072_v21 = vld [vmem:[%s5053_s1 + $0x790] sm:$0xff]   ;;  %v4073_v22 = vld [vmem:[%s5053_s1 + $0x758] sm:$0xff]  }
  0xba   :  { %3651 = vmatprep.subr.bf16.mxu1 %v4014_v23  ;;  %v4074_v23 = vld [vmem:[%s5053_s1 + $0x7d8] sm:$0xff]  }
  0xbc   :  { %3630 = vmatpush3.bf16.msra.mxu0 %v4015_v24  ;;  %v4075_v24 = vld [vmem:[%s5053_s1 + $0x718] sm:$0xff]  }
  0xbd   :  { %3652 = vmatpush3.bf16.msra.mxu1 %v4016_v25  ;;  %3631 = vmatprep.subr.bf16.mxu0 %v4017_v26  ;;  %v4076_v25 = vld [vmem:[%s5053_s1 + $0x798] sm:$0xff]   ;;  %v4077_v26 = vld [vmem:[%s5053_s1 + $0x760] sm:$0xff]  }
  0xbe   :  { %3653 = vmatprep.subr.bf16.mxu1 %v4018_v27  ;;  %v4078_v27 = vld [vmem:[%s5053_s1 + $0x7e0] sm:$0xff]  }
  0xc0   :  { %3632 = vmatpush3.bf16.msra.mxu0 %v4019_v28  ;;  %v4079_v28 = vld [vmem:[%s5053_s1 + $0x720] sm:$0xff]  }
  0xc1   :  { %3654 = vmatpush3.bf16.msra.mxu1 %v4020_v29  ;;  %3661 = vmatprep.subr.bf16.mxu0 %v4025_v36 }
  0xc2   :  { %3683 = vmatprep.subr.bf16.mxu1 %v4026_v37  ;;  %v4081_v37 = vld [vmem:[%s5053_s1 + $0x768] sm:$0xff]  }
  0xc3   :  { %2643 = vmatmul.mubr.bf16.vlgmr.msra.gmra.mrb[20].mxu0 %v3111_v32  ;;  %v3090_v32 = vld [vmem:[%s5055_s2] ss:$0 sm:$0xff] }
  0xc4   :  { %2683 = vmatmul.mubr.bf16.vlgmr.msra.gmra.mrb[20].mxu1 %v3113_v34  ;;  %3662 = vmatpush3.bf16.msra.mxu0 %v4027_v38 }
  0xc5   :  { %3684 = vmatpush3.bf16.msra.mxu1 %v4028_v39  ;;  %3663 = vmatprep.subr.bf16.mxu0 %v4029_v40  ;;  %v4082_v39 = vld [vmem:[%s5053_s1 + $0x7e8] sm:$0xff]  }
  0xc6   :  { %3685 = vmatprep.subr.bf16.mxu1 %v4030_v41  ;;  %2722 = vmatprep.mubr.bf16.mxu0 %v3116_v7 }
  0xc7   :  { %2762 = vmatprep.mubr.bf16.mxu1 %v3118_v10 }
  0xc8   :  { %3664 = vmatpush3.bf16.msra.mxu0 %v4031_v42  ;;  %v4083_v42 = vld [vmem:[%s5053_s1 + $0x728] sm:$0xff]  }
  0xc9   :  { %3686 = vmatpush3.bf16.msra.mxu1 %v4032_v43  ;;  %3665 = vmatprep.subr.bf16.mxu0 %v4033_v44  ;;  %v4084_v44 = vld [vmem:[%s5053_s1 + $0x7a8] sm:$0xff]  }
  0xca   :  { %3687 = vmatprep.subr.bf16.mxu1 %v4034_v45 }
  0xcc   :  { %3666 = vmatpush3.bf16.msra.mxu0 %v4035_v46 }
  0xcd   :  { %3688 = vmatpush3.bf16.msra.mxu1 %v4036_v47  ;;  %3667 = vmatprep.subr.bf16.mxu0 %v4037_v48  ;;  %v4085_v47 = vld [vmem:[%s5053_s1 + $0x770] sm:$0xff]  }
  0xce   :  { %3689 = vmatprep.subr.bf16.mxu1 %v4038_v49  ;;  %v4086_v48 = vld [vmem:[%s5053_s1 + $0x7f0] sm:$0xff]  }
  0xcf   :  { %v4087_v49 = vld [vmem:[%s5053_s1 + $0x730] sm:$0xff]  }
  0xd0   :  { %3668 = vmatpush3.bf16.msra.mxu0 %v4039_v50  ;;  %v4088_v50 = vld [vmem:[%s5053_s1 + $0x7b0] sm:$0xff]  }
  0xd1   :  { %3690 = vmatpush3.bf16.msra.mxu1 %v4040_v51  ;;  %3669 = vmatprep.subr.bf16.mxu0 %v4041_v52  ;;  %v4089_v51 = vld [vmem:[%s5053_s1 + $0x778] sm:$0xff]  }
  0xd2   :  { %3691 = vmatprep.subr.bf16.mxu1 %v4042_v53  ;;  %v4090_v52 = vld [vmem:[%s5053_s1 + $0x7f8] sm:$0xff]  }
  0xd3   :  { %v4091_v53 = vld [vmem:[%s5053_s1 + $0x738] sm:$0xff]  }
  0xd4   :  { %3670 = vmatpush3.bf16.msra.mxu0 %v4043_v54  ;;  %v4092_v54 = vld [vmem:[%s5053_s1 + $0x7b8] sm:$0xff]  }
  0xd5   :  { %3692 = vmatpush3.bf16.msra.mxu1 %v4044_v55  ;;  %3671 = vmatprep.subr.bf16.mxu0 %v4045_v56  ;;  %v41_v55 = vld [vmem:[%s5054_s0 + $0x70] sm:$0xff]  ;;  %v42_v56 = vld [vmem:[%s5054_s0 + $0x78] sm:$0xff] }
  0xd6   :  { %3693 = vmatprep.subr.bf16.mxu1 %v4046_v57  ;;  %v3119_v57 = vcombine.low %v41_v55, %v41_v55 }
  0xd8   :  { %3672 = vmatpush3.bf16.msra.mxu0 %v4047_v58  ;;  %v3120_v58 = vcombine.high %v41_v55, %v41_v55 }
  0xd9   :  { %3694 = vmatpush3.bf16.msra.mxu1 %v4048_v59  ;;  %3673 = vmatprep.subr.bf16.mxu0 %v4049_v60  ;;  %v3121_v59 = vcombine.low %v42_v56, %v42_v56  ;;  %v3122_v60 = vcombine.high %v42_v56, %v42_v56 }
  0xda   :  { %3695 = vmatprep.subr.bf16.mxu1 %v4050_v61 }
  0xdc   :  { %3674 = vmatpush3.bf16.msra.mxu0 %v4051_v62 }
  0xdd   :  { %3696 = vmatpush3.bf16.msra.mxu1 %v4052_v63  ;;  %3675 = vmatprep.subr.bf16.mxu0 %v4053_v0 }
  0xde   :  { %3697 = vmatprep.subr.bf16.mxu1 %v4054_v1 }
  0xe0   :  { %3676 = vmatpush3.bf16.msra.mxu0 %v4055_v2 }
  0xe1   :  { %3698 = vmatpush3.bf16.msra.mxu1 %v4056_v3  ;;  %3705 = vmatprep.subr.bf16.mxu0 %v4061_v9 }
  0xe2   :  { %3727 = vmatprep.subr.bf16.mxu1 %v4062_v11 }
  0xe3   :  { %2723 = vmatmul.mubr.bf16.vlgmr.msra.gmra.mrb[24].mxu0 %v3115_v6 }
  0xe4   :  { %2763 = vmatmul.mubr.bf16.vlgmr.msra.gmra.mrb[24].mxu1 %v3117_v8  ;;  %3706 = vmatpush3.bf16.msra.mxu0 %v4063_v12 }
  0xe5   :  { %3728 = vmatpush3.bf16.msra.mxu1 %v4064_v13  ;;  %3707 = vmatprep.subr.bf16.mxu0 %v4065_v14 }
  0xe6   :  { %3729 = vmatprep.subr.bf16.mxu1 %v4066_v15  ;;  %2802 = vmatprep.mubr.bf16.mxu0 %v3120_v58 }
  0xe7   :  { %2842 = vmatprep.mubr.bf16.mxu1 %v3122_v60 }
  0xe8   :  { %3708 = vmatpush3.bf16.msra.mxu0 %v4067_v16 }
  0xe9   :  { %3730 = vmatpush3.bf16.msra.mxu1 %v4068_v17  ;;  %3709 = vmatprep.subr.bf16.mxu0 %v4069_v18 }
  0xea   :  { %3731 = vmatprep.subr.bf16.mxu1 %v4070_v19 }
  0xec   :  { %3710 = vmatpush3.bf16.msra.mxu0 %v4071_v20 }
  0xed   :  { %3732 = vmatpush3.bf16.msra.mxu1 %v4072_v21  ;;  %3711 = vmatprep.subr.bf16.mxu0 %v4073_v22  ;;  %v4117_v21 = vmov 0.0   ;;  %v4097_v22 = vld [vmem:[%s5056_s3] sm:$0xff]  }
  0xee   :  { %3733 = vmatprep.subr.bf16.mxu1 %v4074_v23  ;;  %v4098_v23 = vld [vmem:[%s5056_s3 + $0x8] sm:$0xff]  }
  0xf0   :  { %3712 = vmatpush3.bf16.msra.mxu0 %v4075_v24  ;;  %v4099_v24 = vld [vmem:[%s5056_s3 + $0x10] sm:$0xff]  }
  0xf1   :  { %3734 = vmatpush3.bf16.msra.mxu1 %v4076_v25  ;;  %3713 = vmatprep.subr.bf16.mxu0 %v4077_v26  ;;  %v4100_v25 = vld [vmem:[%s5056_s3 + $0x18] sm:$0xff]   ;;  %v4101_v26 = vld [vmem:[%s5056_s3 + $0x20] sm:$0xff]  }
  0xf2   :  { %3735 = vmatprep.subr.bf16.mxu1 %v4078_v27 }
  0xf4   :  { %3714 = vmatpush3.bf16.msra.mxu0 %v4079_v28 }
  0xf5   :  { %3736 = vmatpush3.bf16.msra.mxu1 %v4080_v30  ;;  %3715 = vmatprep.subr.bf16.mxu0 %v4081_v37 }
  0xf6   :  { %v3413_v29 = vpop.f32.mrb[0].mxu0  ;;  %3737 = vmatprep.subr.bf16.mxu1 %v4082_v39 }
  0xf7   :  { %v3435_v31 = vpop.f32.mrb[0].mxu1  ;;  %v3414_v33 = vpop.f32.mrb[1].mxu0 }
  0xf8   :  { %v3436_v34 = vpop.f32.mrb[1].mxu1  ;;  %v3415_v35 = vadd.f32 %v3414_v33, %v3413_v29  ;;  %v3416_v38 = vpop.f32.mrb[2].mxu0  ;;  %3716 = vmatpush3.bf16.msra.mxu0 %v4083_v42  ;;  %v4105_v42 = vld [vmem:[%s5057_s5] sm:$0xff]  }
  0xf9   :  { %v3437_v36 = vadd.f32 %v3436_v34, %v3435_v31  ;;  %v3438_v40 = vpop.f32.mrb[2].mxu1  ;;  %v3417_v43 = vpop.f32.mrb[3].mxu0  ;;  %3738 = vmatpush3.bf16.msra.mxu1 %v4084_v44  ;;  %3717 = vmatprep.subr.bf16.mxu0 %v4085_v47  ;;  %v4107_v44 = vld [vmem:[%s5057_s5 + $0x10] sm:$0xff]  }
  0xfa   :  { %v2245_v41 = vadd.f32 %v3415_v35, %v3090_v32  ;;  %v3439_v45 = vpop.f32.mrb[3].mxu1  ;;  %3739 = vmatprep.subr.bf16.mxu1 %v4086_v48  ;;  %v4103_v40 = vld [vmem:[%s5056_s3 + $0x30] sm:$0xff]   ;;  %v4106_v43 = vld [vmem:[%s5057_s5 + $0x8] sm:$0xff]  }
  0xfb   :  { %v4108_v45 = vld [vmem:[%s5057_s5 + $0x18] sm:$0xff]  }
  0xfc   :  { %v2285_v46 = vadd.f32 %v3437_v36, %v2245_v41  ;;  %3718 = vmatpush3.bf16.msra.mxu0 %v4087_v49  ;;  %v4102_v36 = vld [vmem:[%s5056_s3 + $0x28] sm:$0xff]   ;;  %v4104_v41 = vld [vmem:[%s5056_s3 + $0x38] sm:$0xff]  }
  0xfd   :  { %3740 = vmatpush3.bf16.msra.mxu1 %v4088_v50  ;;  %3719 = vmatprep.subr.bf16.mxu0 %v4089_v51  ;;  %v4110_v51 = vld [vmem:[%s5057_s5 + $0x28] sm:$0xff]  }
  0xfe   :  { %3741 = vmatprep.subr.bf16.mxu1 %v4090_v52 }
 0x100   :  { %3720 = vmatpush3.bf16.msra.mxu0 %v4091_v53 }
 0x101   :  { %3742 = vmatpush3.bf16.msra.mxu1 %v4092_v54  ;;  %3767 = vmatprep.subr.bf16.mxu0 %v4117_v21 }
 0x102   :  { %3787 = vmatprep.subr.bf16.mxu1 %v4117_v21 }
 0x103   :  { %2803 = vmatmul.mubr.bf16.vlgmr.msra.gmra.mrb[28].mxu0 %v3119_v57 }
 0x104   :  { %2843 = vmatmul.mubr.bf16.vlgmr.msra.gmra.mrb[28].mxu1 %v3121_v59  ;;  %3768 = vmatpush3.bf16.msra.mxu0 %v4097_v22 }
 0x105   :  { %3769 = vmatprep.subr.bf16.mxu0 %v4117_v21  ;;  %3783 = vmatprep.mubr.msk.bf16.mxu0 %vm4118_vm0, %v4117_v21 }
 0x106   :  { %3803 = vmatprep.mubr.msk.bf16.mxu1 %vm4118_vm0, %v4117_v21  ;;  %3788 = vmatpush3.bf16.msra.mxu1 %v4105_v42 }
 0x107   :  { %3789 = vmatprep.subr.bf16.mxu1 %v4117_v21 }
 0x108   :  { %3770 = vmatpush3.bf16.msra.mxu0 %v4098_v23 }
 0x109   :  { %3771 = vmatprep.subr.bf16.mxu0 %v4117_v21 }
 0x10a   :  { %3790 = vmatpush3.bf16.msra.mxu1 %v4106_v43 }
 0x10b   :  { %3791 = vmatprep.subr.bf16.mxu1 %v4117_v21 }
 0x10c   :  { %3772 = vmatpush3.bf16.msra.mxu0 %v4099_v24 }
 0x10d   :  { %3773 = vmatprep.subr.bf16.mxu0 %v4117_v21 }
 0x10e   :  { %3792 = vmatpush3.bf16.msra.mxu1 %v4107_v44 }
 0x10f   :  { %3793 = vmatprep.subr.bf16.mxu1 %v4117_v21 }
 0x110   :  { %3774 = vmatpush3.bf16.msra.mxu0 %v4100_v25 }
 0x111   :  { %3775 = vmatprep.subr.bf16.mxu0 %v4117_v21 }
 0x112   :  { %3794 = vmatpush3.bf16.msra.mxu1 %v4108_v45 }
 0x113   :  { %3795 = vmatprep.subr.bf16.mxu1 %v4117_v21 }
 0x114   :  { %3776 = vmatpush3.bf16.msra.mxu0 %v4101_v26 }
 0x115   :  { %3777 = vmatprep.subr.bf16.mxu0 %v4117_v21 }
 0x116   :  { %v3457_v61 = vpop.f32.mrb[4].mxu0 }
 0x117   :  { %v3479_v62 = vpop.f32.mrb[4].mxu1  ;;  %v3458_v63 = vpop.f32.mrb[5].mxu0 }
 0x118   :  { %v3480_v0 = vpop.f32.mrb[5].mxu1  ;;  %v3459_v1 = vadd.f32 %v3458_v63, %v3457_v61  ;;  %v3460_v3 = vpop.f32.mrb[6].mxu0  ;;  %3778 = vmatpush3.bf16.msra.mxu0 %v4102_v36  ;;  %v4112_v36 = vld [vmem:[%s5057_s5 + $0x38] sm:$0xff]  }
 0x119   :  { %v3481_v2 = vadd.f32 %v3480_v0, %v3479_v62  ;;  %v3482_v4 = vpop.f32.mrb[6].mxu1  ;;  %v3461_v5 = vpop.f32.mrb[7].mxu0  ;;  %3779 = vmatprep.subr.bf16.mxu0 %v4117_v21 }
 0x11a   :  { %v3483_v6 = vpop.f32.mrb[7].mxu1  ;;  %v2325_v7 = vadd.f32 %v3459_v1, %v2285_v46  ;;  %v4109_v46 = vld [vmem:[%s5057_s5 + $0x20] sm:$0xff]  }
 0x11b   :  { %3796 = vmatpush3.bf16.msra.mxu1 %v4109_v46 }
 0x11c   :  { %v2365_v8 = vadd.f32 %v3481_v2, %v2325_v7  ;;  %3780 = vmatpush3.bf16.msra.mxu0 %v4103_v40  ;;  %3797 = vmatprep.subr.bf16.mxu1 %v4117_v21 }
 0x11d   :  { %3781 = vmatprep.subr.bf16.mxu0 %v4117_v21 }
 0x11f   :  { %3798 = vmatpush3.bf16.msra.mxu1 %v4110_v51 }
 0x120   :  { %3782 = vmatpush3.bf16.msra.mxu0 %v4104_v41  ;;  %3799 = vmatprep.subr.bf16.mxu1 %v4117_v21 }
 0x136   :  { %v3501_v9 = vpop.f32.mrb[8].mxu0 }
 0x137   :  { %v3523_v10 = vpop.f32.mrb[8].mxu1  ;;  %v3502_v11 = vpop.f32.mrb[9].mxu0 }
 0x138   :  { %v3503_v12 = vadd.f32 %v3502_v11, %v3501_v9  ;;  %v3524_v13 = vpop.f32.mrb[9].mxu1  ;;  %v3504_v14 = vpop.f32.mrb[10].mxu0 }
 0x139   :  { %v3525_v15 = vadd.f32 %v3524_v13, %v3523_v10  ;;  %v3526_v16 = vpop.f32.mrb[10].mxu1  ;;  %v3505_v17 = vpop.f32.mrb[11].mxu0 }
 0x13a   :  { %v2405_v18 = vadd.f32 %v3503_v12, %v2365_v8  ;;  %v3527_v19 = vpop.f32.mrb[11].mxu1 }
 0x13c   :  { %v2445_v20 = vadd.f32 %v3525_v15, %v2405_v18 }
 0x156   :  { %v3545_v27 = vpop.f32.mrb[12].mxu0 }
 0x157   :  { %v3567_v28 = vpop.f32.mrb[12].mxu1  ;;  %v3546_v29 = vpop.f32.mrb[13].mxu0 }
 0x158   :  { %v3547_v30 = vadd.f32 %v3546_v29, %v3545_v27  ;;  %v3568_v31 = vpop.f32.mrb[13].mxu1  ;;  %v3548_v32 = vpop.f32.mrb[14].mxu0 }
 0x159   :  { %v3569_v33 = vadd.f32 %v3568_v31, %v3567_v28  ;;  %v3570_v34 = vpop.f32.mrb[14].mxu1  ;;  %v3549_v35 = vpop.f32.mrb[15].mxu0 }
 0x15a   :  { %v2485_v37 = vadd.f32 %v3547_v30, %v2445_v20  ;;  %v3571_v38 = vpop.f32.mrb[15].mxu1  ;;  %v4111_v35 = vld [vmem:[%s5057_s5 + $0x30] sm:$0xff]  }
 0x15b   :  { %3800 = vmatpush3.bf16.msra.mxu1 %v4111_v35 }
 0x15c   :  { %v2525_v39 = vadd.f32 %v3569_v33, %v2485_v37  ;;  %3801 = vmatprep.subr.bf16.mxu1 %v4117_v21  ;;  %v3379_v37 = vld [vmem:[%s5058_s4] ss:$0 sm:$0xff] }
 0x15d   :  { %v3388_v21 = vld [vmem:[%s5059_s6] ss:$0 sm:$0xff] }
 0x15f   :  { %3802 = vmatpush3.bf16.msra.mxu1 %v4112_v36 }
 0x176   :  { %v3589_v47 = vpop.f32.mrb[16].mxu0 }
 0x177   :  { %v3611_v48 = vpop.f32.mrb[16].mxu1  ;;  %v3590_v49 = vpop.f32.mrb[17].mxu0 }
 0x178   :  { %v3612_v50 = vpop.f32.mrb[17].mxu1  ;;  %v3591_v52 = vadd.f32 %v3590_v49, %v3589_v47  ;;  %v3592_v54 = vpop.f32.mrb[18].mxu0 }
 0x179   :  { %v3613_v53 = vadd.f32 %v3612_v50, %v3611_v48  ;;  %v3614_v55 = vpop.f32.mrb[18].mxu1  ;;  %v3593_v56 = vpop.f32.mrb[19].mxu0 }
 0x17a   :  { %v3615_v57 = vpop.f32.mrb[19].mxu1  ;;  %v2565_v58 = vadd.f32 %v3591_v52, %v2525_v39 }
 0x17c   :  { %v2605_v59 = vadd.f32 %v3613_v53, %v2565_v58 }
 0x196   :  { %v3633_v60 = vpop.f32.mrb[20].mxu0 }
 0x197   :  { %v3655_v61 = vpop.f32.mrb[20].mxu1  ;;  %v3634_v62 = vpop.f32.mrb[21].mxu0 }
 0x198   :  { %v3635_v63 = vadd.f32 %v3634_v62, %v3633_v60  ;;  %v3656_v0 = vpop.f32.mrb[21].mxu1  ;;  %v3636_v1 = vpop.f32.mrb[22].mxu0 }
 0x199   :  { %v3657_v2 = vadd.f32 %v3656_v0, %v3655_v61  ;;  %v3658_v3 = vpop.f32.mrb[22].mxu1  ;;  %v3637_v4 = vpop.f32.mrb[23].mxu0 }
 0x19a   :  { %v2645_v5 = vadd.f32 %v3635_v63, %v2605_v59  ;;  %v3659_v6 = vpop.f32.mrb[23].mxu1 }
 0x19c   :  { %v2685_v7 = vadd.f32 %v3657_v2, %v2645_v5 }
 0x1b6   :  { %v3677_v8 = vpop.f32.mrb[24].mxu0 }
 0x1b7   :  { %v3699_v9 = vpop.f32.mrb[24].mxu1  ;;  %v3678_v10 = vpop.f32.mrb[25].mxu0 }
 0x1b8   :  { %v3679_v11 = vadd.f32 %v3678_v10, %v3677_v8  ;;  %v3700_v12 = vpop.f32.mrb[25].mxu1  ;;  %v3680_v13 = vpop.f32.mrb[26].mxu0 }
 0x1b9   :  { %v3701_v14 = vadd.f32 %v3700_v12, %v3699_v9  ;;  %v3702_v15 = vpop.f32.mrb[26].mxu1  ;;  %v3681_v16 = vpop.f32.mrb[27].mxu0 }
 0x1ba   :  { %v2725_v17 = vadd.f32 %v3679_v11, %v2685_v7  ;;  %v3703_v18 = vpop.f32.mrb[27].mxu1 }
 0x1bc   :  { %v2765_v19 = vadd.f32 %v3701_v14, %v2725_v17 }
 0x1d6   :  { %v3721_v20 = vpop.f32.mrb[28].mxu0 }
 0x1d7   :  { %v3743_v22 = vpop.f32.mrb[28].mxu1  ;;  %v3722_v23 = vpop.f32.mrb[29].mxu0 }
 0x1d8   :  { %v3723_v24 = vadd.f32 %v3722_v23, %v3721_v20  ;;  %v3744_v25 = vpop.f32.mrb[29].mxu1  ;;  %v3724_v26 = vpop.f32.mrb[30].mxu0 }
 0x1d9   :  { %v3745_v27 = vadd.f32 %v3744_v25, %v3743_v22  ;;  %v3746_v28 = vpop.f32.mrb[30].mxu1  ;;  %v3725_v29 = vpop.f32.mrb[31].mxu0 }
 0x1da   :  { %v2805_v30 = vadd.f32 %v3723_v24, %v2765_v19  ;;  %v3747_v31 = vpop.f32.mrb[31].mxu1 }
 0x1dc   :  { %v2845_v32 = vadd.f32 %v3745_v27, %v2805_v30 }
 0x1de   :  { %v2850_v33 = vmax.f32 %v2845_v32, 0.0 }
 0x1e0   :  { %v2851_v34 = vpack.c.bf16 %v2850_v33, %v2850_v33 }
 0x1e2   :  { %3784 = vmatmul.mubr.bf16.vlgmr.msra.gmra.mrb[32].mxu0 %v2851_v34 }
 0x2b5   :  { %v2957_v38 = vpop.f32.mrb[32].mxu0 }
 0x2b6   :  { %v2958_v39 = vadd.f32 %v3379_v37, %v2957_v38  ;;  %v3785_v40 = vpop.f32.mrb[33].mxu0 }
 0x2b7   :  { %v2960_v41 = vpop.f32.mrb[34].mxu0 }
 0x2b8   :  { %v2963_v42 = vmax.f32 %v2958_v39, 0.0  ;;  %v3786_v43 = vpop.f32.mrb[35].mxu0 }
 0x2ba   :  { %v2964_v44 = vpack.c.bf16 %v2963_v42, %v2963_v42 }
 0x2bc   :  { %3804 = vmatmul.mubr.bf16.vlgmr.msra.gmra.mrb[32].mxu1 %v2964_v44 }
 0x38f   :  { %v3070_v45 = vpop.f32.mrb[32].mxu1 }
 0x390   :  { %v3071_v46 = vadd.f32 %v3388_v21, %v3070_v45  ;;  %v3805_v47 = vpop.f32.mrb[33].mxu1 }
 0x391   :  { %v3073_v48 = vpop.f32.mrb[34].mxu1 }
 0x392   :  { %3076 = vmax.xlane.f32.xlu0 %v3071_v46  ;;  %v3806_v49 = vpop.f32.mrb[35].mxu1 }
 0x41f   :  { %v3077_v50 = vpop.xlane.xlu0 %3076 }
 0x420   :  { %v3078_v51 = vsub.f32 %v3071_v46, %v3077_v50 }
 0x422   :  { %v3079_v52 = vmul.f32 1.442695, %v3078_v51 }
 0x424   :  { %4113 = vpow2.f32 %v3079_v52 }
 0x42e   :  { %v4114_v53 = vpop.eup %4113 }
 0x42f   :  { %3081 = vadd.xlane.f32.xlu0 %v4114_v53 }
 0x4bc   :  { %v3082_v54 = vpop.xlane.xlu0 %3081 }
 0x4bd   :  { %4115 = vrcp.f32 %v3082_v54 }
 0x4c7   :  { %v4116_v55 = vpop.eup %4115 }
 0x4c8   :  { %v3084_v56 = vmul.f32 %v4116_v55, %v4114_v53 }
 0x4ca   :  { %3085 = vst [vmem:[%s5060_s7] sm:$0xff] %v3084_v56 }

// kernel: cifar_cnn_forward.2
= control target key start
LH: loop header
LB: loop body
LE: loop exit
PB: predicated region body
PF: predicated region fallthrough
CT: control target
= control target key end

     0   :  { %vm448_vm0 = vcmask 1046528   ;;  %vm175_vm1 = vsmask.f32 7424  ;;  %vm2184_vm10 = vcmask 1043456   ;;  %vm2029_vm11 = vsmask.f32 4352  ;;  %s6039_s1 = inlined_call_operand.vmem [shape: bf16[640,256], index: 1, kind: input, shape index: {}]   ;;  %s6040_s0 = inlined_call_operand.vmem [shape: bf16[8,2,18,128], index: 0, kind: input, shape index: {}]   ;;  %s6041_s3 = inlined_call_operand.vmem [shape: bf16[640,256], index: 3, kind: input, shape index: {}]   ;;  %s6042_s2 = inlined_call_operand.vmem [shape: f32[1,256], index: 2, kind: input, shape index: {}]   ;;  %s6043_s4 = inlined_call_operand.vmem [shape: f32[1,256], index: 4, kind: input, shape index: {}]   ;;  %s6044_s5 = inlined_call_operand.vmem [shape: bf16[128,256], index: 5, kind: output, shape index: {}]  }
   0x1   :  { %v4114_v0 = vld [vmem:[%s6039_s1 + $0x4] ss:$8 sps:$4 sm:$0xff]   ;;  %v4116_v1 = vld [vmem:[%s6039_s1] ss:$8 sps:$4 sm:$0xff]   ;;  %v4117_v2 = vld [vmem:[%s6039_s1 + $0x14] ss:$8 sps:$4 sm:$0xff]  }
   0x2   :  { %1046 = vmatprep.subr.bf16.mxu0 %v4114_v0  ;;  %v4119_v3 = vld [vmem:[%s6039_s1 + $0x10] ss:$8 sps:$4 sm:$0xff]   ;;  %v4120_v4 = vld [vmem:[%s6039_s1 + $0x24] ss:$8 sps:$4 sm:$0xff]   ;;  %v4122_v5 = vld [vmem:[%s6039_s1 + $0x20] ss:$8 sps:$4 sm:$0xff]  }
   0x3   :  { %1047 = vmatpush1.bf16.msra.mxu0 %v4116_v1  ;;  %v4123_v6 = vld [vmem:[%s6039_s1 + $0x34] ss:$8 sps:$4 sm:$0xff]   ;;  %v4125_v7 = vld [vmem:[%s6039_s1 + $0x30] ss:$8 sps:$4 sm:$0xff]   ;;  %v4126_v8 = vld [vmem:[%s6039_s1 + $0x44] ss:$8 sps:$4 sm:$0xff]  }
   0x4   :  { %1048 = vmatprep.subr.bf16.mxu0 %v4117_v2  ;;  %v4128_v9 = vld [vmem:[%s6039_s1 + $0x40] ss:$8 sps:$4 sm:$0xff]   ;;  %v4129_v10 = vld [vmem:[%s6039_s1 + $0x54] ss:$8 sps:$4 sm:$0xff]   ;;  %v4131_v11 = vld [vmem:[%s6039_s1 + $0x50] ss:$8 sps:$4 sm:$0xff]  }
   0x5   :  { %v4132_v12 = vld [vmem:[%s6039_s1 + $0x64] ss:$8 sps:$4 sm:$0xff]   ;;  %v4478_v14 = vld [vmem:[%s6040_s0 + $0x10] sm:$0xf]  ;;  %v4134_v16 = vld [vmem:[%s6039_s1 + $0x60] ss:$8 sps:$4 sm:$0xff]  }
   0x6   :  { %v3595_v13 = vld [vmem:[%s6040_s0 + $0xc] sm:$0xf]  ;;  %v4135_v17 = vld [vmem:[%s6039_s1 + $0x74] ss:$8 sps:$4 sm:$0xff]   ;;  %v4137_v18 = vld [vmem:[%s6039_s1 + $0x70] ss:$8 sps:$4 sm:$0xff]  }
   0x7   :  { %1049 = vmatpush1.bf16.msra.mxu0 %v4119_v3  ;;  %v4481_v15 = vcombine.low %v3595_v13, %v4478_v14  ;;  %v4138_v19 = vld [vmem:[%s6039_s1 + $0x84] ss:$8 sps:$4 sm:$0xff]   ;;  %v4140_v20 = vld [vmem:[%s6039_s1 + $0x80] ss:$8 sps:$4 sm:$0xff]   ;;  %v4141_v21 = vld [vmem:[%s6039_s1 + $0x94] ss:$8 sps:$4 sm:$0xff]  }
   0x8   :  { %1050 = vmatprep.subr.bf16.mxu0 %v4120_v4  ;;  %v4143_v22 = vld [vmem:[%s6039_s1 + $0x90] ss:$8 sps:$4 sm:$0xff]   ;;  %v4144_v23 = vld [vmem:[%s6039_s1 + $0xa4] ss:$8 sps:$4 sm:$0xff]   ;;  %v4146_v24 = vld [vmem:[%s6039_s1 + $0xa0] ss:$8 sps:$4 sm:$0xff]  }
   0x9   :  { %1078 = vmatprep.mubr.bf16.mxu0 %v4481_v15  ;;  %v4147_v25 = vld [vmem:[%s6039_s1 + $0xb4] ss:$8 sps:$4 sm:$0xff]   ;;  %v4149_v26 = vld [vmem:[%s6039_s1 + $0xb0] ss:$8 sps:$4 sm:$0xff]   ;;  %v4150_v27 = vld [vmem:[%s6039_s1 + $0xc4] ss:$8 sps:$4 sm:$0xff]  }
   0xa   :  { %v4152_v28 = vld [vmem:[%s6039_s1 + $0xc0] ss:$8 sps:$4 sm:$0xff]   ;;  %v4153_v29 = vld [vmem:[%s6039_s1 + $0xd4] ss:$8 sps:$4 sm:$0xff]   ;;  %v4155_v30 = vld [vmem:[%s6039_s1 + $0xd0] ss:$8 sps:$4 sm:$0xff]  }
   0xb   :  { %1051 = vmatpush1.bf16.msra.mxu0 %v4122_v5  ;;  %v4156_v31 = vld [vmem:[%s6039_s1 + $0xe4] ss:$8 sps:$4 sm:$0xff]   ;;  %v4158_v32 = vld [vmem:[%s6039_s1 + $0xe0] ss:$8 sps:$4 sm:$0xff]   ;;  %v4159_v33 = vld [vmem:[%s6039_s1 + $0xf4] ss:$8 sps:$4 sm:$0xff]  }
   0xc   :  { %1052 = vmatprep.subr.bf16.mxu0 %v4123_v6  ;;  %v4161_v34 = vld [vmem:[%s6039_s1 + $0xf0] ss:$8 sps:$4 sm:$0xff]   ;;  %v21_v35 = vld [vmem:[%s6040_s0] sm:$0xf]  ;;  %v4547_v36 = vld [vmem:[%s6040_s0 + $0x4] sm:$0xf] }
   0xd   :  { %v4167_v37 = vld [vmem:[%s6039_s1 + $0x104] ss:$8 sps:$4 sm:$0xff]   ;;  %v4558_v39 = vld [vmem:[%s6040_s0 + $0x28] sm:$0xf]  ;;  %v4561_v40 = vcombine.low %v21_v35, %v4547_v36  ;;  %v4582_v45 = vld [vmem:[%s6039_s1 + $0x214] ss:$8 sps:$4 sm:$0xff]  }
   0xe   :  { %v3597_v38 = vld [vmem:[%s6040_s0 + $0x24] sm:$0xf]  ;;  %v4571_v42 = vld [vmem:[%s6039_s1 + $0x200] ss:$8 sps:$4 sm:$0xff]   ;;  %v4173_v46 = vld [vmem:[%s6039_s1 + $0x114] ss:$8 sps:$4 sm:$0xff]  }
   0xf   :  { %1053 = vmatpush1.bf16.msra.mxu0 %v4125_v7  ;;  %v4566_v41 = vld [vmem:[%s6039_s1 + $0x204] ss:$8 sps:$4 sm:$0xff]   ;;  %v4165_v43 = vld [vmem:[%s6039_s1 + $0x100] ss:$8 sps:$4 sm:$0xff]   ;;  %v4577_v44 = vcombine.low %v3597_v38, %v4558_v39  ;;  %v3573_v47 = vld [vmem:[%s6040_s0 + $0x18] sm:$0xf] }
  0x10   :  { %1054 = vmatprep.subr.bf16.mxu0 %v4126_v8  ;;  %3873 = vmatprep.subr.bf16.mxu1 %v4566_v41  ;;  %v4594_v48 = vld [vmem:[%s6040_s0 + $0x1c] sm:$0xf]  ;;  %v4600_v49 = vld [vmem:[%s6039_s1 + $0x210] ss:$8 sps:$4 sm:$0xff]   ;;  %v4614_v52 = vld [vmem:[%s6039_s1 + $0x224] ss:$8 sps:$4 sm:$0xff]  }
  0x11   :  { %6057 = vst [vmem:[#allocation4_spill] sm:$0xff] %v4594_v48  ;;  %3881 = vmatpush1.bf16.msra.mxu1 %v4571_v42  ;;  %v4171_v50 = vld [vmem:[%s6039_s1 + $0x110] ss:$8 sps:$4 sm:$0xff]   ;;  %v3599_v51 = vld [vmem:[%s6040_s0 + $0x3c] sm:$0xf]  ;;  %v4631_v56 = vcombine.low %v3573_v47, %v4594_v48  ;;  %v6045_v6 = vmov 0  }
  0x12   :  { %3874 = vmatprep.subr.bf16.mxu1 %v4582_v45  ;;  %v4619_v53 = vld [vmem:[%s6040_s0 + $0x40] sm:$0xf]  ;;  %v4179_v54 = vld [vmem:[%s6039_s1 + $0x124] ss:$8 sps:$4 sm:$0xff]   ;;  %v4637_v57 = vld [vmem:[%s6039_s1 + $0x234] ss:$8 sps:$4 sm:$0xff]   ;;  %1484 = vmatprep.mubr.bf16.mxu1 %v6045_v6 }
  0x13   :  { %1055 = vmatpush1.bf16.msra.mxu0 %v4128_v9  ;;  %v4628_v55 = vld [vmem:[%s6039_s1 + $0x220] ss:$8 sps:$4 sm:$0xff]   ;;  %v4640_v58 = vcombine.low %v3599_v51, %v4619_v53  ;;  %v4185_v60 = vld [vmem:[%s6039_s1 + $0x134] ss:$8 sps:$4 sm:$0xff]   ;;  %v3575_v61 = vld [vmem:[%s6040_s0 + $0x30] sm:$0xf] }
  0x14   :  { %1056 = vmatprep.subr.bf16.mxu0 %v4129_v10  ;;  %v4177_v59 = vld [vmem:[%s6039_s1 + $0x120] ss:$8 sps:$4 sm:$0xff]   ;;  %v4655_v62 = vld [vmem:[%s6039_s1 + $0x230] ss:$8 sps:$4 sm:$0xff]   ;;  %v4661_v63 = vld [vmem:[%s6040_s0 + $0x34] sm:$0xf] }
  0x15   :  { %3882 = vmatpush1.bf16.msra.mxu1 %v4600_v49  ;;  %v4667_v0 = vld [vmem:[%s6039_s1 + $0x244] ss:$8 sps:$4 sm:$0xff]   ;;  %v3601_v1 = vld [vmem:[%s6040_s0 + $0x54] sm:$0xf]  ;;  %v4676_v2 = vld [vmem:[%s6040_s0 + $0x58] sm:$0xf]  ;;  %v4708_v7 = vcombine.low %v3575_v61, %v4661_v63 }
  0x16   :  { %3875 = vmatprep.subr.bf16.mxu1 %v4614_v52  ;;  %v4183_v3 = vld [vmem:[%s6039_s1 + $0x130] ss:$8 sps:$4 sm:$0xff]   ;;  %v4191_v4 = vld [vmem:[%s6039_s1 + $0x144] ss:$8 sps:$4 sm:$0xff]   ;;  %v4688_v5 = vld [vmem:[%s6039_s1 + $0x240] ss:$8 sps:$4 sm:$0xff]   ;;  %v4717_v9 = vcombine.low %v3601_v1, %v4676_v2 }
  0x17   :  { %1057 = vmatpush1.bf16.msra.mxu0 %v4131_v11  ;;  %1950 = vst [vmem:[#allocation3] sm:$0xf] %v6045_v6  ;;  %1951 = vst [vmem:[#allocation3 + $0x10] sm:$0xf] %v6045_v6  ;;  %v4714_v8 = vld [vmem:[%s6039_s1 + $0x254] ss:$8 sps:$4 sm:$0xff]  }
  0x18   :  { %1058 = vmatprep.subr.bf16.mxu0 %v4132_v12  ;;  %1952 = vst [vmem:[#allocation3 + $0x20] sm:$0xf] %v6045_v6  ;;  %1953 = vst [vmem:[#allocation3 + $0x30] sm:$0xf] %v6045_v6  ;;  %v4189_v10 = vld [vmem:[%s6039_s1 + $0x140] ss:$8 sps:$4 sm:$0xff]  }
  0x19   :  { %3883 = vmatpush1.bf16.msra.mxu1 %v4628_v55  ;;  %1954 = vst [vmem:[#allocation3 + $0x40] sm:$0xf] %v6045_v6  ;;  %1955 = vst [vmem:[#allocation3 + $0x50] sm:$0xf] %v6045_v6  ;;  %v4197_v11 = vld [vmem:[%s6039_s1 + $0x154] ss:$8 sps:$4 sm:$0xff]  }
  0x1a   :  { %3876 = vmatprep.subr.bf16.mxu1 %v4637_v57  ;;  %1956 = vst [vmem:[#allocation3 + $0x60] sm:$0xf] %v6045_v6  ;;  %1957 = vst [vmem:[#allocation3 + $0x70] sm:$0xf] %v6045_v6  ;;  %v4729_v12 = vld [vmem:[%s6039_s1 + $0x250] ss:$8 sps:$4 sm:$0xff]  }
  0x1b   :  { %1059 = vmatpush1.bf16.msra.mxu0 %v4134_v16  ;;  %1958 = vst [vmem:[#allocation3 + $0x8] sm:$0xf0] %v6045_v6  ;;  %1959 = vst [vmem:[#allocation3 + $0x18] sm:$0xf0] %v6045_v6  ;;  %v3651_v13 = vld [vmem:[%s6040_s0 + $0x30] sm:$0xe] }
  0x1c   :  { %1060 = vmatprep.subr.bf16.mxu0 %v4135_v17  ;;  %1960 = vst [vmem:[#allocation3 + $0x28] sm:$0xf0] %v6045_v6  ;;  %1961 = vst [vmem:[#allocation3 + $0x38] sm:$0xf0] %v6045_v6  ;;  %v4739_v16 = vld [vmem:[%s6039_s1 + $0x264] ss:$8 sps:$4 sm:$0xff]  }
  0x1d   :  { %3884 = vmatpush1.bf16.msra.mxu1 %v4655_v62  ;;  %1962 = vst [vmem:[#allocation3 + $0x48] sm:$0xf0] %v6045_v6  ;;  %1963 = vst [vmem:[#allocation3 + $0x58] sm:$0xf0] %v6045_v6  ;;  %v3577_v17 = vld [vmem:[%s6040_s0 + $0x48] sm:$0xf] }
  0x1e   :  { %1964 = vst [vmem:[#allocation3 + $0x68] sm:$0xf0] %v6045_v6  ;;  %1965 = vst [vmem:[#allocation3 + $0x78] sm:$0xf0] %v6045_v6  ;;  %3877 = vmatprep.subr.bf16.mxu1 %v4667_v0  ;;  %v3579_v35 = vld [vmem:[%s6040_s0 + $0x60] sm:$0xf] }
  0x1f   :  { %1061 = vmatpush1.bf16.msra.mxu0 %v4137_v18  ;;  %v3578_v18 = vld [vmem:[%s6040_s0 + $0x4c] sm:$0xf]  ;;  %v4207_v38 = vld [vmem:[%s6039_s1 + $0x170] ss:$8 sps:$4 sm:$0xff]   ;;  %v209_v48 = vshrl.u32 %v4708_v7, 16  ;;  %vm2394_vm12 = vcmask 1042432  }
  0x20   :  { %1062 = vmatprep.subr.bf16.mxu0 %v4138_v19  ;;  %v4195_v19 = vld [vmem:[%s6039_s1 + $0x150] ss:$8 sps:$4 sm:$0xff]   ;;  %v4213_v47 = vld [vmem:[%s6039_s1 + $0x184] ss:$8 sps:$4 sm:$0xff]   ;;  %vm2239_vm13 = vsmask.f32 3328 }
  0x21   :  { %3885 = vmatpush1.bf16.msra.mxu1 %v4688_v5  ;;  %v4839_v61 = vld [vmem:[%s6040_s0 + $0x50] ss:$0 sps:$4 sm:$0x11]   ;;  %vm2449_vm14 = vsmask.f32 2304 }
  0x22   :  { %3878 = vmatprep.subr.bf16.mxu1 %v4714_v8 }
  0x23   :  { %1063 = vmatpush1.bf16.msra.mxu0 %v4140_v20  ;;  %v3603_v20 = vld [vmem:[%s6040_s0 + $0x6c] sm:$0xf] }
  0x24   :  { %1064 = vmatprep.subr.bf16.mxu0 %v4141_v21  ;;  %v4757_v21 = vld [vmem:[%s6040_s0 + $0x70] sm:$0xf] }
  0x25   :  { %3886 = vmatpush1.bf16.msra.mxu1 %v4729_v12 }
  0x26   :  { %3879 = vmatprep.subr.bf16.mxu1 %v4739_v16 }
  0x27   :  { %1065 = vmatpush1.bf16.msra.mxu0 %v4143_v22  ;;  %v4203_v22 = vld [vmem:[%s6039_s1 + $0x164] ss:$8 sps:$4 sm:$0xff]  }
  0x28   :  { %1066 = vmatprep.subr.bf16.mxu0 %v4144_v23  ;;  %v3659_v23 = vcombine.low %v3651_v13, %v4661_v63  ;;  %v4217_v63 = vld [vmem:[%s6039_s1 + $0x194] ss:$8 sps:$4 sm:$0xff]   ;;  %v4215_v13 = vld [vmem:[%s6039_s1 + $0x190] ss:$8 sps:$4 sm:$0xff]  }
  0x2b   :  { %1067 = vmatpush1.bf16.msra.mxu0 %v4146_v24  ;;  %v4767_v24 = vld [vmem:[%s6039_s1 + $0x260] ss:$8 sps:$4 sm:$0xff]  }
  0x2c   :  { %1068 = vmatprep.subr.bf16.mxu0 %v4147_v25  ;;  %v4769_v25 = vcombine.low %v3577_v17, %v3578_v18  ;;  %3887 = vmatpush1.bf16.msra.mxu1 %v4767_v24  ;;  %v3607_v17 = vld [vmem:[%s6040_s0 + $0x9c] sm:$0xf] }
  0x2f   :  { %1069 = vmatpush1.bf16.msra.mxu0 %v4149_v26  ;;  %v4775_v26 = vld [vmem:[%s6039_s1 + $0x274] ss:$8 sps:$4 sm:$0xff]  }
  0x30   :  { %1070 = vmatprep.subr.bf16.mxu0 %v4150_v27  ;;  %v4778_v27 = vcombine.low %v3603_v20, %v4757_v21  ;;  %3880 = vmatprep.subr.bf16.mxu1 %v4775_v26 }
  0x33   :  { %1071 = vmatpush1.bf16.msra.mxu0 %v4152_v28  ;;  %v4201_v28 = vld [vmem:[%s6039_s1 + $0x160] ss:$8 sps:$4 sm:$0xff]  }
  0x34   :  { %1072 = vmatprep.subr.bf16.mxu0 %v4153_v29  ;;  %v4786_v29 = vld [vmem:[%s6040_s0 + $0x38] ss:$0 sps:$4 sm:$0x11]  }
  0x37   :  { %1073 = vmatpush1.bf16.msra.mxu0 %v4155_v30  ;;  %v4209_v30 = vld [vmem:[%s6039_s1 + $0x174] ss:$8 sps:$4 sm:$0xff]  }
  0x38   :  { %1074 = vmatprep.subr.bf16.mxu0 %v4156_v31  ;;  %v4795_v31 = vld [vmem:[%s6039_s1 + $0x270] ss:$8 sps:$4 sm:$0xff]  }
  0x39   :  { %3888 = vmatpush1.bf16.msra.mxu1 %v4795_v31 }
  0x3b   :  { %1075 = vmatpush1.bf16.msra.mxu0 %v4158_v32  ;;  %v463_v32 = vrot.slane %v3659_v23, 1 }
  0x3c   :  { %1076 = vmatprep.subr.bf16.mxu0 %v4159_v33  ;;  %v464_v33 = vrot.slane %v4786_v29, 1 }
  0x3e   :  { %v4826_v51 = vsel %vm448_vm0, %v463_v32, %v464_v33  ;;  %v4886_v32 = vld [vmem:[%s6040_s0 + $0x68] ss:$0 sps:$4 sm:$0x11]   ;;  %v4225_v33 = vld [vmem:[%s6039_s1 + $0x1b4] ss:$8 sps:$4 sm:$0xff]  }
  0x3f   :  { %1077 = vmatpush1.bf16.msra.mxu0 %v4161_v34  ;;  %v3652_v34 = vld [vmem:[%s6040_s0 + $0x48] sm:$0xe]  ;;  %6058 = vst [vmem:[#allocation5_spill] sm:$0xff] %v4826_v51  ;;  %1485 = vmatmul.mubr.bf16.vlgmr.msra.gmra.mrb[0].mxu1 %v4826_v51 }
  0x40   :  { %1239 = vmatprep.subr.bf16.mxu0 %v4167_v37  ;;  %v3580_v37 = vld [vmem:[%s6040_s0 + $0x64] sm:$0xf]  ;;  %1494 = vmatprep.mubr.bf16.mxu1 %v6045_v6 }
  0x42   :  { %1079 = vmatmul.mubr.bf16.vlgmr.msra.gmra.mrb[0].mxu0 %v4561_v40 }
  0x43   :  { %1240 = vmatpush1.bf16.msra.mxu0 %v4165_v43  ;;  %1088 = vmatprep.mubr.bf16.mxu0 %v4577_v44  ;;  %v3605_v43 = vld [vmem:[%s6040_s0 + $0x84] sm:$0xf] }
  0x44   :  { %1241 = vmatprep.subr.bf16.mxu0 %v4173_v46  ;;  %v4819_v46 = vld [vmem:[%s6040_s0 + $0x88] sm:$0xf] }
  0x47   :  { %1242 = vmatpush1.bf16.msra.mxu0 %v4171_v50  ;;  %v3660_v50 = vcombine.low %v3652_v34, %v3578_v18  ;;  %v4867_v18 = vld [vmem:[%s6040_s0 + $0xa0] sm:$0xf] }
  0x48   :  { %1243 = vmatprep.subr.bf16.mxu0 %v4179_v54  ;;  %v4828_v54 = vcombine.low %v3579_v35, %v3580_v37  ;;  %v478_v35 = vrot.slane %v4886_v32, 1 }
  0x49   :  { %v470_v1 = vrot.slane %v3660_v50, 1  ;;  %v4911_v50 = vld [vmem:[%s6040_s0 + $0xb8] sm:$0xf] }
  0x4a   :  { %1089 = vmatmul.mubr.bf16.gmra.mrb[4].mxu0 %v4631_v56 }
  0x4b   :  { %1098 = vmatprep.mubr.bf16.mxu0 %v4640_v58  ;;  %1244 = vmatpush1.bf16.msra.mxu0 %v4177_v59  ;;  %v4831_v59 = vcombine.low %v3605_v43, %v4819_v46  ;;  %v3584_v43 = vld [vmem:[%s6040_s0 + $0x94] sm:$0xf] }
  0x4c   :  { %1245 = vmatprep.subr.bf16.mxu0 %v4185_v60  ;;  %v4211_v60 = vld [vmem:[%s6039_s1 + $0x180] ss:$8 sps:$4 sm:$0xff]  }
  0x4f   :  { %1246 = vmatpush1.bf16.msra.mxu0 %v4183_v3  ;;  %v471_v3 = vrot.slane %v4839_v61, 1 }
  0x50   :  { %1247 = vmatprep.subr.bf16.mxu0 %v4191_v4  ;;  %v3653_v4 = vld [vmem:[%s6040_s0 + $0x60] sm:$0xe] }
  0x51   :  { %v3661_v20 = vcombine.low %v3653_v4, %v3580_v37  ;;  %v3654_v37 = vld [vmem:[%s6040_s0 + $0x78] sm:$0xe] }
  0x52   :  { %1099 = vmatmul.mubr.bf16.gmra.mrb[8].mxu0 %v4708_v7 }
  0x53   :  { %1108 = vmatprep.mubr.bf16.mxu0 %v4717_v9  ;;  %1248 = vmatpush1.bf16.msra.mxu0 %v4189_v10  ;;  %v3581_v10 = vld [vmem:[%s6040_s0 + $0x78] sm:$0xf]  ;;  %v477_v34 = vrot.slane %v3661_v20, 1  ;;  %v4939_v20 = vld [vmem:[%s6040_s0 + $0x80] ss:$0 sps:$4 sm:$0x11]  }
  0x54   :  { %1249 = vmatprep.subr.bf16.mxu0 %v4197_v11  ;;  %v3582_v11 = vld [vmem:[%s6040_s0 + $0x7c] sm:$0xf] }
  0x55   :  { %v4875_v23 = vcombine.low %v3581_v10, %v3582_v11  ;;  %v3662_v4 = vcombine.low %v3654_v37, %v3582_v11  ;;  %v4926_v10 = vsel %vm448_vm0, %v477_v34, %v478_v35  ;;  %v177_v11 = vshrl.u32 %v4561_v40, 16  ;;  %v4233_v34 = vld [vmem:[%s6039_s1 + $0x1d4] ss:$8 sps:$4 sm:$0xff]  }
  0x56   :  { %6061 = vst [vmem:[#allocation8_spill] sm:$0xff] %v4926_v10  ;;  %v485_v37 = vrot.slane %v4939_v20, 1 }
  0x57   :  { %1250 = vmatpush1.bf16.msra.mxu0 %v4195_v19  ;;  %v4221_v19 = vld [vmem:[%s6039_s1 + $0x1a4] ss:$8 sps:$4 sm:$0xff]   ;;  %v484_v35 = vrot.slane %v3662_v4, 1 }
  0x58   :  { %1251 = vmatprep.subr.bf16.mxu0 %v4203_v22  ;;  %v4873_v22 = vsel %vm448_vm0, %v470_v1, %v471_v3  ;;  %v4920_v1 = vld [vmem:[%s6040_s0 + $0x8] ss:$0 sps:$4 sm:$0x11]   ;;  %v4229_v3 = vld [vmem:[%s6039_s1 + $0x1c4] ss:$8 sps:$4 sm:$0xff]  }
  0x59   :  { %6059 = vst [vmem:[#allocation6_spill] sm:$0xff] %v4873_v22  ;;  %1495 = vmatmul.mubr.bf16.gmra.mrb[4].mxu1 %v4873_v22  ;;  %6060 = vst [vmem:[#allocation7_spill] sm:$0xff] %v4920_v1 }
  0x5a   :  { %1109 = vmatmul.mubr.bf16.gmra.mrb[12].mxu0 %v4769_v25  ;;  %1504 = vmatprep.mubr.bf16.mxu1 %v6045_v6 }
  0x5b   :  { %1118 = vmatprep.mubr.bf16.mxu0 %v4778_v27  ;;  %1252 = vmatpush1.bf16.msra.mxu0 %v4201_v28  ;;  %v4878_v28 = vcombine.low %v3607_v17, %v4867_v18 }
  0x5c   :  { %1253 = vmatprep.subr.bf16.mxu0 %v4209_v30  ;;  %v4219_v30 = vld [vmem:[%s6039_s1 + $0x1a0] ss:$8 sps:$4 sm:$0xff]  }
  0x5f   :  { %1254 = vmatpush1.bf16.msra.mxu0 %v4207_v38  ;;  %v3583_v38 = vld [vmem:[%s6040_s0 + $0x90] sm:$0xf] }
  0x60   :  { %1255 = vmatprep.subr.bf16.mxu0 %v4213_v47  ;;  %v3609_v47 = vld [vmem:[%s6040_s0 + $0xb4] sm:$0xf] }
  0x61   :  { %v4931_v17 = vcombine.low %v3609_v47, %v4911_v50  ;;  %1505 = vmatmul.mubr.bf16.gmra.mrb[8].mxu1 %v4926_v10  ;;  %v3585_v47 = vld [vmem:[%s6040_s0 + $0xa8] sm:$0xf]  ;;  %v4237_v10 = vld [vmem:[%s6039_s1 + $0x1e4] ss:$8 sps:$4 sm:$0xff]  }
  0x62   :  { %1119 = vmatmul.mubr.bf16.gmra.mrb[16].mxu0 %v4828_v54  ;;  %1514 = vmatprep.mubr.bf16.mxu1 %v6045_v6  ;;  %v4967_v6 = vld [vmem:[%s6040_s0 + $0x20] ss:$0 sps:$4 sm:$0x11]  }
  0x63   :  { %1128 = vmatprep.mubr.bf16.mxu0 %v4831_v59  ;;  %1256 = vmatpush1.bf16.msra.mxu0 %v4211_v60  ;;  %v4223_v60 = vld [vmem:[%s6039_s1 + $0x1b0] ss:$8 sps:$4 sm:$0xff]   ;;  %6062 = vst [vmem:[#allocation9_spill] sm:$0xff] %v4967_v6 }
  0x64   :  { %1257 = vmatprep.subr.bf16.mxu0 %v4217_v63  ;;  %v179_v63 = vshll.u32 %v4561_v40, 16  ;;  %v3655_v40 = vld [vmem:[%s6040_s0 + $0x90] sm:$0xe] }
  0x65   :  { %v3663_v22 = vcombine.low %v3655_v40, %v3584_v43  ;;  %v6064_v40 = vmov 0  }
  0x67   :  { %1258 = vmatpush1.bf16.msra.mxu0 %v4215_v13  ;;  %v4928_v13 = vcombine.low %v3583_v38, %v3584_v43  ;;  %v195_v38 = vshll.u32 %v4631_v56, 16  ;;  %v193_v43 = vshrl.u32 %v4631_v56, 16  ;;  %v4245_v56 = vld [vmem:[%s6039_s1 + $0x1f0] ss:$8 sps:$4 sm:$0xff]  }
  0x68   :  { %1259 = vmatprep.subr.bf16.mxu0 %v4221_v19  ;;  %v4227_v19 = vld [vmem:[%s6039_s1 + $0x1c0] ss:$8 sps:$4 sm:$0xff]  }
  0x6a   :  { %1129 = vmatmul.mubr.bf16.gmra.mrb[20].mxu0 %v4875_v23 }
  0x6b   :  { %1138 = vmatprep.mubr.bf16.mxu0 %v4878_v28  ;;  %1260 = vmatpush1.bf16.msra.mxu0 %v4219_v30  ;;  %v181_v30 = vrot.slane %v179_v63, 1  ;;  %v4231_v63 = vld [vmem:[%s6039_s1 + $0x1d0] ss:$8 sps:$4 sm:$0xff]  }
  0x6c   :  { %1261 = vmatprep.subr.bf16.mxu0 %v4225_v33  ;;  %v184_v33 = vshll.u32 %v4920_v1, 16 }
  0x6e   :  { %v186_v4 = vrot.slane %v184_v33, 1 }
  0x6f   :  { %1262 = vmatpush1.bf16.msra.mxu0 %v4223_v60  ;;  %v3586_v60 = vld [vmem:[%s6040_s0 + $0xac] sm:$0xf] }
  0x70   :  { %1263 = vmatprep.subr.bf16.mxu0 %v4229_v3  ;;  %v182_v3 = vor.u32 %v181_v30, %v177_v11  ;;  %v4975_v51 = vcombine.low %v3585_v47, %v3586_v60  ;;  %v4980_v11 = vld [vmem:[%s6040_s0 + $0x98] ss:$0 sps:$4 sm:$0x11]   ;;  %v4235_v30 = vld [vmem:[%s6039_s1 + $0x1e0] ss:$8 sps:$4 sm:$0xff]   ;;  %v491_v47 = vrot.slane %v3663_v22, 1 }
  0x72   :  { %1139 = vmatmul.mubr.bf16.gmra.mrb[24].mxu0 %v4928_v13  ;;  %v4986_v33 = vsel %vm175_vm1, %v182_v3, %v186_v4  ;;  %v3656_v3 = vld [vmem:[%s6040_s0 + $0xa8] sm:$0xe] }
  0x73   :  { %1148 = vmatprep.mubr.bf16.mxu0 %v4931_v17  ;;  %1264 = vmatpush1.bf16.msra.mxu0 %v4227_v19  ;;  %v4973_v19 = vsel %vm448_vm0, %v484_v35, %v485_v37  ;;  %v200_v35 = vshll.u32 %v4967_v6, 16  ;;  %v4247_v37 = vld [vmem:[%s6039_s1 + $0x1f4] ss:$8 sps:$4 sm:$0xff]   ;;  %v3664_v22 = vcombine.low %v3656_v3, %v3586_v60  ;;  %v5011_v6 = vld [vmem:[%s6040_s0 + $0xb0] ss:$0 sps:$4 sm:$0x11]  }
  0x74   :  { %1265 = vmatprep.subr.bf16.mxu0 %v4233_v34  ;;  %6063 = vst [vmem:[#allocation10_spill] sm:$0xff] %v4973_v19  ;;  %v197_v34 = vrot.slane %v195_v38, 1  ;;  %1515 = vmatmul.mubr.bf16.gmra.mrb[12].mxu1 %v4973_v19 }
  0x75   :  { %1524 = vmatprep.mubr.bf16.mxu1 %v6064_v40  ;;  %v202_v4 = vrot.slane %v200_v35, 1  ;;  %v498_v60 = vrot.slane %v3664_v22, 1  ;;  %v3665_v35 = vld [vmem:[%s6040_s0 + $0xc] sm:$0xe] }
  0x76   :  { %v198_v38 = vor.u32 %v197_v34, %v193_v43  ;;  %v216_v43 = vshll.u32 %v4786_v29, 16  ;;  %v499_v34 = vrot.slane %v5011_v6, 1 }
  0x77   :  { %1266 = vmatpush1.bf16.msra.mxu0 %v4231_v63  ;;  %v492_v63 = vrot.slane %v4980_v11, 1 }
  0x78   :  { %1267 = vmatprep.subr.bf16.mxu0 %v4237_v10  ;;  %v211_v10 = vshll.u32 %v4708_v7, 16  ;;  %v227_v7 = vshll.u32 %v4769_v25, 16 }
  0x79   :  { %v5006_v19 = vsel %vm448_vm0, %v491_v47, %v492_v63  ;;  %v3673_v47 = vcombine.low %v3665_v35, %v4478_v14  ;;  %v5035_v63 = vld [vmem:[%s6040_s0 + $0x14] ss:$0 sps:$4 sm:$0x11]   ;;  %v241_v35 = vshrl.u32 %v4828_v54, 16 }
  0x7a   :  { %1149 = vmatmul.mubr.bf16.gmra.mrb[28].mxu0 %v4975_v51  ;;  %v213_v1 = vrot.slane %v211_v10, 1  ;;  %v229_v10 = vrot.slane %v227_v7, 1  ;;  %v514_v14 = vrot.slane %v5035_v63, 1 }
  0x7b   :  { %1158 = vmatprep.mubr.bf16.mxu0 %v4986_v33  ;;  %1268 = vmatpush1.bf16.msra.mxu0 %v4235_v30  ;;  %v5014_v30 = vsel %vm175_vm1, %v198_v38, %v202_v4  ;;  %v232_v38 = vshll.u32 %v4839_v61, 16 }
  0x7c   :  { %1269 = vmatprep.subr.bf16.mxu0 %v4247_v37  ;;  %1525 = vmatmul.mubr.bf16.gmra.mrb[16].mxu1 %v5006_v19  ;;  %v214_v29 = vor.u32 %v213_v1, %v209_v48  ;;  %v218_v37 = vrot.slane %v216_v43, 1  ;;  %v513_v48 = vrot.slane %v3673_v47, 1  ;;  %v3666_v1 = vld [vmem:[%s6040_s0 + $0x24] sm:$0xe] }
  0x7d   :  { %1534 = vmatprep.mubr.bf16.mxu1 %v6064_v40  ;;  %v234_v22 = vrot.slane %v232_v38, 1  ;;  %v3674_v43 = vcombine.low %v3666_v1, %v4558_v39  ;;  %v3667_v39 = vld [vmem:[%s6040_s0 + $0x3c] sm:$0xe]  ;;  %v257_v1 = vshrl.u32 %v4875_v23, 16 }
  0x7e   :  { %v5038_v3 = vsel %vm175_vm1, %v214_v29, %v218_v37  ;;  %v515_v61 = vsel %vm448_vm0, %v513_v48, %v514_v14  ;;  %v248_v29 = vshll.u32 %v4886_v32, 16  ;;  %v3675_v38 = vcombine.low %v3667_v39, %v4619_v53  ;;  %v5076_v48 = vld [vmem:[%s6040_s0 + $0x44] ss:$0 sps:$4 sm:$0x11]   ;;  %v3668_v53 = vld [vmem:[%s6040_s0 + $0x54] sm:$0xe] }
  0x7f   :  { %1270 = vmatpush1.bf16.msra.mxu0 %v4245_v56  ;;  %v225_v56 = vshrl.u32 %v4769_v25, 16  ;;  %v243_v25 = vshll.u32 %v4828_v54, 16  ;;  %v520_v37 = vrot.slane %v3674_v43, 1  ;;  %v275_v43 = vshll.u32 %v4928_v13, 16 }
  0x80   :  { %1432 = vmatprep.subr.bf16.mxu0 %v4566_v41  ;;  %v5029_v41 = vsel %vm448_vm0, %v498_v60, %v499_v34  ;;  %v5056_v60 = vld [vmem:[%s6040_s0 + $0x2c] ss:$0 sps:$4 sm:$0x11]  }
  0x81   :  { %v230_v4 = vor.u32 %v229_v10, %v225_v56  ;;  %v245_v7 = vrot.slane %v243_v25, 1  ;;  %v521_v47 = vrot.slane %v5056_v60, 1  ;;  %v259_v56 = vshll.u32 %v4875_v23, 16 }
  0x82   :  { %1159 = vmatmul.mubr.bf16.gmra.mrb[32].mxu0 %v4481_v15  ;;  %v250_v10 = vrot.slane %v248_v29, 1  ;;  %v5096_v29 = vld [vmem:[%s6040_s0 + $0x5c] ss:$0 sps:$4 sm:$0x11]   ;;  %v277_v39 = vrot.slane %v275_v43, 1 }
  0x83   :  { %1168 = vmatprep.mubr.bf16.mxu0 %v5014_v30  ;;  %v5059_v34 = vsel %vm175_vm1, %v230_v4, %v234_v22  ;;  %v246_v54 = vor.u32 %v245_v7, %v241_v35  ;;  %v522_v32 = vsel %vm448_vm0, %v520_v37, %v521_v47  ;;  %v261_v25 = vrot.slane %v259_v56, 1 }
  0x84   :  { %1535 = vmatmul.mubr.bf16.gmra.mrb[20].mxu1 %v5029_v41  ;;  %v264_v4 = vshll.u32 %v4939_v20, 16  ;;  %v527_v22 = vrot.slane %v3675_v38, 1  ;;  %v3676_v7 = vcombine.low %v3668_v53, %v4676_v2  ;;  %v273_v47 = vshrl.u32 %v4928_v13, 16  ;;  %v3669_v2 = vld [vmem:[%s6040_s0 + $0x6c] sm:$0xe] }
  0x85   :  { %1544 = vmatprep.mubr.bf16.mxu1 %v6064_v40  ;;  %v5079_v14 = vsel %vm175_vm1, %v246_v54, %v250_v10  ;;  %v262_v23 = vor.u32 %v261_v25, %v257_v1  ;;  %v280_v56 = vshll.u32 %v4980_v11, 16  ;;  %v535_v10 = vrot.slane %v5096_v29, 1  ;;  %v5116_v25 = vld [vmem:[%s6040_s0 + $0x74] ss:$0 sps:$4 sm:$0x11]  }
  0x86   :  { %v266_v35 = vrot.slane %v264_v4, 1  ;;  %v534_v54 = vrot.slane %v3676_v7, 1  ;;  %v278_v13 = vor.u32 %v277_v39, %v273_v47  ;;  %v3677_v1 = vcombine.low %v3669_v2, %v4757_v21  ;;  %v3670_v21 = vld [vmem:[%s6040_s0 + $0x84] sm:$0xe] }
  0x87   :  { %v282_v38 = vrot.slane %v280_v56, 1  ;;  %v296_v53 = vshll.u32 %v5011_v6, 16  ;;  %v3678_v7 = vcombine.low %v3670_v21, %v4819_v46  ;;  %v5136_v47 = vld [vmem:[%s6040_s0 + $0x8c] ss:$0 sps:$4 sm:$0x11]   ;;  %v313_v56 = vshrl.u32 %v4481_v15, 16 }
  0x88   :  { %v5099_v37 = vsel %vm175_vm1, %v262_v23, %v266_v35  ;;  %v536_v11 = vsel %vm448_vm0, %v534_v54, %v535_v10  ;;  %v541_v43 = vrot.slane %v3677_v1, 1  ;;  %v542_v23 = vrot.slane %v5116_v25, 1  ;;  %v3671_v46 = vld [vmem:[%s6040_s0 + $0x9c] sm:$0xe] }
  0x89   :  { %v5119_v4 = vsel %vm175_vm1, %v278_v13, %v282_v38  ;;  %v320_v10 = vshll.u32 %v5035_v63, 16  ;;  %v548_v2 = vrot.slane %v3678_v7, 1  ;;  %v5156_v1 = vld [vmem:[%s6040_s0 + $0xa4] ss:$0 sps:$4 sm:$0x11]  }
  0x8a   :  { %1169 = vmatmul.mubr.bf16.gmra.mrb[36].mxu0 %v4577_v44  ;;  %v543_v6 = vsel %vm448_vm0, %v541_v43, %v542_v23  ;;  %v336_v43 = vshll.u32 %v5056_v60, 16  ;;  %v556_v21 = vrot.slane %v5156_v1, 1 }
  0x8b   :  { %1178 = vmatprep.mubr.bf16.mxu0 %v5038_v3  ;;  %v322_v38 = vrot.slane %v320_v10, 1  ;;  %v352_v10 = vshll.u32 %v5076_v48, 16 }
  0x8c   :  { %1545 = vmatmul.mubr.bf16.gmra.mrb[24].mxu1 %v515_v61  ;;  %v528_v61 = vrot.slane %v5076_v48, 1 }
  0x8d   :  { %1554 = vmatprep.mubr.bf16.mxu1 %v6064_v40 }
  0x8e   :  { %v529_v20 = vsel %vm448_vm0, %v527_v22, %v528_v61  ;;  %v289_v22 = vshrl.u32 %v4975_v51, 16 }
  0x92   :  { %1179 = vmatmul.mubr.bf16.gmra.mrb[40].mxu0 %v4640_v58 }
  0x93   :  { %1188 = vmatprep.mubr.bf16.mxu0 %v5059_v34 }
  0x94   :  { %1555 = vmatmul.mubr.bf16.gmra.mrb[28].mxu1 %v522_v32  ;;  %v291_v32 = vshll.u32 %v4975_v51, 16  ;;  %v315_v51 = vshll.u32 %v4481_v15, 16  ;;  %v331_v15 = vshll.u32 %v4577_v44, 16 }
  0x95   :  { %1564 = vmatprep.mubr.bf16.mxu1 %v6064_v40 }
  0x96   :  { %v293_v61 = vrot.slane %v291_v32, 1  ;;  %v317_v54 = vrot.slane %v315_v51, 1  ;;  %v549_v32 = vrot.slane %v5136_v47, 1 }
  0x98   :  { %v294_v35 = vor.u32 %v293_v61, %v289_v22  ;;  %v318_v13 = vor.u32 %v317_v54, %v313_v56  ;;  %v550_v63 = vsel %vm448_vm0, %v548_v2, %v549_v32  ;;  %v329_v61 = vshrl.u32 %v4577_v44, 16 }
  0x99   :  { %v347_v44 = vshll.u32 %v4640_v58, 16  ;;  %v345_v56 = vshrl.u32 %v4640_v58, 16  ;;  %v363_v58 = vshll.u32 %v4717_v9, 16 }
  0x9a   :  { %1189 = vmatmul.mubr.bf16.gmra.mrb[44].mxu0 %v4717_v9  ;;  %v5159_v22 = vsel %vm175_vm1, %v318_v13, %v322_v38  ;;  %v361_v38 = vshrl.u32 %v4717_v9, 16 }
  0x9b   :  { %1198 = vmatprep.mubr.bf16.mxu0 %v5079_v14  ;;  %v349_v54 = vrot.slane %v347_v44, 1 }
  0x9c   :  { %1565 = vmatmul.mubr.bf16.gmra.mrb[32].mxu1 %v529_v20  ;;  %v298_v20 = vrot.slane %v296_v53, 1  ;;  %v333_v53 = vrot.slane %v331_v15, 1 }
  0x9d   :  { %1574 = vmatprep.mubr.bf16.mxu1 %v6064_v40 }
  0x9e   :  { %v5139_v39 = vsel %vm175_vm1, %v294_v35, %v298_v20  ;;  %v334_v35 = vor.u32 %v333_v53, %v329_v61  ;;  %v338_v20 = vrot.slane %v336_v43, 1 }
  0xa0   :  { %v5179_v7 = vsel %vm175_vm1, %v334_v35, %v338_v20  ;;  %v6066_v35 = vld [vmem:[#allocation4_spill] sm:$0xff] }
  0xa2   :  { %1199 = vmatmul.mubr.bf16.gmra.mrb[48].mxu0 %v4778_v27 }
  0xa3   :  { %1208 = vmatprep.mubr.bf16.mxu0 %v5099_v37 }
  0xa4   :  { %1575 = vmatmul.mubr.bf16.gmra.mrb[36].mxu1 %v536_v11  ;;  %v3679_v11 = vcombine.low %v3671_v46, %v4867_v18  ;;  %v3672_v18 = vld [vmem:[%s6040_s0 + $0xb4] sm:$0xe]  ;;  %v354_v46 = vrot.slane %v352_v10, 1 }
  0xa5   :  { %1584 = vmatprep.mubr.bf16.mxu1 %v6064_v40  ;;  %v3680_v51 = vcombine.low %v3672_v18, %v4911_v50  ;;  %v350_v50 = vor.u32 %v349_v54, %v345_v56  ;;  %v6069_v56 = vld [vmem:[#allocation6_spill] sm:$0xff] }
  0xa6   :  { %v555_v23 = vrot.slane %v3679_v11, 1  ;;  %v427_v11 = vshll.u32 %v4931_v17, 16  ;;  %v6071_v54 = vld [vmem:[#allocation10_spill] sm:$0xff] }
  0xa7   :  { %v562_v2 = vrot.slane %v3680_v51, 1  ;;  %v5193_v13 = vsel %vm175_vm1, %v350_v50, %v354_v46 }
  0xa8   :  { %v557_v60 = vsel %vm448_vm0, %v555_v23, %v556_v21  ;;  %v429_v53 = vrot.slane %v427_v11, 1  ;;  %v6065_v21 = vld [vmem:[#allocation7_spill] sm:$0xff] }
  0xa9   :  { %v450_v18 = vrot.slane %v6065_v21, 1 }
  0xaa   :  { %1209 = vmatmul.mubr.bf16.gmra.mrb[52].mxu0 %v4831_v59 }
  0xab   :  { %1218 = vmatprep.mubr.bf16.mxu0 %v5119_v4 }
  0xac   :  { %1585 = vmatmul.mubr.bf16.gmra.mrb[40].mxu1 %v543_v6  ;;  %v5176_v6 = vld [vmem:[%s6040_s0 + $0xbc] ss:$0 sps:$4 sm:$0x11]  }
  0xad   :  { %1594 = vmatprep.mubr.bf16.mxu1 %v6064_v40  ;;  %v563_v32 = vrot.slane %v5176_v6, 1 }
  0xaf   :  { %v564_v48 = vsel %vm448_vm0, %v562_v2, %v563_v32 }
  0xb2   :  { %1219 = vmatmul.mubr.bf16.gmra.mrb[56].mxu0 %v4878_v28 }
  0xb3   :  { %1228 = vmatprep.mubr.bf16.mxu0 %v5139_v39 }
  0xb4   :  { %1595 = vmatmul.mubr.bf16.gmra.mrb[44].mxu1 %v550_v63 }
  0xb5   :  { %1604 = vmatprep.mubr.bf16.mxu1 %v6064_v40 }
  0xba   :  { %1229 = vmatmul.mubr.bf16.gmra.mrb[60].mxu0 %v4931_v17 }
  0xbb   :  { %1271 = vmatprep.mubr.bf16.mxu0 %v5159_v22 }
  0xbc   :  { %1605 = vmatmul.mubr.bf16.gmra.mrb[48].mxu1 %v557_v60  ;;  %v6067_v60 = vld [vmem:[#allocation9_spill] sm:$0xff] }
  0xbd   :  { %1614 = vmatprep.mubr.bf16.mxu1 %v6064_v40  ;;  %v457_v51 = vrot.slane %v6067_v60, 1 }
  0xc2   :  { %1272 = vmatmul.mubr.bf16.vlgmr.msra.gmra.mrb[0].mxu0 %v4986_v33  ;;  %v365_v33 = vrot.slane %v363_v58, 1 }
  0xc3   :  { %1433 = vmatpush1.bf16.msra.mxu0 %v4571_v42  ;;  %1281 = vmatprep.mubr.bf16.mxu0 %v5179_v7  ;;  %v368_v42 = vshll.u32 %v5096_v29, 16 }
  0xc4   :  { %1434 = vmatprep.subr.bf16.mxu0 %v4582_v45  ;;  %1615 = vmatmul.mubr.bf16.gmra.mrb[52].mxu1 %v564_v48  ;;  %v366_v45 = vor.u32 %v365_v33, %v361_v38  ;;  %v4282_v38 = vld [vmem:[%s6041_s3] ss:$8 sps:$4 sm:$0xff]   ;;  %v4284_v33 = vld [vmem:[%s6041_s3 + $0x4] ss:$8 sps:$4 sm:$0xff]  }
  0xc5   :  { %v370_v15 = vrot.slane %v368_v42, 1  ;;  %v4285_v42 = vld [vmem:[%s6041_s3 + $0x10] ss:$8 sps:$4 sm:$0xff]   ;;  %3086 = vmatprep.subr.bf16.mxu1 %v4284_v33 }
  0xc6   :  { %3087 = vmatpush1.bf16.msra.mxu1 %v4282_v38 }
  0xc7   :  { %1435 = vmatpush1.bf16.msra.mxu0 %v4600_v49  ;;  %v379_v49 = vshll.u32 %v4778_v27, 16  ;;  %v5205_v9 = vsel %vm175_vm1, %v366_v45, %v370_v15  ;;  %v4287_v45 = vld [vmem:[%s6041_s3 + $0x14] ss:$8 sps:$4 sm:$0xff]  }
  0xc8   :  { %1436 = vmatprep.subr.bf16.mxu0 %v4614_v52  ;;  %v377_v52 = vshrl.u32 %v4778_v27, 16  ;;  %3088 = vmatprep.subr.bf16.mxu1 %v4287_v45  ;;  %v4309_v45 = vld [vmem:[%s6041_s3 + $0x90] ss:$8 sps:$4 sm:$0xff]  }
  0xc9   :  { %v381_v29 = vrot.slane %v379_v49, 1 }
  0xca   :  { %1282 = vmatmul.mubr.bf16.gmra.mrb[4].mxu0 %v5014_v30  ;;  %v384_v30 = vshll.u32 %v5116_v25, 16  ;;  %v393_v25 = vshrl.u32 %v4831_v59, 16  ;;  %3089 = vmatpush1.bf16.msra.mxu1 %v4285_v42 }
  0xcb   :  { %1291 = vmatprep.mubr.bf16.mxu0 %v5193_v13  ;;  %1437 = vmatpush1.bf16.msra.mxu0 %v4628_v55  ;;  %v382_v55 = vor.u32 %v381_v29, %v377_v52  ;;  %v4288_v29 = vld [vmem:[%s6041_s3 + $0x20] ss:$8 sps:$4 sm:$0xff]  }
  0xcc   :  { %1438 = vmatprep.subr.bf16.mxu0 %v4637_v57  ;;  %v386_v57 = vrot.slane %v384_v30, 1  ;;  %v4290_v30 = vld [vmem:[%s6041_s3 + $0x24] ss:$8 sps:$4 sm:$0xff]  }
  0xcd   :  { %3090 = vmatprep.subr.bf16.mxu1 %v4290_v30 }
  0xce   :  { %v387_v27 = vsel %vm175_vm1, %v382_v55, %v386_v57  ;;  %3091 = vmatpush1.bf16.msra.mxu1 %v4288_v29  ;;  %v4311_v29 = vld [vmem:[%s6041_s3 + $0x94] ss:$8 sps:$4 sm:$0xff]  }
  0xcf   :  { %1439 = vmatpush1.bf16.msra.mxu0 %v4655_v62  ;;  %v395_v62 = vshll.u32 %v4831_v59, 16  ;;  %v409_v59 = vshrl.u32 %v4878_v28, 16 }
  0xd0   :  { %1440 = vmatprep.subr.bf16.mxu0 %v4667_v0  ;;  %v400_v0 = vshll.u32 %v5136_v47, 16 }
  0xd1   :  { %v397_v63 = vrot.slane %v395_v62, 1 }
  0xd2   :  { %1292 = vmatmul.mubr.bf16.gmra.mrb[8].mxu0 %v5038_v3  ;;  %v402_v3 = vrot.slane %v400_v0, 1 }
  0xd3   :  { %1301 = vmatprep.mubr.bf16.mxu0 %v5205_v9  ;;  %1441 = vmatpush1.bf16.msra.mxu0 %v4688_v5  ;;  %v398_v5 = vor.u32 %v397_v63, %v393_v25  ;;  %v4291_v25 = vld [vmem:[%s6041_s3 + $0x30] ss:$8 sps:$4 sm:$0xff]   ;;  %v4293_v63 = vld [vmem:[%s6041_s3 + $0x34] ss:$8 sps:$4 sm:$0xff]  }
  0xd4   :  { %1442 = vmatprep.subr.bf16.mxu0 %v4714_v8  ;;  %v411_v8 = vshll.u32 %v4878_v28, 16  ;;  %3092 = vmatprep.subr.bf16.mxu1 %v4293_v63 }
  0xd5   :  { %3093 = vmatpush1.bf16.msra.mxu1 %v4291_v25 }
  0xd6   :  { %v413_v47 = vrot.slane %v411_v8, 1 }
  0xd7   :  { %1443 = vmatpush1.bf16.msra.mxu0 %v4729_v12  ;;  %v403_v12 = vsel %vm175_vm1, %v398_v5, %v402_v3 }
  0xd8   :  { %1444 = vmatprep.subr.bf16.mxu0 %v4739_v16  ;;  %v416_v16 = vshll.u32 %v5156_v1, 16 }
  0xda   :  { %1302 = vmatmul.mubr.bf16.gmra.mrb[12].mxu0 %v5059_v34  ;;  %v414_v34 = vor.u32 %v413_v47, %v409_v59  ;;  %v4296_v59 = vld [vmem:[%s6041_s3 + $0x44] ss:$8 sps:$4 sm:$0xff]  }
  0xdb   :  { %1311 = vmatprep.mubr.bf16.mxu0 %v387_v27  ;;  %1445 = vmatpush1.bf16.msra.mxu0 %v4767_v24  ;;  %v418_v24 = vrot.slane %v416_v16, 1 }
  0xdc   :  { %1446 = vmatprep.subr.bf16.mxu0 %v4775_v26  ;;  %v425_v26 = vshrl.u32 %v4931_v17, 16  ;;  %3094 = vmatprep.subr.bf16.mxu1 %v4296_v59  ;;  %v4312_v59 = vld [vmem:[%s6041_s3 + $0xa0] ss:$8 sps:$4 sm:$0xff]  }
  0xdd   :  { %v419_v61 = vsel %vm175_vm1, %v414_v34, %v418_v24 }
  0xde   :  { %v430_v28 = vor.u32 %v429_v53, %v425_v26 }
  0xdf   :  { %1447 = vmatpush1.bf16.msra.mxu0 %v4795_v31  ;;  %v432_v31 = vshll.u32 %v5176_v6, 16  ;;  %v6068_v6 = vld [vmem:[#allocation5_spill] sm:$0xff] }
  0xe1   :  { %v434_v43 = vrot.slane %v432_v31, 1 }
  0xe2   :  { %1312 = vmatmul.mubr.bf16.gmra.mrb[16].mxu0 %v5079_v14  ;;  %v437_v14 = vld [vmem:[%s6040_s0] sm:$0xe] }
  0xe3   :  { %1321 = vmatprep.mubr.bf16.mxu0 %v403_v12  ;;  %v3657_v1 = vcombine.low %v437_v14, %v4547_v36  ;;  %v435_v23 = vsel %vm175_vm1, %v430_v28, %v434_v43 }
  0xe5   :  { %v449_v17 = vrot.slane %v3657_v1, 1  ;;  %v4297_v1 = vld [vmem:[%s6041_s3 + $0x50] ss:$8 sps:$4 sm:$0xff]  }
  0xe7   :  { %v451_v44 = vsel %vm448_vm0, %v449_v17, %v450_v18  ;;  %v4302_v17 = vld [vmem:[%s6041_s3 + $0x64] ss:$8 sps:$4 sm:$0xff]   ;;  %v4300_v18 = vld [vmem:[%s6041_s3 + $0x60] ss:$8 sps:$4 sm:$0xff]  }
  0xea   :  { %1322 = vmatmul.mubr.bf16.gmra.mrb[20].mxu0 %v5099_v37  ;;  %v3650_v37 = vld [vmem:[%s6040_s0 + $0x18] sm:$0xe] }
  0xeb   :  { %1331 = vmatprep.mubr.bf16.mxu0 %v419_v61  ;;  %v3658_v20 = vcombine.low %v3650_v37, %v6066_v35 }
  0xed   :  { %v456_v36 = vrot.slane %v3658_v20, 1 }
  0xf2   :  { %1332 = vmatmul.mubr.bf16.gmra.mrb[24].mxu0 %v5119_v4  ;;  %v458_v4 = vsel %vm448_vm0, %v456_v36, %v457_v51  ;;  %v4305_v36 = vld [vmem:[%s6041_s3 + $0x74] ss:$8 sps:$4 sm:$0xff]  }
  0xf3   :  { %1341 = vmatprep.mubr.bf16.mxu0 %v435_v23 }
  0xfa   :  { %1342 = vmatmul.mubr.bf16.gmra.mrb[28].mxu0 %v5139_v39  ;;  %v6070_v39 = vld [vmem:[#allocation8_spill] sm:$0xff] }
  0xfb   :  { %1351 = vmatprep.mubr.bf16.mxu0 %v451_v44 }
 0x102   :  { %1352 = vmatmul.mubr.bf16.gmra.mrb[32].mxu0 %v5159_v22 }
 0x103   :  { %1361 = vmatprep.mubr.bf16.mxu0 %v458_v4 }
 0x10a   :  { %1362 = vmatmul.mubr.bf16.gmra.mrb[36].mxu0 %v5179_v7 }
 0x10b   :  { %1371 = vmatprep.mubr.bf16.mxu0 %v6068_v6 }
 0x112   :  { %1372 = vmatmul.mubr.bf16.gmra.mrb[40].mxu0 %v5193_v13  ;;  %v5259_v22 = vpop.f32.mrb[0].mxu1 }
 0x113   :  { %1381 = vmatprep.mubr.bf16.mxu0 %v6069_v56  ;;  %v5261_v7 = vpop.f32.mrb[1].mxu1  ;;  %v4306_v56 = vld [vmem:[%s6041_s3 + $0x80] ss:$8 sps:$4 sm:$0xff]  }
 0x114   :  { %v5263_v10 = vpop.f32.mrb[2].mxu1 }
 0x115   :  { %v5265_v2 = vpop.f32.mrb[3].mxu1 }
 0x11a   :  { %1382 = vmatmul.mubr.bf16.gmra.mrb[44].mxu0 %v5205_v9 }
 0x11b   :  { %1391 = vmatprep.mubr.bf16.mxu0 %v6070_v39  ;;  %v4308_v39 = vld [vmem:[%s6041_s3 + $0x84] ss:$8 sps:$4 sm:$0xff]  }
 0x122   :  { %1392 = vmatmul.mubr.bf16.gmra.mrb[48].mxu0 %v387_v27 }
 0x123   :  { %1401 = vmatprep.mubr.bf16.mxu0 %v6071_v54 }
 0x12a   :  { %1402 = vmatmul.mubr.bf16.gmra.mrb[52].mxu0 %v403_v12  ;;  %v4294_v12 = vld [vmem:[%s6041_s3 + $0x40] ss:$8 sps:$4 sm:$0xff]  }
 0x12b   :  { %1411 = vmatprep.mubr.bf16.mxu0 %v5006_v19  ;;  %3095 = vmatpush1.bf16.msra.mxu1 %v4294_v12 }
 0x12c   :  { %v5268_v32 = vpop.f32.mrb[4].mxu1 }
 0x12d   :  { %v5270_v50 = vpop.f32.mrb[5].mxu1 }
 0x12e   :  { %v5272_v46 = vpop.f32.mrb[6].mxu1 }
 0x12f   :  { %v5274_v19 = vpop.f32.mrb[7].mxu1 }
 0x132   :  { %1412 = vmatmul.mubr.bf16.gmra.mrb[56].mxu0 %v419_v61 }
 0x133   :  { %1421 = vmatprep.mubr.bf16.mxu0 %v5029_v41 }
 0x134   :  { %v5277_v41 = vpop.f32.mrb[8].mxu1 }
 0x135   :  { %v5279_v58 = vpop.f32.mrb[9].mxu1 }
 0x136   :  { %v5281_v48 = vpop.f32.mrb[10].mxu1 }
 0x137   :  { %v5283_v13 = vpop.f32.mrb[11].mxu1 }
 0x13a   :  { %1422 = vmatmul.mubr.bf16.gmra.mrb[60].mxu0 %v435_v23  ;;  %v4299_v23 = vld [vmem:[%s6041_s3 + $0x54] ss:$8 sps:$4 sm:$0xff]  }
 0x13b   :  { %1464 = vmatprep.mubr.bf16.mxu0 %v6064_v40  ;;  %3096 = vmatprep.subr.bf16.mxu1 %v4299_v23 }
 0x13c   :  { %3097 = vmatpush1.bf16.msra.mxu1 %v4297_v1  ;;  %v4314_v1 = vld [vmem:[%s6041_s3 + $0xa4] ss:$8 sps:$4 sm:$0xff]  }
 0x13d   :  { %3098 = vmatprep.subr.bf16.mxu1 %v4302_v17 }
 0x140   :  { %3099 = vmatpush1.bf16.msra.mxu1 %v4300_v18 }
 0x141   :  { %3100 = vmatprep.subr.bf16.mxu1 %v4305_v36  ;;  %v4317_v36 = vld [vmem:[%s6041_s3 + $0xb4] ss:$8 sps:$4 sm:$0xff]  }
 0x142   :  { %1465 = vmatmul.mubr.bf16.vlgmr.msra.gmra.mrb[0].mxu0 %v451_v44  ;;  %v4303_v44 = vld [vmem:[%s6041_s3 + $0x70] ss:$8 sps:$4 sm:$0xff]  }
 0x143   :  { %1474 = vmatprep.mubr.bf16.mxu0 %v6064_v40 }
 0x144   :  { %3101 = vmatpush1.bf16.msra.mxu1 %v4303_v44 }
 0x145   :  { %3102 = vmatprep.subr.bf16.mxu1 %v4308_v39  ;;  %v4320_v39 = vld [vmem:[%s6041_s3 + $0xc4] ss:$8 sps:$4 sm:$0xff]  }
 0x147   :  { %v5297_v15 = vpop.f32.mrb[12].mxu1 }
 0x148   :  { %v5299_v49 = vpop.f32.mrb[13].mxu1  ;;  %3103 = vmatpush1.bf16.msra.mxu1 %v4306_v56  ;;  %v4315_v56 = vld [vmem:[%s6041_s3 + $0xb0] ss:$8 sps:$4 sm:$0xff]  }
 0x149   :  { %v5301_v9 = vpop.f32.mrb[14].mxu1  ;;  %3104 = vmatprep.subr.bf16.mxu1 %v4311_v29 }
 0x14a   :  { %1475 = vmatmul.mubr.bf16.gmra.mrb[4].mxu0 %v458_v4  ;;  %v5303_v52 = vpop.f32.mrb[15].mxu1 }
 0x14c   :  { %3105 = vmatpush1.bf16.msra.mxu1 %v4309_v45  ;;  %v4318_v45 = vld [vmem:[%s6041_s3 + $0xc0] ss:$8 sps:$4 sm:$0xff]  }
 0x14d   :  { %3106 = vmatprep.subr.bf16.mxu1 %v4314_v1 }
 0x14f   :  { %v5311_v55 = vpop.f32.mrb[16].mxu1 }
 0x150   :  { %v5313_v57 = vpop.f32.mrb[17].mxu1  ;;  %3107 = vmatpush1.bf16.msra.mxu1 %v4312_v59 }
 0x151   :  { %v5315_v62 = vpop.f32.mrb[18].mxu1  ;;  %3108 = vmatprep.subr.bf16.mxu1 %v4317_v36 }
 0x152   :  { %v5317_v27 = vpop.f32.mrb[19].mxu1 }
 0x154   :  { %3109 = vmatpush1.bf16.msra.mxu1 %v4315_v56  ;;  %v4323_v56 = vld [vmem:[%s6041_s3 + $0xd4] ss:$8 sps:$4 sm:$0xff]  }
 0x155   :  { %3110 = vmatprep.subr.bf16.mxu1 %v4320_v39  ;;  %v4321_v39 = vld [vmem:[%s6041_s3 + $0xd0] ss:$8 sps:$4 sm:$0xff]  }
 0x157   :  { %v5325_v0 = vpop.f32.mrb[20].mxu1 }
 0x158   :  { %v5327_v5 = vpop.f32.mrb[21].mxu1  ;;  %3111 = vmatpush1.bf16.msra.mxu1 %v4318_v45  ;;  %v4324_v45 = vld [vmem:[%s6041_s3 + $0xe0] ss:$8 sps:$4 sm:$0xff]  }
 0x159   :  { %v5329_v3 = vpop.f32.mrb[22].mxu1  ;;  %3112 = vmatprep.subr.bf16.mxu1 %v4323_v56 }
 0x15a   :  { %v5331_v8 = vpop.f32.mrb[23].mxu1 }
 0x15c   :  { %3113 = vmatpush1.bf16.msra.mxu1 %v4321_v39 }
 0x15f   :  { %v5339_v47 = vpop.f32.mrb[24].mxu1 }
 0x160   :  { %v5341_v16 = vpop.f32.mrb[25].mxu1 }
 0x161   :  { %v5343_v34 = vpop.f32.mrb[26].mxu1 }
 0x162   :  { %v5345_v24 = vpop.f32.mrb[27].mxu1 }
 0x167   :  { %v5347_v11 = vpop.f32.mrb[28].mxu1 }
 0x168   :  { %v5349_v61 = vpop.f32.mrb[29].mxu1 }
 0x169   :  { %v5351_v26 = vpop.f32.mrb[30].mxu1 }
 0x16a   :  { %v5353_v53 = vpop.f32.mrb[31].mxu1 }
 0x16f   :  { %v5355_v31 = vpop.f32.mrb[32].mxu1 }
 0x170   :  { %v5357_v28 = vpop.f32.mrb[33].mxu1 }
 0x171   :  { %v5359_v43 = vpop.f32.mrb[34].mxu1 }
 0x172   :  { %v5361_v14 = vpop.f32.mrb[35].mxu1 }
 0x177   :  { %v5372_v21 = vpop.f32.mrb[36].mxu1 }
 0x178   :  { %v5377_v37 = vpop.f32.mrb[37].mxu1 }
 0x179   :  { %v5379_v35 = vpop.f32.mrb[38].mxu1 }
 0x17a   :  { %v5381_v20 = vpop.f32.mrb[39].mxu1 }
 0x17f   :  { %v5389_v60 = vpop.f32.mrb[40].mxu1 }
 0x180   :  { %v5391_v51 = vpop.f32.mrb[41].mxu1 }
 0x181   :  { %v5393_v4 = vpop.f32.mrb[42].mxu1 }
 0x182   :  { %v5395_v6 = vpop.f32.mrb[43].mxu1 }
 0x187   :  { %v5403_v54 = vpop.f32.mrb[44].mxu1 }
 0x188   :  { %v5405_v38 = vpop.f32.mrb[45].mxu1 }
 0x189   :  { %v5407_v33 = vpop.f32.mrb[46].mxu1 }
 0x18a   :  { %v5409_v42 = vpop.f32.mrb[47].mxu1 }
 0x18f   :  { %v5417_v30 = vpop.f32.mrb[48].mxu1 }
 0x190   :  { %v5419_v25 = vpop.f32.mrb[49].mxu1 }
 0x191   :  { %v5421_v63 = vpop.f32.mrb[50].mxu1 }
 0x192   :  { %v5423_v12 = vpop.f32.mrb[51].mxu1 }
 0x197   :  { %v5431_v23 = vpop.f32.mrb[52].mxu1 }
 0x198   :  { %6072 = vst [vmem:[#allocation7_spill] sm:$0xff] %v5431_v23  ;;  %v5433_v17 = vpop.f32.mrb[53].mxu1 }
 0x199   :  { %6073 = vst [vmem:[#allocation4_spill] sm:$0xff] %v5433_v17  ;;  %v5435_v18 = vpop.f32.mrb[54].mxu1 }
 0x19a   :  { %6074 = vst [vmem:[#allocation9_spill] sm:$0xff] %v5435_v18  ;;  %v5437_v44 = vpop.f32.mrb[55].mxu1 }
 0x19b   :  { %6075 = vst [vmem:[#allocation5_spill] sm:$0xff] %v5437_v44 }
 0x1a5   :  { %v1293_v29 = vpop.f32.mrb[8].mxu0 }
 0x1a6   :  { %v5452_v59 = vadd.f32 %v5259_v22, %v1293_v29  ;;  %v1295_v1 = vpop.f32.mrb[9].mxu0 }
 0x1a7   :  { %v5455_v40 = vadd.f32 %v5261_v7, %v1295_v1  ;;  %v1297_v36 = vpop.f32.mrb[10].mxu0  ;;  %v4326_v7 = vld [vmem:[%s6041_s3 + $0xe4] ss:$8 sps:$4 sm:$0xff]  }
 0x1a8   :  { %v5461_v44 = vadd.f32 %v5263_v10, %v1297_v36  ;;  %v1299_v18 = vpop.f32.mrb[11].mxu0  ;;  %3114 = vmatprep.subr.bf16.mxu1 %v4326_v7 }
 0x1a9   :  { %v5467_v22 = vadd.f32 %v5265_v2, %v1299_v18  ;;  %3115 = vmatpush1.bf16.msra.mxu1 %v4324_v45  ;;  %v4327_v2 = vld [vmem:[%s6041_s3 + $0xf0] ss:$8 sps:$4 sm:$0xff]   ;;  %v4329_v18 = vld [vmem:[%s6041_s3 + $0xf4] ss:$8 sps:$4 sm:$0xff]   ;;  %v4332_v45 = vld [vmem:[%s6041_s3 + $0x104] ss:$8 sps:$4 sm:$0xff]  }
 0x1aa   :  { %3116 = vmatprep.subr.bf16.mxu1 %v4329_v18 }
 0x1ad   :  { %v1303_v10 = vpop.f32.mrb[12].mxu0  ;;  %3117 = vmatpush1.bf16.msra.mxu1 %v4327_v2 }
 0x1ae   :  { %v5476_v29 = vadd.f32 %v5268_v32, %v1303_v10  ;;  %v1305_v1 = vpop.f32.mrb[13].mxu0  ;;  %3199 = vmatprep.subr.bf16.mxu1 %v4332_v45 }
 0x1af   :  { %v5485_v36 = vadd.f32 %v5270_v50, %v1305_v1  ;;  %v1307_v56 = vpop.f32.mrb[14].mxu0 }
 0x1b0   :  { %v5488_v39 = vadd.f32 %v5272_v46, %v1307_v56  ;;  %v1309_v7 = vpop.f32.mrb[15].mxu0 }
 0x1b1   :  { %v5491_v32 = vadd.f32 %v5274_v19, %v1309_v7 }
 0x1b5   :  { %v1313_v10 = vpop.f32.mrb[16].mxu0 }
 0x1b6   :  { %v5497_v17 = vadd.f32 %v5277_v41, %v1313_v10  ;;  %v1315_v50 = vpop.f32.mrb[17].mxu0 }
 0x1b7   :  { %v5500_v1 = vadd.f32 %v5279_v58, %v1315_v50  ;;  %v1317_v46 = vpop.f32.mrb[18].mxu0 }
 0x1b8   :  { %v5503_v18 = vadd.f32 %v5281_v48, %v1317_v46  ;;  %v1319_v19 = vpop.f32.mrb[19].mxu0 }
 0x1b9   :  { %v5506_v2 = vadd.f32 %v5283_v13, %v1319_v19 }
 0x1bd   :  { %v1323_v56 = vpop.f32.mrb[20].mxu0 }
 0x1be   :  { %v5509_v7 = vadd.f32 %v5297_v15, %v1323_v56  ;;  %v1325_v23 = vpop.f32.mrb[21].mxu0 }
 0x1bf   :  { %v5512_v41 = vadd.f32 %v5299_v49, %v1325_v23  ;;  %v1327_v45 = vpop.f32.mrb[22].mxu0 }
 0x1c0   :  { %v5515_v58 = vadd.f32 %v5301_v9, %v1327_v45  ;;  %v1329_v10 = vpop.f32.mrb[23].mxu0 }
 0x1c1   :  { %v5518_v48 = vadd.f32 %v5303_v52, %v1329_v10 }
 0x1c5   :  { %v1333_v50 = vpop.f32.mrb[24].mxu0 }
 0x1c6   :  { %v5521_v13 = vadd.f32 %v5311_v55, %v1333_v50  ;;  %v1335_v46 = vpop.f32.mrb[25].mxu0 }
 0x1c7   :  { %v5524_v15 = vadd.f32 %v5313_v57, %v1335_v46  ;;  %v1337_v19 = vpop.f32.mrb[26].mxu0 }
 0x1c8   :  { %v5527_v49 = vadd.f32 %v5315_v62, %v1337_v19  ;;  %v1339_v23 = vpop.f32.mrb[27].mxu0 }
 0x1c9   :  { %v5530_v9 = vadd.f32 %v5317_v27, %v1339_v23 }
 0x1cd   :  { %v1343_v56 = vpop.f32.mrb[28].mxu0 }
 0x1ce   :  { %v5533_v52 = vadd.f32 %v5325_v0, %v1343_v56  ;;  %v1345_v45 = vpop.f32.mrb[29].mxu0 }
 0x1cf   :  { %v5536_v55 = vadd.f32 %v5327_v5, %v1345_v45  ;;  %v1347_v10 = vpop.f32.mrb[30].mxu0  ;;  %v1787_v45 = vlaneseq }
 0x1d0   :  { %v5539_v57 = vadd.f32 %v5329_v3, %v1347_v10  ;;  %v1349_v50 = vpop.f32.mrb[31].mxu0 }
 0x1d1   :  { %v5542_v62 = vadd.f32 %v5331_v8, %v1349_v50 }
 0x1d5   :  { %v1353_v46 = vpop.f32.mrb[32].mxu0 }
 0x1d6   :  { %v5545_v27 = vadd.f32 %v5339_v47, %v1353_v46  ;;  %v1355_v19 = vpop.f32.mrb[33].mxu0  ;;  %v5559_v47 = vshrl.u32 %v1787_v45, 7 }
 0x1d7   :  { %v5548_v0 = vadd.f32 %v5341_v16, %v1355_v19  ;;  %v1357_v23 = vpop.f32.mrb[34].mxu0 }
 0x1d8   :  { %v5551_v5 = vadd.f32 %v5343_v34, %v1357_v23  ;;  %v1359_v56 = vpop.f32.mrb[35].mxu0 }
 0x1d9   :  { %v5554_v3 = vadd.f32 %v5345_v24, %v1359_v56  ;;  %v6055_v24 = vsub.s32 0, %v5559_v47  ;;  %v6056_v56 = vsub.s32 1, %v5559_v47 }
 0x1db   :  { %6076 = vst [vmem:[#allocation6_spill] sm:$0xff] %v5554_v3 }
 0x1dd   :  { %v1363_v10 = vpop.f32.mrb[36].mxu0 }
 0x1de   :  { %v5557_v8 = vadd.f32 %v5347_v11, %v1363_v10  ;;  %v1365_v50 = vpop.f32.mrb[37].mxu0  ;;  %v1785_v11 = vld [vmem:[%s6042_s2] sm:$0x3] }
 0x1df   :  { %v5562_v46 = vadd.f32 %v5349_v61, %v1365_v50  ;;  %v1367_v16 = vpop.f32.mrb[38].mxu0  ;;  %v5578_v10 = vrot.slane %v1785_v11, %v6055_v24 }
 0x1e0   :  { %6077 = vst [vmem:[#allocation8_spill] sm:$0xff] %v5557_v8  ;;  %v5565_v19 = vadd.f32 %v5351_v26, %v1367_v16  ;;  %v1369_v34 = vpop.f32.mrb[39].mxu0 }
 0x1e1   :  { %6078 = vst [vmem:[#allocation10_spill] sm:$0xff] %v5562_v46  ;;  %v5568_v23 = vadd.f32 %v5353_v53, %v1369_v34  ;;  %v5583_v53 = vrot.slane %v1785_v11, %v6056_v56  ;;  %v1883_v46 = vadd.s32 40, %v5559_v47 }
 0x1e2   :  { %6079 = vst [vmem:[#allocation11_spill] sm:$0xff] %v5565_v19 }
 0x1e3   :  { %6080 = vst [vmem:[#allocation12_spill] sm:$0xff] %v5568_v23 }
 0x1e5   :  { %v1373_v45 = vpop.f32.mrb[40].mxu0 }
 0x1e6   :  { %v3921_v61 = vadd.f32 %v5355_v31, %v1373_v45  ;;  %v1375_v26 = vpop.f32.mrb[41].mxu0 }
 0x1e7   :  { %v3922_v50 = vadd.f32 %v5357_v28, %v1375_v26  ;;  %v1377_v16 = vpop.f32.mrb[42].mxu0 }
 0x1e8   :  { %v1761_v34 = vmax.f32 %v5452_v59, %v3921_v61  ;;  %v3923_v23 = vadd.f32 %v5359_v43, %v1377_v16  ;;  %v1379_v19 = vpop.f32.mrb[43].mxu0  ;;  %v1899_v61 = vand.u32 15, %v1883_v46  ;;  %v1885_v46 = vadd.s32 56, %v5559_v47 }
 0x1e9   :  { %v1762_v31 = vmax.f32 %v5455_v40, %v3922_v50  ;;  %v3924_v45 = vadd.f32 %v5361_v14, %v1379_v19 }
 0x1ea   :  { %v1805_v24 = vadd.f32 %v5578_v10, %v1761_v34  ;;  %v1763_v28 = vmax.f32 %v5461_v44, %v3923_v23  ;;  %vm1915_vm2 = vcmp.lt.s32.totalorder %v1899_v61, 15 }
 0x1eb   :  { %v1806_v26 = vadd.f32 %v5583_v53, %v1762_v31  ;;  %v1764_v11 = vmax.f32 %v5467_v22, %v3924_v45 }
 0x1ec   :  { %v1837_v56 = vmax.f32 %v1805_v24, 0.0  ;;  %v1807_v59 = vadd.f32 %v5578_v10, %v1763_v28 }
 0x1ed   :  { %v1838_v43 = vmax.f32 %v1806_v26, 0.0  ;;  %v1808_v16 = vadd.f32 %v5583_v53, %v1764_v11  ;;  %v1383_v8 = vpop.f32.mrb[44].mxu0 }
 0x1ee   :  { %v1839_v3 = vmax.f32 %v1807_v59, 0.0  ;;  %v3925_v40 = vadd.f32 %v5372_v21, %v1383_v8  ;;  %v1385_v14 = vpop.f32.mrb[45].mxu0  ;;  %v1901_v59 = vand.u32 15, %v1885_v46 }
 0x1ef   :  { %v1865_v19 = vmax.f32 %v1837_v56, %v1838_v43  ;;  %v1840_v50 = vmax.f32 %v1808_v16, 0.0  ;;  %v3926_v44 = vadd.f32 %v5377_v37, %v1385_v14  ;;  %v1387_v23 = vpop.f32.mrb[46].mxu0 }
 0x1f0   :  { %v1765_v22 = vmax.f32 %v5476_v29, %v3925_v40  ;;  %v3927_v24 = vadd.f32 %v5379_v35, %v1387_v23  ;;  %v1389_v34 = vpop.f32.mrb[47].mxu0  ;;  %vm1917_vm3 = vcmp.lt.s32.totalorder %v1901_v59, 15 }
 0x1f1   :  { %v1866_v31 = vmax.f32 %v1839_v3, %v1840_v50  ;;  %v1766_v45 = vmax.f32 %v5485_v36, %v3926_v44  ;;  %v3928_v28 = vadd.f32 %v5381_v20, %v1389_v34 }
 0x1f2   :  { %v1809_v21 = vadd.f32 %v5578_v10, %v1765_v22  ;;  %v1767_v8 = vmax.f32 %v5488_v39, %v3927_v24  ;;  %v1887_v22 = vadd.s32 72, %v5559_v47 }
 0x1f3   :  { %v1931_v56 = vsel %vm1915_vm2, %v1866_v31, 0.0  ;;  %v1810_v37 = vadd.f32 %v5583_v53, %v1766_v45  ;;  %v1768_v26 = vmax.f32 %v5491_v32, %v3928_v28 }
 0x1f4   :  { %v1944_v29 = vpack.c.bf16 %v1931_v56, %v1865_v19  ;;  %v1841_v11 = vmax.f32 %v1809_v21, 0.0  ;;  %v1811_v35 = vadd.f32 %v5578_v10, %v1767_v8  ;;  %v1903_v8 = vand.u32 15, %v1887_v22 }
 0x1f5   :  { %v1842_v61 = vmax.f32 %v1810_v37, 0.0  ;;  %v1812_v3 = vadd.f32 %v5583_v53, %v1768_v26  ;;  %v1393_v36 = vpop.f32.mrb[48].mxu0 }
 0x1f6   :  { %v1978_v43 = vrot.slane %v1944_v29, 4  ;;  %v1843_v20 = vmax.f32 %v1811_v35, 0.0  ;;  %v3929_v16 = vadd.f32 %v5389_v60, %v1393_v36  ;;  %v1395_v40 = vpop.f32.mrb[49].mxu0  ;;  %vm1919_vm4 = vcmp.lt.s32.totalorder %v1903_v8, 15 }
 0x1f7   :  { %v1867_v39 = vmax.f32 %v1841_v11, %v1842_v61  ;;  %v1844_v14 = vmax.f32 %v1812_v3, 0.0  ;;  %v3930_v50 = vadd.f32 %v5391_v51, %v1395_v40  ;;  %v1397_v44 = vpop.f32.mrb[50].mxu0 }
 0x1f8   :  { %1981 = vst [vmem:[#allocation3 + $0x28] ss:$-4 sps:$4 sm:$0xff] %v1978_v43   ;;  %v1769_v32 = vmax.f32 %v5497_v17, %v3929_v16  ;;  %v3931_v19 = vadd.f32 %v5393_v4, %v1397_v44  ;;  %v1399_v23 = vpop.f32.mrb[51].mxu0  ;;  %v1889_v43 = vadd.s32 88, %v5559_v47 }
 0x1f9   :  { %v1868_v24 = vmax.f32 %v1843_v20, %v1844_v14  ;;  %v1770_v34 = vmax.f32 %v5500_v1, %v3930_v50  ;;  %v3932_v60 = vadd.f32 %v5395_v6, %v1399_v23 }
 0x1fa   :  { %v1813_v46 = vadd.f32 %v5578_v10, %v1769_v32  ;;  %v1771_v31 = vmax.f32 %v5503_v18, %v3931_v19  ;;  %v1905_v32 = vand.u32 15, %v1889_v43  ;;  %v6083_v43 = vld [vmem:[#allocation9_spill] sm:$0xff] }
 0x1fb   :  { %v1933_v51 = vsel %vm1917_vm3, %v1868_v24, 0.0  ;;  %v1814_v45 = vadd.f32 %v5583_v53, %v1770_v34  ;;  %v1772_v28 = vmax.f32 %v5506_v2, %v3932_v60 }
 0x1fc   :  { %v1945_v17 = vpack.c.bf16 %v1933_v51, %v1867_v39  ;;  %v1845_v21 = vmax.f32 %v1813_v46, 0.0  ;;  %v1815_v4 = vadd.f32 %v5578_v10, %v1771_v31  ;;  %vm1921_vm5 = vcmp.lt.s32.totalorder %v1905_v32, 15 }
 0x1fd   :  { %v1846_v56 = vmax.f32 %v1814_v45, 0.0  ;;  %v1816_v37 = vadd.f32 %v5583_v53, %v1772_v28  ;;  %v1403_v1 = vpop.f32.mrb[52].mxu0  ;;  %v1891_v28 = vadd.s32 104, %v5559_v47 }
 0x1fe   :  { %v1984_v26 = vrot.slane %v1945_v17, 4  ;;  %v1847_v6 = vmax.f32 %v1815_v4, 0.0  ;;  %v3933_v29 = vadd.f32 %v5403_v54, %v1403_v1  ;;  %v1405_v11 = vpop.f32.mrb[53].mxu0 }
 0x1ff   :  { %v1869_v18 = vmax.f32 %v1845_v21, %v1846_v56  ;;  %v1848_v35 = vmax.f32 %v1816_v37, 0.0  ;;  %v3934_v59 = vadd.f32 %v5405_v38, %v1405_v11  ;;  %v1407_v61 = vpop.f32.mrb[54].mxu0 }
 0x200   :  { %1987 = vst [vmem:[#allocation3 + $0x38] ss:$-4 sps:$4 sm:$0xff] %v1984_v26   ;;  %v1773_v2 = vmax.f32 %v5509_v7, %v3933_v29  ;;  %v3935_v3 = vadd.f32 %v5407_v33, %v1407_v61  ;;  %v1409_v36 = vpop.f32.mrb[55].mxu0  ;;  %v1907_v26 = vand.u32 15, %v1891_v28 }
 0x201   :  { %v1870_v20 = vmax.f32 %v1847_v6, %v1848_v35  ;;  %v1774_v16 = vmax.f32 %v5512_v41, %v3934_v59  ;;  %v3936_v54 = vadd.f32 %v5409_v42, %v1409_v36 }
 0x202   :  { %v1817_v40 = vadd.f32 %v5578_v10, %v1773_v2  ;;  %v1775_v39 = vmax.f32 %v5515_v58, %v3935_v3  ;;  %v6082_v2 = vld [vmem:[#allocation4_spill] sm:$0xff]  ;;  %vm1923_vm6 = vcmp.lt.s32.totalorder %v1907_v26, 15 }
 0x203   :  { %v1935_v38 = vsel %vm1919_vm4, %v1870_v20, 0.0  ;;  %v1818_v14 = vadd.f32 %v5583_v53, %v1774_v16  ;;  %v1776_v50 = vmax.f32 %v5518_v48, %v3936_v54  ;;  %v1893_v54 = vadd.s32 120, %v5559_v47 }
 0x204   :  { %v1946_v7 = vpack.c.bf16 %v1935_v38, %v1869_v18  ;;  %v1849_v44 = vmax.f32 %v1817_v40, 0.0  ;;  %v1819_v33 = vadd.f32 %v5578_v10, %v1775_v39  ;;  %v6081_v18 = vld [vmem:[#allocation7_spill] sm:$0xff]  ;;  %v6084_v38 = vld [vmem:[#allocation5_spill] sm:$0xff] }
 0x205   :  { %v1850_v19 = vmax.f32 %v1818_v14, 0.0  ;;  %v1820_v23 = vadd.f32 %v5583_v53, %v1776_v50  ;;  %v1413_v41 = vpop.f32.mrb[56].mxu0 }
 0x206   :  { %v1990_v22 = vrot.slane %v1946_v7, 4  ;;  %v1851_v42 = vmax.f32 %v1819_v33, 0.0  ;;  %v3937_v24 = vadd.f32 %v5417_v30, %v1413_v41  ;;  %v1415_v34 = vpop.f32.mrb[57].mxu0  ;;  %v1909_v41 = vand.u32 15, %v1893_v54 }
 0x207   :  { %v1871_v58 = vmax.f32 %v1849_v44, %v1850_v19  ;;  %v1852_v60 = vmax.f32 %v1820_v23, 0.0  ;;  %v3938_v46 = vadd.f32 %v5419_v25, %v1415_v34  ;;  %v1417_v31 = vpop.f32.mrb[58].mxu0 }
 0x208   :  { %1993 = vst [vmem:[#allocation3 + $0x48] ss:$-4 sps:$4 sm:$0xff] %v1990_v22   ;;  %v1777_v48 = vmax.f32 %v5521_v13, %v3937_v24  ;;  %v3939_v51 = vadd.f32 %v5421_v63, %v1417_v31  ;;  %v1419_v45 = vpop.f32.mrb[59].mxu0  ;;  %vm1925_vm7 = vcmp.lt.s32.totalorder %v1909_v41, 15 }
 0x209   :  { %v1872_v17 = vmax.f32 %v1851_v42, %v1852_v60  ;;  %v1778_v21 = vmax.f32 %v5524_v15, %v3938_v46  ;;  %v3940_v30 = vadd.f32 %v5423_v12, %v1419_v45 }
 0x20a   :  { %v1821_v4 = vadd.f32 %v5578_v10, %v1777_v48  ;;  %v1779_v8 = vmax.f32 %v5527_v49, %v3939_v51 }
 0x20b   :  { %v1937_v25 = vsel %vm1921_vm5, %v1872_v17, 0.0  ;;  %v1822_v56 = vadd.f32 %v5583_v53, %v1778_v21  ;;  %v1780_v37 = vmax.f32 %v5530_v9, %v3940_v30  ;;  %v6085_v30 = vld [vmem:[#allocation6_spill] sm:$0xff] }
 0x20c   :  { %v1947_v13 = vpack.c.bf16 %v1937_v25, %v1871_v58  ;;  %v1853_v1 = vmax.f32 %v1821_v4, 0.0  ;;  %v1823_v63 = vadd.f32 %v5578_v10, %v1779_v8 }
 0x20d   :  { %v1854_v6 = vmax.f32 %v1822_v56, 0.0  ;;  %v1824_v29 = vadd.f32 %v5583_v53, %v1780_v37  ;;  %v1423_v15 = vpop.f32.mrb[60].mxu0 }
 0x20e   :  { %v1996_v11 = vrot.slane %v1947_v13, 4  ;;  %v1855_v12 = vmax.f32 %v1823_v63, 0.0  ;;  %v3941_v35 = vadd.f32 %v6081_v18, %v1423_v15  ;;  %v1425_v59 = vpop.f32.mrb[61].mxu0 }
 0x20f   :  { %v1873_v49 = vmax.f32 %v1853_v1, %v1854_v6  ;;  %v1856_v61 = vmax.f32 %v1824_v29, 0.0  ;;  %v3942_v3 = vadd.f32 %v6082_v2, %v1425_v59  ;;  %v1427_v36 = vpop.f32.mrb[62].mxu0  ;;  %v6086_v29 = vld [vmem:[#allocation8_spill] sm:$0xff]  ;;  %v6088_v2 = vld [vmem:[#allocation11_spill] sm:$0xff] }
 0x210   :  { %1999 = vst [vmem:[#allocation3 + $0x58] ss:$-4 sps:$4 sm:$0xff] %v1996_v11   ;;  %v1781_v9 = vmax.f32 %v5533_v52, %v3941_v35  ;;  %v3943_v20 = vadd.f32 %v6083_v43, %v1427_v36  ;;  %v1429_v16 = vpop.f32.mrb[63].mxu0  ;;  %v6087_v35 = vld [vmem:[#allocation10_spill] sm:$0xff] }
 0x211   :  { %v1874_v40 = vmax.f32 %v1855_v12, %v1856_v61  ;;  %v1782_v39 = vmax.f32 %v5536_v55, %v3942_v3  ;;  %v3944_v14 = vadd.f32 %v6084_v38, %v1429_v16  ;;  %v1881_v12 = vadd.s32 24, %v5559_v47 }
 0x212   :  { %v1825_v50 = vadd.f32 %v5578_v10, %v1781_v9  ;;  %v1783_v7 = vmax.f32 %v5539_v57, %v3943_v20  ;;  %v1879_v57 = vadd.s32 8, %v5559_v47  ;;  %v6089_v20 = vld [vmem:[#allocation12_spill] sm:$0xff] }
 0x213   :  { %v1939_v44 = vsel %vm1923_vm6, %v1874_v40, 0.0  ;;  %v1826_v33 = vadd.f32 %v5583_v53, %v1782_v39  ;;  %v1784_v32 = vmax.f32 %v5542_v62, %v3944_v14  ;;  %v1897_v38 = vand.u32 15, %v1881_v12  ;;  %v4338_v12 = vld [vmem:[%s6041_s3 + $0x124] ss:$8 sps:$4 sm:$0xff]  }
 0x214   :  { %v1948_v52 = vpack.c.bf16 %v1939_v44, %v1873_v49  ;;  %v1857_v19 = vmax.f32 %v1825_v50, 0.0  ;;  %v1827_v23 = vadd.f32 %v5578_v10, %v1783_v7  ;;  %v1895_v25 = vand.u32 15, %v1879_v57 }
 0x215   :  { %v1858_v22 = vmax.f32 %v1826_v33, 0.0  ;;  %v1828_v42 = vadd.f32 %v5583_v53, %v1784_v32  ;;  %v1466_v55 = vpop.f32.mrb[0].mxu0  ;;  %vm1913_vm9 = vcmp.lt.s32.totalorder %v1897_v38, 15 }
 0x216   :  { %v2002_v24 = vrot.slane %v1948_v52, 4  ;;  %v1859_v34 = vmax.f32 %v1827_v23, 0.0  ;;  %v1753_v58 = vmax.f32 %v1466_v55, %v5545_v27  ;;  %v1468_v60 = vpop.f32.mrb[1].mxu0  ;;  %vm1911_vm8 = vcmp.lt.s32.totalorder %v1895_v25, 15 }
 0x217   :  { %v1875_v46 = vmax.f32 %v1857_v19, %v1858_v22  ;;  %v1860_v31 = vmax.f32 %v1828_v42, 0.0  ;;  %v1754_v62 = vmax.f32 %v1468_v60, %v5548_v0  ;;  %v1470_v48 = vpop.f32.mrb[2].mxu0 }
 0x218   :  { %2005 = vst [vmem:[#allocation3 + $0x68] ss:$-4 sps:$4 sm:$0xff] %v2002_v24   ;;  %v1797_v51 = vadd.f32 %v5578_v10, %v1753_v58  ;;  %v1755_v45 = vmax.f32 %v1470_v48, %v5551_v5  ;;  %v1472_v28 = vpop.f32.mrb[3].mxu0 }
 0x219   :  { %v1876_v17 = vmax.f32 %v1859_v34, %v1860_v31  ;;  %v1798_v21 = vadd.f32 %v5583_v53, %v1754_v62  ;;  %v1756_v27 = vmax.f32 %v1472_v28, %v6085_v30  ;;  %v4330_v28 = vld [vmem:[%s6041_s3 + $0x100] ss:$8 sps:$4 sm:$0xff]  }
 0x21a   :  { %v1829_v4 = vmax.f32 %v1797_v51, 0.0  ;;  %v1799_v8 = vadd.f32 %v5578_v10, %v1755_v45 }
 0x21b   :  { %v1941_v56 = vsel %vm1925_vm7, %v1876_v17, 0.0  ;;  %v1830_v37 = vmax.f32 %v1798_v21, 0.0  ;;  %v1800_v0 = vadd.f32 %v5583_v53, %v1756_v27  ;;  %v4335_v17 = vld [vmem:[%s6041_s3 + $0x114] ss:$8 sps:$4 sm:$0xff]   ;;  %v2017_v21 = vld [vmem:[#allocation3 + $0x20] sm:$0xf8] }
 0x21c   :  { %v1949_v13 = vpack.c.bf16 %v1941_v56, %v1875_v46  ;;  %v1831_v1 = vmax.f32 %v1799_v8, 0.0  ;;  %v4333_v8 = vld [vmem:[%s6041_s3 + $0x110] ss:$8 sps:$4 sm:$0xff]  }
 0x21d   :  { %v1861_v63 = vmax.f32 %v1829_v4, %v1830_v37  ;;  %v1832_v26 = vmax.f32 %v1800_v0, 0.0  ;;  %v1476_v6 = vpop.f32.mrb[4].mxu0 }
 0x21e   :  { %v2008_v5 = vrot.slane %v1949_v13, 4  ;;  %v1757_v15 = vmax.f32 %v1476_v6, %v6086_v29  ;;  %v1478_v11 = vpop.f32.mrb[5].mxu0  ;;  %v5696_v6 = vld [vmem:[#allocation3 + $0x20] sm:$0xf0] }
 0x21f   :  { %v1862_v18 = vmax.f32 %v1831_v1, %v1832_v26  ;;  %v1758_v59 = vmax.f32 %v1478_v11, %v6087_v35  ;;  %v1480_v49 = vpop.f32.mrb[6].mxu0  ;;  %v2018_v1 = vld [vmem:[#allocation3 + $0x28] sm:$0xf] }
 0x220   :  { %2011 = vst [vmem:[#allocation3 + $0x78] ss:$-4 sps:$4 sm:$0xff] %v2008_v5   ;;  %v1801_v61 = vadd.f32 %v5578_v10, %v1757_v15  ;;  %v1759_v3 = vmax.f32 %v1480_v49, %v6088_v2  ;;  %v1482_v36 = vpop.f32.mrb[7].mxu0  ;;  %v2067_v5 = vshrl.u32 %v2017_v21, 16  ;;  %v2075_v49 = vshrl.u32 %v2018_v1, 16 }
 0x221   :  { %v1927_v9 = vsel %vm1911_vm8, %v1862_v18, 0.0  ;;  %v1802_v43 = vadd.f32 %v5583_v53, %v1758_v59  ;;  %v1760_v16 = vmax.f32 %v1482_v36, %v6089_v20  ;;  %v2070_v18 = vshll.u32 %v2017_v21, 16  ;;  %v4341_v20 = vld [vmem:[%s6041_s3 + $0x134] ss:$8 sps:$4 sm:$0xff]  }
 0x222   :  { %v1942_v54 = vpack.c.bf16 %v1927_v9, %v1861_v63  ;;  %v1833_v40 = vmax.f32 %v1801_v61, 0.0  ;;  %v1803_v39 = vadd.f32 %v5578_v10, %v1759_v3  ;;  %v2078_v61 = vshll.u32 %v2018_v1, 16 }
 0x223   :  { %v1834_v14 = vmax.f32 %v1802_v43, 0.0  ;;  %v1804_v50 = vadd.f32 %v5583_v53, %v1760_v16  ;;  %v2197_v3 = vrot.slane %v5696_v6, 4  ;;  %v2198_v36 = vrot.slane %v2018_v1, 4  ;;  %v4336_v43 = vld [vmem:[%s6041_s3 + $0x120] ss:$8 sps:$4 sm:$0xff]  }
 0x224   :  { %v1967_v7 = vrot.slane %v1942_v54, 4  ;;  %v1835_v44 = vmax.f32 %v1803_v39, 0.0  ;;  %v2069_v16 = vrot.slane %v2067_v5, 3  ;;  %v2077_v39 = vrot.slane %v2075_v49, 3  ;;  %v4353_v1 = vld [vmem:[%s6041_s3 + $0x174] ss:$8 sps:$4 sm:$0xff]  }
 0x225   :  { %v1863_v33 = vmax.f32 %v1833_v40, %v1834_v14  ;;  %v1836_v32 = vmax.f32 %v1804_v50, 0.0  ;;  %v2072_v40 = vrot.slane %v2070_v18, 4  ;;  %v2080_v38 = vrot.slane %v2078_v61, 4  ;;  %v2019_v14 = vld [vmem:[#allocation3 + $0x30] sm:$0xf8] }
 0x226   :  { %1969 = vst [vmem:[#allocation3 + $0x8] ss:$-4 sps:$4 sm:$0xff] %v1967_v7   ;;  %v2199_v50 = vsel %vm2184_vm10, %v2197_v3, %v2198_v36  ;;  %v2020_v7 = vld [vmem:[#allocation3 + $0x38] sm:$0xf]  ;;  %v2023_v18 = vld [vmem:[#allocation3 + $0x50] sm:$0xf8] }
 0x227   :  { %v1864_v52 = vmax.f32 %v1835_v44, %v1836_v32  ;;  %v4339_v44 = vld [vmem:[%s6041_s3 + $0x130] ss:$8 sps:$4 sm:$0xff]   ;;  %v4344_v32 = vld [vmem:[%s6041_s3 + $0x144] ss:$8 sps:$4 sm:$0xff]   ;;  %v2121_v3 = vshrl.u32 %v2023_v18, 16  ;;  %v2124_v36 = vshll.u32 %v2023_v18, 16 }
 0x229   :  { %v1929_v19 = vsel %vm1913_vm9, %v1864_v52, 0.0  ;;  %v2085_v52 = vshrl.u32 %v2019_v14, 16 }
 0x22a   :  { %v1943_v23 = vpack.c.bf16 %v1929_v19, %v1863_v33  ;;  %v5714_v33 = vld [vmem:[#allocation3 + $0x30] sm:$0xf0]  ;;  %v2088_v19 = vshll.u32 %v2019_v14, 16  ;;  %v2126_v14 = vrot.slane %v2124_v36, 4 }
 0x22c   :  { %v1972_v41 = vrot.slane %v1943_v23, 4  ;;  %v2073_v23 = vor.u32 %v2072_v40, %v2069_v16 }
 0x22d   :  { %v2014_v22 = vld [vmem:[#allocation3 + $0x8] sm:$0xf]  ;;  %v5679_v42 = vld [vmem:[#allocation3] sm:$0xf0] }
 0x22e   :  { %v2013_v55 = vld [vmem:[#allocation3] sm:$0xf8]  ;;  %1975 = vst [vmem:[#allocation3 + $0x18] ss:$-4 sps:$4 sm:$0xff] %v1972_v41   ;;  %v2039_v10 = vshrl.u32 %v2014_v22, 16  ;;  %v2042_v24 = vshll.u32 %v2014_v22, 16  ;;  %v2081_v41 = vor.u32 %v2080_v38, %v2077_v39 }
 0x22f   :  { %v2185_v34 = vrot.slane %v5679_v42, 4  ;;  %v2186_v53 = vrot.slane %v2014_v22, 4  ;;  %v2031_v58 = vshrl.u32 %v2013_v55, 16  ;;  %v2034_v60 = vshll.u32 %v2013_v55, 16  ;;  %v4359_v39 = vld [vmem:[%s6041_s3 + $0x194] ss:$8 sps:$4 sm:$0xff]  }
 0x230   :  { %v2041_v57 = vrot.slane %v2039_v10, 3  ;;  %v2044_v46 = vrot.slane %v2042_v24, 4  ;;  %v2093_v22 = vshrl.u32 %v2020_v7, 16  ;;  %v2096_v55 = vshll.u32 %v2020_v7, 16  ;;  %v5799_v36 = vld [vmem:[#allocation3] sm:$0xe0] }
 0x231   :  { %v2187_v31 = vsel %vm2184_vm10, %v2185_v34, %v2186_v53  ;;  %v2033_v62 = vrot.slane %v2031_v58, 3  ;;  %v2036_v48 = vrot.slane %v2034_v60, 4  ;;  %v2203_v10 = vrot.slane %v5714_v33, 4  ;;  %v4342_v34 = vld [vmem:[%s6041_s3 + $0x140] ss:$8 sps:$4 sm:$0xff]  }
 0x232   :  { %3118 = vmatprep.mubr.bf16.mxu1 %v2187_v31  ;;  %v2045_v51 = vor.u32 %v2044_v46, %v2041_v57  ;;  %v2204_v24 = vrot.slane %v2020_v7, 4  ;;  %v4347_v53 = vld [vmem:[%s6041_s3 + $0x154] ss:$8 sps:$4 sm:$0xff]   ;;  %v2087_v58 = vrot.slane %v2085_v52, 3  ;;  %v2090_v60 = vrot.slane %v2088_v19, 4 }
 0x233   :  { %v2037_v45 = vor.u32 %v2036_v48, %v2033_v62  ;;  %v2082_v57 = vsel %vm2029_vm11, %v2073_v23, %v2081_v41  ;;  %v2095_v46 = vrot.slane %v2093_v22, 3  ;;  %v2098_v31 = vrot.slane %v2096_v55, 4  ;;  %v2022_v62 = vld [vmem:[#allocation3 + $0x48] sm:$0xf]  ;;  %v2021_v48 = vld [vmem:[#allocation3 + $0x40] sm:$0xf8] }
 0x234   :  { %v2103_v21 = vshrl.u32 %v2021_v48, 16  ;;  %v2123_v38 = vrot.slane %v2121_v3, 3  ;;  %v2026_v52 = vld [vmem:[#allocation3 + $0x68] sm:$0xf]  ;;  %v4357_v19 = vld [vmem:[%s6041_s3 + $0x190] ss:$8 sps:$4 sm:$0xff]  }
 0x235   :  { %v2046_v30 = vsel %vm2029_vm11, %v2037_v45, %v2045_v51  ;;  %v2016_v27 = vld [vmem:[#allocation3 + $0x18] sm:$0xf]  ;;  %v5690_v4 = vld [vmem:[#allocation3 + $0x10] sm:$0xf0]  ;;  %v2205_v51 = vsel %vm2184_vm10, %v2203_v10, %v2204_v24  ;;  %v5765_v23 = vld [vmem:[#allocation3 + $0x60] sm:$0xf0] }
 0x236   :  { %v2015_v25 = vld [vmem:[#allocation3 + $0x10] sm:$0xf8]  ;;  %3119 = vmatmul.mubr.bf16.vlgmr.msra.gmra.mrb[56].mxu1 %v2046_v30  ;;  %v2191_v56 = vrot.slane %v5690_v4, 4  ;;  %v2192_v37 = vrot.slane %v2016_v27, 4  ;;  %v2057_v63 = vshrl.u32 %v2016_v27, 16  ;;  %v2060_v26 = vshll.u32 %v2016_v27, 16 }
 0x237   :  { %v2049_v0 = vshrl.u32 %v2015_v25, 16  ;;  %v2052_v13 = vshll.u32 %v2015_v25, 16  ;;  %3200 = vmatpush1.bf16.msra.mxu1 %v4330_v28  ;;  %v4345_v45 = vld [vmem:[%s6041_s3 + $0x150] ss:$8 sps:$4 sm:$0xff]   ;;  %v5731_v28 = vld [vmem:[#allocation3 + $0x40] sm:$0xf0]  ;;  %v2091_v25 = vor.u32 %v2090_v60, %v2087_v58  ;;  %v2127_v10 = vor.u32 %v2126_v14, %v2123_v38 }
 0x238   :  { %v2193_v29 = vsel %vm2184_vm10, %v2191_v56, %v2192_v37  ;;  %3201 = vmatprep.subr.bf16.mxu1 %v4335_v17  ;;  %v2059_v35 = vrot.slane %v2057_v63, 3  ;;  %v2062_v59 = vrot.slane %v2060_v26, 4  ;;  %v4350_v17 = vld [vmem:[%s6041_s3 + $0x164] ss:$8 sps:$4 sm:$0xff]   ;;  %v2106_v30 = vshll.u32 %v2021_v48, 16 }
 0x239   :  { %v2051_v15 = vrot.slane %v2049_v0, 3  ;;  %v2054_v11 = vrot.slane %v2052_v13, 4  ;;  %3128 = vmatprep.mubr.bf16.mxu1 %v2193_v29  ;;  %v2111_v27 = vshrl.u32 %v2022_v62, 16  ;;  %v2099_v56 = vor.u32 %v2098_v31, %v2095_v46  ;;  %v4348_v13 = vld [vmem:[%s6041_s3 + $0x160] ss:$8 sps:$4 sm:$0xff]  }
 0x23a   :  { %v2063_v9 = vor.u32 %v2062_v59, %v2059_v35  ;;  %v2209_v37 = vrot.slane %v5731_v28, 4  ;;  %v2210_v0 = vrot.slane %v2022_v62, 4  ;;  %v2105_v63 = vrot.slane %v2103_v21, 3  ;;  %v4351_v35 = vld [vmem:[%s6041_s3 + $0x170] ss:$8 sps:$4 sm:$0xff]  }
 0x23b   :  { %v2055_v2 = vor.u32 %v2054_v11, %v2051_v15  ;;  %3202 = vmatpush1.bf16.msra.mxu1 %v4333_v8  ;;  %v2114_v8 = vshll.u32 %v2022_v62, 16  ;;  %v2108_v26 = vrot.slane %v2106_v30, 4  ;;  %v2113_v5 = vrot.slane %v2111_v27, 3  ;;  %v5748_v59 = vld [vmem:[#allocation3 + $0x50] sm:$0xf0] }
 0x23c   :  { %3203 = vmatprep.subr.bf16.mxu1 %v4338_v12  ;;  %v2100_v15 = vsel %vm2029_vm11, %v2091_v25, %v2099_v56  ;;  %v2211_v11 = vsel %vm2184_vm10, %v2209_v37, %v2210_v0  ;;  %v2024_v12 = vld [vmem:[#allocation3 + $0x58] sm:$0xf]  ;;  %v4362_v41 = vld [vmem:[%s6041_s3 + $0x1a4] ss:$8 sps:$4 sm:$0xff]   ;;  %v2221_v58 = vrot.slane %v5765_v23, 4  ;;  %v2222_v60 = vrot.slane %v2026_v52, 4 }
 0x23d   :  { %v2064_v54 = vsel %vm2029_vm11, %v2055_v2, %v2063_v9  ;;  %v2116_v29 = vrot.slane %v2114_v8, 4  ;;  %v2109_v49 = vor.u32 %v2108_v26, %v2105_v63  ;;  %v4356_v2 = vld [vmem:[%s6041_s3 + $0x184] ss:$8 sps:$4 sm:$0xff]   ;;  %v2129_v9 = vshrl.u32 %v2024_v12, 16  ;;  %v4365_v46 = vld [vmem:[%s6041_s3 + $0x1b4] ss:$8 sps:$4 sm:$0xff]  }
 0x23e   :  { %3129 = vmatmul.mubr.bf16.gmra.mrb[60].mxu1 %v2064_v54  ;;  %v2216_v16 = vrot.slane %v2024_v12, 4  ;;  %v4354_v54 = vld [vmem:[%s6041_s3 + $0x180] ss:$8 sps:$4 sm:$0xff]   ;;  %v2223_v21 = vsel %vm2184_vm10, %v2221_v58, %v2222_v60  ;;  %v2028_v30 = vld [vmem:[#allocation3 + $0x78] sm:$0xf]  ;;  %v2395_v38 = vrot.slane %v5799_v36, 5 }
 0x23f   :  { %3138 = vmatprep.mubr.bf16.mxu1 %v2199_v50  ;;  %3204 = vmatpush1.bf16.msra.mxu1 %v4336_v43  ;;  %v2117_v61 = vor.u32 %v2116_v29, %v2113_v5  ;;  %v2132_v43 = vshll.u32 %v2024_v12, 16  ;;  %v2131_v50 = vrot.slane %v2129_v9, 3  ;;  %v4363_v27 = vld [vmem:[%s6041_s3 + $0x1b0] ss:$8 sps:$4 sm:$0xff]   ;;  %v5782_v8 = vld [vmem:[#allocation3 + $0x70] sm:$0xf0] }
 0x240   :  { %3205 = vmatprep.subr.bf16.mxu1 %v4341_v20  ;;  %v2215_v20 = vrot.slane %v5748_v59, 4  ;;  %v4368_v56 = vld [vmem:[%s6041_s3 + $0x1c4] ss:$8 sps:$4 sm:$0xff]   ;;  %v2168_v63 = vshll.u32 %v2028_v30, 16  ;;  %v2227_v26 = vrot.slane %v5782_v8, 4  ;;  %v2228_v5 = vrot.slane %v2028_v30, 4 }
 0x241   :  { %v2118_v40 = vsel %vm2029_vm11, %v2109_v49, %v2117_v61  ;;  %v2134_v7 = vrot.slane %v2132_v43, 4  ;;  %v4366_v29 = vld [vmem:[%s6041_s3 + $0x1c0] ss:$8 sps:$4 sm:$0xff]   ;;  %v4369_v3 = vld [vmem:[%s6041_s3 + $0x1d0] ss:$8 sps:$4 sm:$0xff]   ;;  %v2241_v9 = vshrl.u32 %v5679_v42, 16 }
 0x242   :  { %v2170_v49 = vrot.slane %v2168_v63, 4  ;;  %v2231_v61 = vld [vmem:[#allocation3 + $0x8] sm:$0x1f]  ;;  %v2244_v43 = vshll.u32 %v5679_v42, 16  ;;  %v2259_v58 = vshrl.u32 %v5690_v4, 16  ;;  %v2262_v60 = vshll.u32 %v5690_v4, 16 }
 0x243   :  { %3206 = vmatpush1.bf16.msra.mxu1 %v4339_v44  ;;  %v2025_v44 = vld [vmem:[#allocation3 + $0x60] sm:$0xf8]  ;;  %v2135_v24 = vor.u32 %v2134_v7, %v2131_v50  ;;  %v2396_v14 = vrot.slane %v2231_v61, 5  ;;  %v2243_v7 = vrot.slane %v2241_v9, 4  ;;  %v2234_v9 = vld [vmem:[#allocation3 + $0x38] sm:$0x1f] }
 0x244   :  { %3207 = vmatprep.subr.bf16.mxu1 %v4344_v32  ;;  %v2217_v32 = vsel %vm2184_vm10, %v2215_v20, %v2216_v16  ;;  %v2139_v22 = vshrl.u32 %v2025_v44, 16  ;;  %v2142_v55 = vshll.u32 %v2025_v44, 16  ;;  %v4374_v20 = vld [vmem:[%s6041_s3 + $0x1e4] ss:$8 sps:$4 sm:$0xff]   ;;  %v2249_v16 = vshrl.u32 %v2231_v61, 16 }
 0x245   :  { %v2136_v48 = vsel %vm2029_vm11, %v2127_v10, %v2135_v24  ;;  %v4372_v50 = vld [vmem:[%s6041_s3 + $0x1e0] ss:$8 sps:$4 sm:$0xff]   ;;  %v2246_v44 = vrot.slane %v2244_v43, 5  ;;  %v5818_v10 = vld [vmem:[#allocation3 + $0x10] sm:$0xe0]  ;;  %v2264_v4 = vrot.slane %v2262_v60, 5 }
 0x246   :  { %3139 = vmatmul.mubr.bf16.gmra.mrb[64].mxu1 %v2082_v57  ;;  %v4360_v57 = vld [vmem:[%s6041_s3 + $0x1a0] ss:$8 sps:$4 sm:$0xff]   ;;  %v2141_v31 = vrot.slane %v2139_v22, 3  ;;  %v2144_v62 = vrot.slane %v2142_v55, 4  ;;  %v2251_v42 = vrot.slane %v2249_v16, 4  ;;  %v2316_v60 = vshll.u32 %v5731_v28, 16 }
 0x247   :  { %3148 = vmatprep.mubr.bf16.mxu1 %v2205_v51  ;;  %3208 = vmatpush1.bf16.msra.mxu1 %v4342_v34  ;;  %v2147_v34 = vshrl.u32 %v2026_v52, 16  ;;  %v2232_v22 = vld [vmem:[#allocation3 + $0x18] sm:$0x1f]  ;;  %v2247_v24 = vor.u32 %v2246_v44, %v2243_v7  ;;  %v5853_v43 = vld [vmem:[#allocation3 + $0x30] sm:$0xe0]  ;;  %v2414_v44 = vrot.slane %v2234_v9, 5 }
 0x248   :  { %3209 = vmatprep.subr.bf16.mxu1 %v4347_v53  ;;  %v2150_v53 = vshll.u32 %v2026_v52, 16  ;;  %v2145_v25 = vor.u32 %v2144_v62, %v2141_v31  ;;  %v4377_v52 = vld [vmem:[%s6041_s3 + $0x1f4] ss:$8 sps:$4 sm:$0xff]   ;;  %v4375_v55 = vld [vmem:[%s6041_s3 + $0x1f0] ss:$8 sps:$4 sm:$0xff]   ;;  %v2401_v31 = vrot.slane %v5818_v10, 5 }
 0x249   :  { %v2149_v51 = vrot.slane %v2147_v34, 3  ;;  %v2402_v62 = vrot.slane %v2232_v22, 5  ;;  %v2413_v7 = vrot.slane %v5853_v43, 5 }
 0x24b   :  { %3210 = vmatpush1.bf16.msra.mxu1 %v4345_v45  ;;  %v2152_v45 = vrot.slane %v2150_v53, 4  ;;  %v4380_v53 = vld [vmem:[%s6041_s3 + $0x204] ss:$8 sps:$4 sm:$0xff]  }
 0x24c   :  { %3211 = vmatprep.subr.bf16.mxu1 %v4350_v17  ;;  %v2027_v17 = vld [vmem:[#allocation3 + $0x70] sm:$0xf8] }
 0x24d   :  { %v2157_v37 = vshrl.u32 %v2027_v17, 16  ;;  %v2153_v0 = vor.u32 %v2152_v45, %v2149_v51  ;;  %v4383_v45 = vld [vmem:[%s6041_s3 + $0x214] ss:$8 sps:$4 sm:$0xff]  }
 0x24e   :  { %3149 = vmatmul.mubr.bf16.gmra.mrb[68].mxu1 %v2100_v15  ;;  %v4371_v15 = vld [vmem:[%s6041_s3 + $0x1d4] ss:$8 sps:$4 sm:$0xff]  }
 0x24f   :  { %3158 = vmatprep.mubr.bf16.mxu1 %v2211_v11  ;;  %3212 = vmatpush1.bf16.msra.mxu1 %v4348_v13  ;;  %v2160_v13 = vshll.u32 %v2027_v17, 16  ;;  %v2159_v11 = vrot.slane %v2157_v37, 3  ;;  %v2154_v12 = vsel %vm2029_vm11, %v2145_v25, %v2153_v0  ;;  %v2261_v17 = vrot.slane %v2259_v58, 4  ;;  %v2233_v25 = vld [vmem:[#allocation3 + $0x28] sm:$0x1f] }
 0x250   :  { %3213 = vmatprep.subr.bf16.mxu1 %v4353_v1  ;;  %v2165_v1 = vshrl.u32 %v2028_v30, 16  ;;  %v5837_v37 = vld [vmem:[#allocation3 + $0x20] sm:$0xe0]  ;;  %v2277_v0 = vshrl.u32 %v5696_v6, 16  ;;  %v2313_v58 = vshrl.u32 %v5731_v28, 16 }
 0x251   :  { %v2162_v18 = vrot.slane %v2160_v13, 4  ;;  %v2280_v13 = vshll.u32 %v5696_v6, 16  ;;  %v2265_v63 = vor.u32 %v2264_v4, %v2261_v17  ;;  %v4389_v6 = vld [vmem:[%s6041_s3 + $0x234] ss:$8 sps:$4 sm:$0xff]   ;;  %v4396_v17 = vld [vmem:[%s6041_s3 + $0x260] ss:$8 sps:$4 sm:$0xff]  }
 0x252   :  { %v2315_v4 = vrot.slane %v2313_v58, 4  ;;  %v4401_v28 = vld [vmem:[%s6041_s3 + $0x274] ss:$8 sps:$4 sm:$0xff]  }
 0x253   :  { %3214 = vmatpush1.bf16.msra.mxu1 %v4351_v35  ;;  %v2167_v35 = vrot.slane %v2165_v1, 3  ;;  %v4386_v1 = vld [vmem:[%s6041_s3 + $0x224] ss:$8 sps:$4 sm:$0xff]  }
 0x254   :  { %3215 = vmatprep.subr.bf16.mxu1 %v4356_v2  ;;  %v2229_v2 = vsel %vm2184_vm10, %v2227_v26, %v2228_v5  ;;  %v2285_v5 = vshrl.u32 %v2233_v25, 16 }
 0x256   :  { %3159 = vmatmul.mubr.bf16.gmra.mrb[72].mxu1 %v2118_v40  ;;  %v2163_v40 = vor.u32 %v2162_v18, %v2159_v11  ;;  %v2408_v11 = vrot.slane %v2233_v25, 5  ;;  %v2279_v18 = vrot.slane %v2277_v0, 4  ;;  %v2236_v0 = vld [vmem:[#allocation3 + $0x58] sm:$0x1f] }
 0x257   :  { %3168 = vmatprep.mubr.bf16.mxu1 %v2217_v32  ;;  %3216 = vmatpush1.bf16.msra.mxu1 %v4354_v54  ;;  %v2252_v54 = vshll.u32 %v2231_v61, 16  ;;  %v2287_v61 = vrot.slane %v2285_v5, 4 }
 0x258   :  { %3217 = vmatprep.subr.bf16.mxu1 %v4359_v39  ;;  %v2171_v39 = vor.u32 %v2170_v49, %v2167_v35  ;;  %v2282_v35 = vrot.slane %v2280_v13, 5  ;;  %v5891_v13 = vld [vmem:[#allocation3 + $0x50] sm:$0xe0] }
 0x259   :  { %v2254_v32 = vrot.slane %v2252_v54, 5  ;;  %v2295_v54 = vshrl.u32 %v5714_v33, 16 }
 0x25a   :  { %v2283_v16 = vor.u32 %v2282_v35, %v2279_v18  ;;  %v2426_v18 = vrot.slane %v2236_v0, 5 }
 0x25b   :  { %3218 = vmatpush1.bf16.msra.mxu1 %v4357_v19  ;;  %v2172_v19 = vsel %vm2029_vm11, %v2163_v40, %v2171_v39  ;;  %v2255_v34 = vor.u32 %v2254_v32, %v2251_v42  ;;  %v4392_v40 = vld [vmem:[%s6041_s3 + $0x244] ss:$8 sps:$4 sm:$0xff]   ;;  %v4390_v42 = vld [vmem:[%s6041_s3 + $0x240] ss:$8 sps:$4 sm:$0xff]   ;;  %v2297_v32 = vrot.slane %v2295_v54, 4 }
 0x25c   :  { %3219 = vmatprep.subr.bf16.mxu1 %v4362_v41  ;;  %v2397_v41 = vsel %vm2394_vm12, %v2395_v38, %v2396_v14  ;;  %v2298_v38 = vshll.u32 %v5714_v33, 16  ;;  %v2303_v14 = vshrl.u32 %v2234_v9, 16 }
 0x25d   :  { %v2256_v51 = vsel %vm2239_vm13, %v2247_v24, %v2255_v34  ;;  %v2235_v24 = vld [vmem:[#allocation3 + $0x48] sm:$0x1f]  ;;  %v5872_v34 = vld [vmem:[#allocation3 + $0x40] sm:$0xe0] }
 0x25e   :  { %3169 = vmatmul.mubr.bf16.gmra.mrb[76].mxu1 %v2136_v48  ;;  %v4378_v48 = vld [vmem:[%s6041_s3 + $0x200] ss:$8 sps:$4 sm:$0xff]   ;;  %v2305_v33 = vrot.slane %v2303_v14, 4 }
 0x25f   :  { %3178 = vmatprep.mubr.bf16.mxu1 %v2223_v21  ;;  %3220 = vmatpush1.bf16.msra.mxu1 %v4360_v57  ;;  %v2267_v57 = vshrl.u32 %v2232_v22, 16 }
 0x260   :  { %3221 = vmatprep.subr.bf16.mxu1 %v4365_v46  ;;  %v2270_v46 = vshll.u32 %v2232_v22, 16 }
 0x261   :  { %v2269_v21 = vrot.slane %v2267_v57, 4  ;;  %v4398_v57 = vld [vmem:[%s6041_s3 + $0x264] ss:$8 sps:$4 sm:$0xff]  }
 0x262   :  { %v2272_v30 = vrot.slane %v2270_v46, 5 }
 0x263   :  { %3222 = vmatpush1.bf16.msra.mxu1 %v4363_v27  ;;  %v2403_v27 = vsel %vm2394_vm12, %v2401_v31, %v2402_v62  ;;  %v2321_v62 = vshrl.u32 %v2235_v24, 16 }
 0x264   :  { %3223 = vmatprep.subr.bf16.mxu1 %v4368_v56  ;;  %v4381_v56 = vld [vmem:[%s6041_s3 + $0x210] ss:$8 sps:$4 sm:$0xff]   ;;  %v2273_v26 = vor.u32 %v2272_v30, %v2269_v21  ;;  %v2318_v21 = vrot.slane %v2316_v60, 5 }
 0x266   :  { %3179 = vmatmul.mubr.bf16.gmra.mrb[80].mxu1 %v2154_v12  ;;  %v4384_v12 = vld [vmem:[%s6041_s3 + $0x220] ss:$8 sps:$4 sm:$0xff]   ;;  %v2274_v49 = vsel %vm2239_vm13, %v2265_v63, %v2273_v26  ;;  %v2319_v63 = vor.u32 %v2318_v21, %v2315_v4  ;;  %v2331_v26 = vshrl.u32 %v5748_v59, 16  ;;  %v2451_v4 = vshrl.u32 %v5799_v36, 16 }
 0x267   :  { %3188 = vmatprep.mubr.bf16.mxu1 %v2229_v2  ;;  %3224 = vmatpush1.bf16.msra.mxu1 %v4366_v29  ;;  %v2288_v29 = vshll.u32 %v2233_v25, 16 }
 0x268   :  { %3225 = vmatprep.subr.bf16.mxu1 %v4371_v15  ;;  %v2407_v15 = vrot.slane %v5837_v37, 5  ;;  %v2333_v35 = vrot.slane %v2331_v26, 4  ;;  %v2442_v26 = vld [vmem:[#allocation3 + $0x18] sm:$0x3f] }
 0x269   :  { %v2290_v2 = vrot.slane %v2288_v29, 5  ;;  %v2334_v29 = vshll.u32 %v5748_v59, 16  ;;  %v2349_v59 = vshrl.u32 %v5765_v23, 16 }
 0x26b   :  { %3226 = vmatpush1.bf16.msra.mxu1 %v4369_v3  ;;  %v2409_v3 = vsel %vm2394_vm12, %v2407_v15, %v2408_v11  ;;  %v2291_v39 = vor.u32 %v2290_v2, %v2287_v61  ;;  %v2339_v15 = vshrl.u32 %v2236_v0, 16  ;;  %v2342_v11 = vshll.u32 %v2236_v0, 16 }
 0x26c   :  { %3227 = vmatprep.subr.bf16.mxu1 %v4374_v20  ;;  %v4387_v20 = vld [vmem:[%s6041_s3 + $0x230] ss:$8 sps:$4 sm:$0xff]  }
 0x26d   :  { %v2341_v61 = vrot.slane %v2339_v15, 4  ;;  %v2344_v2 = vrot.slane %v2342_v11, 5  ;;  %v2469_v15 = vshrl.u32 %v5818_v10, 16 }
 0x26e   :  { %3189 = vmatmul.mubr.bf16.gmra.mrb[84].mxu1 %v2172_v19  ;;  %v2292_v19 = vsel %vm2239_vm13, %v2283_v16, %v2291_v39  ;;  %v2352_v16 = vshll.u32 %v5765_v23, 16 }
 0x26f   :  { %3228 = vmatpush1.bf16.msra.mxu1 %v4372_v50  ;;  %3231 = vmatprep.mubr.bf16.mxu1 %v2397_v41  ;;  %v2306_v50 = vshll.u32 %v2234_v9, 16  ;;  %v2300_v41 = vrot.slane %v2298_v38, 5  ;;  %v2237_v9 = vld [vmem:[#allocation3 + $0x68] sm:$0x1f] }
 0x270   :  { %3229 = vmatprep.subr.bf16.mxu1 %v4377_v52  ;;  %v4395_v52 = vld [vmem:[%s6041_s3 + $0x254] ss:$8 sps:$4 sm:$0xff]   ;;  %v2357_v39 = vshrl.u32 %v2237_v9, 16  ;;  %v2360_v38 = vshll.u32 %v2237_v9, 16 }
 0x271   :  { %v2308_v22 = vrot.slane %v2306_v50, 5  ;;  %v2301_v46 = vor.u32 %v2300_v41, %v2297_v32  ;;  %v2432_v50 = vrot.slane %v2237_v9, 5  ;;  %v2238_v41 = vld [vmem:[#allocation3 + $0x78] sm:$0x1f]  ;;  %v2487_v9 = vshrl.u32 %v5837_v37, 16 }
 0x272   :  { %v2359_v32 = vrot.slane %v2357_v39, 4  ;;  %v2378_v58 = vshll.u32 %v2238_v41, 16 }
 0x273   :  { %3230 = vmatpush1.bf16.msra.mxu1 %v4375_v55  ;;  %v2415_v55 = vsel %vm2394_vm12, %v2413_v7, %v2414_v44  ;;  %v2309_v31 = vor.u32 %v2308_v22, %v2305_v33  ;;  %v2351_v7 = vrot.slane %v2349_v59, 4  ;;  %v2354_v44 = vrot.slane %v2352_v16, 5  ;;  %v5908_v33 = vld [vmem:[#allocation3 + $0x70] sm:$0xe0] }
 0x274   :  { %3312 = vmatprep.subr.bf16.mxu1 %v4380_v53  ;;  %v4393_v53 = vld [vmem:[%s6041_s3 + $0x250] ss:$8 sps:$4 sm:$0xff]   ;;  %v2367_v22 = vshrl.u32 %v5782_v8, 16  ;;  %v2437_v60 = vrot.slane %v5908_v33, 5  ;;  %v2490_v59 = vshll.u32 %v5837_v37, 16  ;;  %v2489_v39 = vrot.slane %v2487_v9, 5 }
 0x275   :  { %v2310_v30 = vsel %vm2239_vm13, %v2301_v46, %v2309_v31  ;;  %v2355_v23 = vor.u32 %v2354_v44, %v2351_v7  ;;  %v2444_v44 = vld [vmem:[#allocation3 + $0x38] sm:$0x3f]  ;;  %v2508_v37 = vshll.u32 %v5853_v43, 16  ;;  %v2577_v9 = vshrl.u32 %v5908_v33, 16 }
 0x276   :  { %3232 = vmatmul.mubr.bf16.vlgmr.msra.gmra.mrb[56].mxu1 %v2256_v51  ;;  %v2419_v51 = vrot.slane %v5872_v34, 5  ;;  %v2369_v46 = vrot.slane %v2367_v22, 4 }
 0x277   :  { %3241 = vmatprep.mubr.bf16.mxu1 %v2403_v27  ;;  %3313 = vmatpush1.bf16.msra.mxu1 %v4378_v48  ;;  %v2324_v48 = vshll.u32 %v2235_v24, 16  ;;  %v2323_v27 = vrot.slane %v2321_v62, 4 }
 0x278   :  { %3314 = vmatprep.subr.bf16.mxu1 %v4383_v45  ;;  %v2420_v45 = vrot.slane %v2235_v24, 5  ;;  %v2370_v24 = vshll.u32 %v5782_v8, 16  ;;  %v2454_v8 = vshll.u32 %v5799_v36, 16  ;;  %v2472_v36 = vshll.u32 %v5818_v10, 16 }
 0x279   :  { %v2326_v25 = vrot.slane %v2324_v48, 5 }
 0x27a   :  { %v2372_v62 = vrot.slane %v2370_v24, 5 }
 0x27b   :  { %3315 = vmatpush1.bf16.msra.mxu1 %v4381_v56  ;;  %v2421_v56 = vsel %vm2394_vm12, %v2419_v51, %v2420_v45  ;;  %v2327_v5 = vor.u32 %v2326_v25, %v2323_v27  ;;  %v2380_v51 = vrot.slane %v2378_v58, 5  ;;  %v2453_v25 = vrot.slane %v2451_v4, 5  ;;  %v2445_v58 = vld [vmem:[#allocation3 + $0x48] sm:$0x3f] }
 0x27c   :  { %3316 = vmatprep.subr.bf16.mxu1 %v4386_v1  ;;  %v4399_v1 = vld [vmem:[%s6041_s3 + $0x270] ss:$8 sps:$4 sm:$0xff]   ;;  %v2373_v21 = vor.u32 %v2372_v62, %v2369_v46  ;;  %v2531_v62 = vshrl.u32 %v2445_v58, 16 }
 0x27e   :  { %3242 = vmatmul.mubr.bf16.gmra.mrb[60].mxu1 %v2274_v49  ;;  %v2336_v49 = vrot.slane %v2334_v29, 5 }
 0x27f   :  { %3251 = vmatprep.mubr.bf16.mxu1 %v2409_v3  ;;  %3317 = vmatpush1.bf16.msra.mxu1 %v4384_v12  ;;  %v2425_v12 = vrot.slane %v5891_v13, 5 }
 0x280   :  { %3318 = vmatprep.subr.bf16.mxu1 %v4389_v6  ;;  %v2328_v6 = vsel %vm2239_vm13, %v2319_v63, %v2327_v5  ;;  %v2337_v54 = vor.u32 %v2336_v49, %v2333_v35  ;;  %v6090_v5 = vmov 0   ;;  %v2471_v35 = vrot.slane %v2469_v15, 5 }
 0x281   :  { %v2427_v3 = vsel %vm2394_vm12, %v2425_v12, %v2426_v18  ;;  %v2477_v12 = vshrl.u32 %v2442_v26, 16  ;;  %v2480_v18 = vshll.u32 %v2442_v26, 16  ;;  %v2474_v49 = vrot.slane %v2472_v36, 6 }
 0x283   :  { %3319 = vmatpush1.bf16.msra.mxu1 %v4387_v20  ;;  %v5901_v20 = vld [vmem:[#allocation3 + $0x60] sm:$0xe0]  ;;  %v2475_v16 = vor.u32 %v2474_v49, %v2471_v35 }
 0x284   :  { %3320 = vmatprep.subr.bf16.mxu1 %v4392_v40  ;;  %v2345_v40 = vor.u32 %v2344_v2, %v2341_v61  ;;  %v2431_v14 = vrot.slane %v5901_v20, 5  ;;  %v2479_v61 = vrot.slane %v2477_v12, 5  ;;  %v2482_v2 = vrot.slane %v2480_v18, 6 }
 0x285   :  { %v2559_v15 = vshrl.u32 %v5901_v20, 16 }
 0x286   :  { %3252 = vmatmul.mubr.bf16.gmra.mrb[64].mxu1 %v2292_v19  ;;  %v2433_v19 = vsel %vm2394_vm12, %v2431_v14, %v2432_v50 }
 0x287   :  { %3261 = vmatprep.mubr.bf16.mxu1 %v2415_v55  ;;  %3321 = vmatpush1.bf16.msra.mxu1 %v4390_v42  ;;  %v2346_v42 = vsel %vm2239_vm13, %v2337_v54, %v2345_v40  ;;  %v2483_v54 = vor.u32 %v2482_v2, %v2479_v61  ;;  %v2561_v35 = vrot.slane %v2559_v15, 5 }
 0x288   :  { %3322 = vmatprep.subr.bf16.mxu1 %v4395_v52  ;;  %v2362_v52 = vrot.slane %v2360_v38, 5  ;;  %v2492_v38 = vrot.slane %v2490_v59, 6  ;;  %v2580_v59 = vshll.u32 %v5908_v33, 16  ;;  %v2674_v33 = vld [vmem:[%s6043_s4] sm:$0x3] }
 0x289   :  { %v2484_v14 = vsel %vm2449_vm14, %v2475_v16, %v2483_v54 }
 0x28a   :  { %v2363_v55 = vor.u32 %v2362_v52, %v2359_v32  ;;  %v2505_v32 = vshrl.u32 %v5853_v43, 16  ;;  %v2534_v43 = vshll.u32 %v2445_v58, 16 }
 0x28b   :  { %3323 = vmatpush1.bf16.msra.mxu1 %v4393_v53  ;;  %v2375_v53 = vshrl.u32 %v2238_v41, 16 }
 0x28c   :  { %3324 = vmatprep.subr.bf16.mxu1 %v4398_v57  ;;  %v2438_v57 = vrot.slane %v2238_v41, 5  ;;  %v2364_v31 = vsel %vm2239_vm13, %v2355_v23, %v2363_v55  ;;  %v2516_v41 = vshll.u32 %v2444_v44, 16  ;;  %v2507_v23 = vrot.slane %v2505_v32, 5 }
 0x28d   :  { %v2377_v48 = vrot.slane %v2375_v53, 4  ;;  %v2510_v55 = vrot.slane %v2508_v37, 6  ;;  %v2536_v4 = vrot.slane %v2534_v43, 6  ;;  %v6091_v32 = vsub.s32 0, %v5559_v47 }
 0x28e   :  { %3262 = vmatmul.mubr.bf16.gmra.mrb[68].mxu1 %v2310_v30  ;;  %v2439_v45 = vsel %vm2394_vm12, %v2437_v60, %v2438_v57  ;;  %v2518_v53 = vrot.slane %v2516_v41, 6  ;;  %v2523_v60 = vshrl.u32 %v5872_v34, 16  ;;  %v2526_v57 = vshll.u32 %v5872_v34, 16 }
 0x28f   :  { %3271 = vmatprep.mubr.bf16.mxu1 %v2421_v56  ;;  %3325 = vmatpush1.bf16.msra.mxu1 %v4396_v17  ;;  %v2441_v17 = vld [vmem:[#allocation3 + $0x8] sm:$0x3f]  ;;  %v2456_v56 = vrot.slane %v2454_v8, 6  ;;  %v2511_v46 = vor.u32 %v2510_v55, %v2507_v23  ;;  %v2446_v8 = vld [vmem:[#allocation3 + $0x58] sm:$0x3f]  ;;  %v6092_v37 = vsub.s32 1, %v5559_v47 }
 0x290   :  { %3326 = vmatprep.subr.bf16.mxu1 %v4401_v28  ;;  %v2381_v28 = vor.u32 %v2380_v51, %v2377_v48  ;;  %v2459_v30 = vshrl.u32 %v2441_v17, 16  ;;  %v2462_v27 = vshll.u32 %v2441_v17, 16  ;;  %v2525_v48 = vrot.slane %v2523_v60, 5 }
 0x291   :  { %v2457_v29 = vor.u32 %v2456_v56, %v2453_v25  ;;  %v2533_v17 = vrot.slane %v2531_v62, 5  ;;  %v2552_v25 = vshll.u32 %v2446_v8, 16 }
 0x292   :  { %v2382_v0 = vsel %vm2239_vm13, %v2373_v21, %v2381_v28  ;;  %v2464_v63 = vrot.slane %v2462_v27, 6  ;;  %v2541_v21 = vshrl.u32 %v5891_v13, 16  ;;  %v2544_v28 = vshll.u32 %v5891_v13, 16 }
 0x293   :  { %3327 = vmatpush1.bf16.msra.mxu1 %v4399_v1  ;;  %v2461_v1 = vrot.slane %v2459_v30, 5  ;;  %v2537_v34 = vor.u32 %v2536_v4, %v2533_v17  ;;  %v2549_v27 = vshrl.u32 %v2446_v8, 16  ;;  %v2554_v26 = vrot.slane %v2552_v25, 6 }
 0x294   :  { %v2543_v56 = vrot.slane %v2541_v21, 5 }
 0x295   :  { %v2465_v11 = vor.u32 %v2464_v63, %v2461_v1  ;;  %v2546_v1 = vrot.slane %v2544_v28, 6  ;;  %v2551_v63 = vrot.slane %v2549_v27, 5 }
 0x296   :  { %3272 = vmatmul.mubr.bf16.gmra.mrb[72].mxu1 %v2328_v6 }
 0x297   :  { %3281 = vmatprep.mubr.bf16.mxu1 %v2427_v3  ;;  %v2466_v6 = vsel %vm2449_vm14, %v2457_v29, %v2465_v11  ;;  %v2443_v3 = vld [vmem:[#allocation3 + $0x28] sm:$0x3f]  ;;  %v2562_v11 = vshll.u32 %v5901_v20, 16  ;;  %v2547_v36 = vor.u32 %v2546_v1, %v2543_v56  ;;  %v2555_v13 = vor.u32 %v2554_v26, %v2551_v63 }
 0x298   :  { %v2495_v10 = vshrl.u32 %v2443_v3, 16  ;;  %v2498_v40 = vshll.u32 %v2443_v3, 16  ;;  %v2447_v29 = vld [vmem:[#allocation3 + $0x68] sm:$0x3f]  ;;  %v2448_v3 = vld [vmem:[#allocation3 + $0x78] sm:$0x3f] }
 0x299   :  { %v2567_v12 = vshrl.u32 %v2447_v29, 16  ;;  %v2570_v18 = vshll.u32 %v2447_v29, 16  ;;  %v2564_v49 = vrot.slane %v2562_v11, 6  ;;  %v2585_v54 = vshrl.u32 %v2448_v3, 16 }
 0x29a   :  { %v2497_v50 = vrot.slane %v2495_v10, 5  ;;  %v2500_v7 = vrot.slane %v2498_v40, 6  ;;  %v2588_v10 = vshll.u32 %v2448_v3, 16  ;;  %v2579_v40 = vrot.slane %v2577_v9, 5 }
 0x29b   :  { %v2569_v61 = vrot.slane %v2567_v12, 5  ;;  %v2572_v2 = vrot.slane %v2570_v18, 6  ;;  %v2565_v16 = vor.u32 %v2564_v49, %v2561_v35 }
 0x29c   :  { %v2501_v52 = vor.u32 %v2500_v7, %v2497_v50  ;;  %v2590_v50 = vrot.slane %v2588_v10, 6 }
 0x29d   :  { %v2573_v20 = vor.u32 %v2572_v2, %v2569_v61 }
 0x29e   :  { %3282 = vmatmul.mubr.bf16.gmra.mrb[76].mxu1 %v2346_v42  ;;  %v2493_v42 = vor.u32 %v2492_v38, %v2489_v39  ;;  %v2582_v38 = vrot.slane %v2580_v59, 6 }
 0x29f   :  { %3291 = vmatprep.mubr.bf16.mxu1 %v2433_v19  ;;  %v2513_v19 = vshrl.u32 %v2444_v44, 16  ;;  %v2574_v39 = vsel %vm2449_vm14, %v2565_v16, %v2573_v20 }
 0x2a0   :  { %v2502_v22 = vsel %vm2449_vm14, %v2493_v42, %v2501_v52  ;;  %v2583_v7 = vor.u32 %v2582_v38, %v2579_v40  ;;  %v5953_v52 = vrot.slane %v2674_v33, %v6091_v32 }
 0x2a1   :  { %v2515_v24 = vrot.slane %v2513_v19, 5  ;;  %v5957_v19 = vrot.slane %v2674_v33, %v6092_v37 }
 0x2a6   :  { %3292 = vmatmul.mubr.bf16.gmra.mrb[80].mxu1 %v2364_v31  ;;  %v2519_v31 = vor.u32 %v2518_v53, %v2515_v24 }
 0x2a7   :  { %3301 = vmatprep.mubr.bf16.mxu1 %v2439_v45  ;;  %v2528_v45 = vrot.slane %v2526_v57, 6 }
 0x2a8   :  { %v2520_v51 = vsel %vm2449_vm14, %v2511_v46, %v2519_v31 }
 0x2a9   :  { %v2529_v30 = vor.u32 %v2528_v45, %v2525_v48 }
 0x2ae   :  { %3302 = vmatmul.mubr.bf16.gmra.mrb[84].mxu1 %v2382_v0  ;;  %v2538_v0 = vsel %vm2449_vm14, %v2529_v30, %v2537_v34 }
 0x2af   :  { %3344 = vmatprep.mubr.bf16.mxu1 %v6090_v5 }
 0x2b6   :  { %3345 = vmatmul.mubr.bf16.vlgmr.msra.gmra.mrb[56].mxu1 %v2466_v6  ;;  %v2556_v6 = vsel %vm2449_vm14, %v2547_v36, %v2555_v13 }
 0x2b7   :  { %3354 = vmatprep.mubr.bf16.mxu1 %v6090_v5 }
 0x2be   :  { %3355 = vmatmul.mubr.bf16.gmra.mrb[60].mxu1 %v2484_v14  ;;  %v2587_v14 = vrot.slane %v2585_v54, 5 }
 0x2bf   :  { %3364 = vmatprep.mubr.bf16.mxu1 %v6090_v5 }
 0x2c0   :  { %v2591_v44 = vor.u32 %v2590_v50, %v2587_v14 }
 0x2c2   :  { %v2592_v42 = vsel %vm2449_vm14, %v2583_v7, %v2591_v44 }
 0x2c6   :  { %3365 = vmatmul.mubr.bf16.gmra.mrb[64].mxu1 %v2502_v22 }
 0x2c7   :  { %3374 = vmatprep.mubr.bf16.mxu1 %v6090_v5 }
 0x2ce   :  { %3375 = vmatmul.mubr.bf16.gmra.mrb[68].mxu1 %v2520_v51 }
 0x2cf   :  { %3384 = vmatprep.mubr.bf16.mxu1 %v6090_v5 }
 0x2d6   :  { %3385 = vmatmul.mubr.bf16.gmra.mrb[72].mxu1 %v2538_v0 }
 0x2d7   :  { %3394 = vmatprep.mubr.bf16.mxu1 %v6090_v5 }
 0x2de   :  { %3395 = vmatmul.mubr.bf16.gmra.mrb[76].mxu1 %v2556_v6 }
 0x2df   :  { %3404 = vmatprep.mubr.bf16.mxu1 %v6090_v5 }
 0x2e6   :  { %3405 = vmatmul.mubr.bf16.gmra.mrb[80].mxu1 %v2574_v39 }
 0x2e7   :  { %3414 = vmatprep.mubr.bf16.mxu1 %v6090_v5 }
 0x2ee   :  { %3415 = vmatmul.mubr.bf16.gmra.mrb[84].mxu1 %v2592_v42 }
 0x389   :  { %v3346_v41 = vpop.f32.mrb[56].mxu1 }
 0x38a   :  { %v3945_v5 = vadd.f32 %v3346_v41, %v5953_v52  ;;  %v3348_v23 = vpop.f32.mrb[57].mxu1 }
 0x38b   :  { %v3946_v22 = vadd.f32 %v3348_v23, %v5957_v19  ;;  %v3350_v55 = vpop.f32.mrb[58].mxu1 }
 0x38c   :  { %v3425_v24 = vmax.f32 %v3945_v5, 0.0  ;;  %v3947_v53 = vadd.f32 %v3350_v55, %v5953_v52  ;;  %v3352_v58 = vpop.f32.mrb[59].mxu1 }
 0x38d   :  { %v3426_v60 = vmax.f32 %v3946_v22, 0.0  ;;  %v3948_v57 = vadd.f32 %v3352_v58, %v5957_v19 }
 0x38e   :  { %v3427_v46 = vmax.f32 %v3947_v53, 0.0 }
 0x38f   :  { %v3857_v31 = vpack.c.bf16 %v3426_v60, %v3425_v24  ;;  %v3428_v62 = vmax.f32 %v3948_v57, 0.0 }
 0x391   :  { %3553 = vst [vmem:[%s6044_s5] sm:$0xff] %v3857_v31  ;;  %v3858_v47 = vpack.c.bf16 %v3428_v62, %v3427_v46  ;;  %v3356_v43 = vpop.f32.mrb[60].mxu1 }
 0x392   :  { %v3949_v48 = vadd.f32 %v3356_v43, %v5953_v52  ;;  %v3358_v51 = vpop.f32.mrb[61].mxu1 }
 0x393   :  { %3554 = vst [vmem:[%s6044_s5 + $0x8] sm:$0xff] %v3858_v47  ;;  %v3950_v45 = vadd.f32 %v3358_v51, %v5957_v19  ;;  %v3360_v17 = vpop.f32.mrb[62].mxu1 }
 0x394   :  { %v3429_v4 = vmax.f32 %v3949_v48, 0.0  ;;  %v3951_v8 = vadd.f32 %v3360_v17, %v5953_v52  ;;  %v3362_v21 = vpop.f32.mrb[63].mxu1 }
 0x395   :  { %v3430_v28 = vmax.f32 %v3950_v45, 0.0  ;;  %v3952_v30 = vadd.f32 %v3362_v21, %v5957_v19 }
 0x396   :  { %v3431_v34 = vmax.f32 %v3951_v8, 0.0 }
 0x397   :  { %v3859_v27 = vpack.c.bf16 %v3430_v28, %v3429_v4  ;;  %v3432_v25 = vmax.f32 %v3952_v30, 0.0 }
 0x399   :  { %3555 = vst [vmem:[%s6044_s5 + $0x10] sm:$0xff] %v3859_v27  ;;  %v3860_v56 = vpack.c.bf16 %v3432_v25, %v3431_v34  ;;  %v3366_v0 = vpop.f32.mrb[64].mxu1 }
 0x39a   :  { %v3953_v1 = vadd.f32 %v3366_v0, %v5953_v52  ;;  %v3368_v63 = vpop.f32.mrb[65].mxu1 }
 0x39b   :  { %3556 = vst [vmem:[%s6044_s5 + $0x18] sm:$0xff] %v3860_v56  ;;  %v3954_v26 = vadd.f32 %v3368_v63, %v5957_v19  ;;  %v3370_v29 = vpop.f32.mrb[66].mxu1 }
 0x39c   :  { %v3433_v15 = vmax.f32 %v3953_v1, 0.0  ;;  %v3955_v11 = vadd.f32 %v3370_v29, %v5953_v52  ;;  %v3372_v36 = vpop.f32.mrb[67].mxu1 }
 0x39d   :  { %v3434_v13 = vmax.f32 %v3954_v26, 0.0  ;;  %v3956_v12 = vadd.f32 %v3372_v36, %v5957_v19 }
 0x39e   :  { %v3435_v18 = vmax.f32 %v3955_v11, 0.0 }
 0x39f   :  { %v3861_v35 = vpack.c.bf16 %v3434_v13, %v3433_v15  ;;  %v3436_v6 = vmax.f32 %v3956_v12, 0.0 }
 0x3a1   :  { %3557 = vst [vmem:[%s6044_s5 + $0x20] sm:$0xff] %v3861_v35  ;;  %v3862_v49 = vpack.c.bf16 %v3436_v6, %v3435_v18  ;;  %v3376_v61 = vpop.f32.mrb[68].mxu1 }
 0x3a2   :  { %v3957_v2 = vadd.f32 %v3376_v61, %v5953_v52  ;;  %v3378_v3 = vpop.f32.mrb[69].mxu1 }
 0x3a3   :  { %3558 = vst [vmem:[%s6044_s5 + $0x28] sm:$0xff] %v3862_v49  ;;  %v3958_v9 = vadd.f32 %v3378_v3, %v5957_v19  ;;  %v3380_v59 = vpop.f32.mrb[70].mxu1 }
 0x3a4   :  { %v3437_v16 = vmax.f32 %v3957_v2, 0.0  ;;  %v3959_v20 = vadd.f32 %v3380_v59, %v5953_v52  ;;  %v3382_v54 = vpop.f32.mrb[71].mxu1 }
 0x3a5   :  { %v3438_v10 = vmax.f32 %v3958_v9, 0.0  ;;  %v3960_v40 = vadd.f32 %v3382_v54, %v5957_v19 }
 0x3a6   :  { %v3439_v39 = vmax.f32 %v3959_v20, 0.0 }
 0x3a7   :  { %v3863_v38 = vpack.c.bf16 %v3438_v10, %v3437_v16  ;;  %v3440_v14 = vmax.f32 %v3960_v40, 0.0 }
 0x3a9   :  { %3559 = vst [vmem:[%s6044_s5 + $0x30] sm:$0xff] %v3863_v38  ;;  %v3864_v50 = vpack.c.bf16 %v3440_v14, %v3439_v39  ;;  %v3386_v7 = vpop.f32.mrb[72].mxu1 }
 0x3aa   :  { %v3961_v44 = vadd.f32 %v3386_v7, %v5953_v52  ;;  %v3388_v42 = vpop.f32.mrb[73].mxu1 }
 0x3ab   :  { %3560 = vst [vmem:[%s6044_s5 + $0x38] sm:$0xff] %v3864_v50  ;;  %v3962_v33 = vadd.f32 %v3388_v42, %v5957_v19  ;;  %v3390_v32 = vpop.f32.mrb[74].mxu1 }
 0x3ac   :  { %v3441_v37 = vmax.f32 %v3961_v44, 0.0  ;;  %v3963_v41 = vadd.f32 %v3390_v32, %v5953_v52  ;;  %v3392_v5 = vpop.f32.mrb[75].mxu1 }
 0x3ad   :  { %v3442_v23 = vmax.f32 %v3962_v33, 0.0  ;;  %v3964_v22 = vadd.f32 %v3392_v5, %v5957_v19 }
 0x3ae   :  { %v3443_v55 = vmax.f32 %v3963_v41, 0.0 }
 0x3af   :  { %v3865_v24 = vpack.c.bf16 %v3442_v23, %v3441_v37  ;;  %v3444_v53 = vmax.f32 %v3964_v22, 0.0 }
 0x3b1   :  { %3561 = vst [vmem:[%s6044_s5 + $0x40] sm:$0xff] %v3865_v24  ;;  %v3866_v58 = vpack.c.bf16 %v3444_v53, %v3443_v55  ;;  %v3396_v60 = vpop.f32.mrb[76].mxu1 }
 0x3b2   :  { %v3965_v57 = vadd.f32 %v3396_v60, %v5953_v52  ;;  %v3398_v46 = vpop.f32.mrb[77].mxu1 }
 0x3b3   :  { %3562 = vst [vmem:[%s6044_s5 + $0x48] sm:$0xff] %v3866_v58  ;;  %v3966_v31 = vadd.f32 %v3398_v46, %v5957_v19  ;;  %v3400_v62 = vpop.f32.mrb[78].mxu1 }
 0x3b4   :  { %v3445_v47 = vmax.f32 %v3965_v57, 0.0  ;;  %v3967_v43 = vadd.f32 %v3400_v62, %v5953_v52  ;;  %v3402_v48 = vpop.f32.mrb[79].mxu1 }
 0x3b5   :  { %v3446_v51 = vmax.f32 %v3966_v31, 0.0  ;;  %v3968_v45 = vadd.f32 %v3402_v48, %v5957_v19 }
 0x3b6   :  { %v3447_v17 = vmax.f32 %v3967_v43, 0.0 }
 0x3b7   :  { %v3867_v4 = vpack.c.bf16 %v3446_v51, %v3445_v47  ;;  %v3448_v8 = vmax.f32 %v3968_v45, 0.0 }
 0x3b9   :  { %3563 = vst [vmem:[%s6044_s5 + $0x50] sm:$0xff] %v3867_v4  ;;  %v3868_v21 = vpack.c.bf16 %v3448_v8, %v3447_v17  ;;  %v3406_v28 = vpop.f32.mrb[80].mxu1 }
 0x3ba   :  { %v3969_v30 = vadd.f32 %v3406_v28, %v5953_v52  ;;  %v3408_v34 = vpop.f32.mrb[81].mxu1 }
 0x3bb   :  { %3564 = vst [vmem:[%s6044_s5 + $0x58] sm:$0xff] %v3868_v21  ;;  %v3970_v27 = vadd.f32 %v3408_v34, %v5957_v19  ;;  %v3410_v25 = vpop.f32.mrb[82].mxu1 }
 0x3bc   :  { %v3449_v56 = vmax.f32 %v3969_v30, 0.0  ;;  %v3971_v0 = vadd.f32 %v3410_v25, %v5953_v52  ;;  %v3412_v1 = vpop.f32.mrb[83].mxu1 }
 0x3bd   :  { %v3450_v63 = vmax.f32 %v3970_v27, 0.0  ;;  %v3972_v26 = vadd.f32 %v3412_v1, %v5957_v19 }
 0x3be   :  { %v3451_v29 = vmax.f32 %v3971_v0, 0.0 }
 0x3bf   :  { %v3869_v15 = vpack.c.bf16 %v3450_v63, %v3449_v56  ;;  %v3452_v11 = vmax.f32 %v3972_v26, 0.0 }
 0x3c1   :  { %3565 = vst [vmem:[%s6044_s5 + $0x60] sm:$0xff] %v3869_v15  ;;  %v3870_v36 = vpack.c.bf16 %v3452_v11, %v3451_v29  ;;  %v3416_v13 = vpop.f32.mrb[84].mxu1 }
 0x3c2   :  { %v3973_v12 = vadd.f32 %v3416_v13, %v5953_v52  ;;  %v3418_v18 = vpop.f32.mrb[85].mxu1 }
 0x3c3   :  { %3566 = vst [vmem:[%s6044_s5 + $0x68] sm:$0xff] %v3870_v36  ;;  %v3974_v35 = vadd.f32 %v3418_v18, %v5957_v19  ;;  %v3420_v6 = vpop.f32.mrb[86].mxu1 }
 0x3c4   :  { %v3453_v49 = vmax.f32 %v3973_v12, 0.0  ;;  %v3975_v61 = vadd.f32 %v3420_v6, %v5953_v52  ;;  %v3422_v2 = vpop.f32.mrb[87].mxu1 }
 0x3c5   :  { %v3454_v3 = vmax.f32 %v3974_v35, 0.0  ;;  %v3976_v9 = vadd.f32 %v3422_v2, %v5957_v19 }
 0x3c6   :  { %v3455_v59 = vmax.f32 %v3975_v61, 0.0 }
 0x3c7   :  { %v3871_v16 = vpack.c.bf16 %v3454_v3, %v3453_v49  ;;  %v3456_v20 = vmax.f32 %v3976_v9, 0.0 }
 0x3c9   :  { %3567 = vst [vmem:[%s6044_s5 + $0x70] sm:$0xff] %v3871_v16  ;;  %v3872_v54 = vpack.c.bf16 %v3456_v20, %v3455_v59 }
 0x3cb   :  { %3568 = vst [vmem:[%s6044_s5 + $0x78] sm:$0xff] %v3872_v54 }

</bundles_post_ra>
